<compile_context>
chip_gen: v7x
topology: tpu7x:2x2x1
jax: 0.10.0
libtpu: 0.0.40
codegen_flags: <defaults>
</compile_context>

<pallas_src>
import jax
import jax.numpy as jnp
from jax import lax
from jax.experimental import pallas as pl
from jax.experimental.pallas import tpu as pltpu


def _dwconv_kernel(x_ref, w_ref, b_ref, o_ref, xpad_ref):
    # x_ref:    (W, H, Cb)   input block (batch dim squeezed by BlockSpec)
    # w_ref:    (3, 3, Cb)   depthwise filter (kh, kw, channel)
    # b_ref:    (1, Cb)      bias
    # o_ref:    (W, H, Cb)   output block
    # xpad_ref: (W+2, H, Cb) f32 scratch, zero halo along W only
    W, H, Cb = o_ref.shape

    # --- W-halo'd tile in VMEM -------------------------------------------------
    # Border-only zeroing (interior is fully overwritten every step).
    zero_slice = jnp.zeros((H, Cb), jnp.float32)
    xpad_ref[0] = zero_slice
    xpad_ref[W + 1] = zero_slice
    # Aligned bulk copy: offset only along the leading (non-tiled) W axis; this is also
    # the single bf16->f32 cast site.
    xpad_ref[pl.ds(1, W)] = x_ref[...].astype(jnp.float32)

    # --- Hoisted per-tap weights ------------------------------------------------
    # The H-direction halo is folded into the weights: the +-1 sublane-shifted taps are
    # built with pltpu.roll and the wrapped edge row is pre-zeroed in the weight.
    row = lax.broadcasted_iota(jnp.int32, (H, 1), 0)
    mask_top = (row > 0).astype(jnp.float32)      # kills wrapped row of roll(+1)
    mask_bot = (row < H - 1).astype(jnp.float32)  # kills wrapped row of roll(-1)

    w_c, w_l, w_r = [], [], []
    for kh in range(3):
        w_c.append(w_ref[kh, pl.ds(1, 1), :].astype(jnp.float32))             # (1, Cb)
        w_l.append(w_ref[kh, pl.ds(0, 1), :].astype(jnp.float32) * mask_top)  # (H, Cb)
        w_r.append(w_ref[kh, pl.ds(2, 1), :].astype(jnp.float32) * mask_bot)  # (H, Cb)

    bias_full = jnp.broadcast_to(b_ref[...].astype(jnp.float32), (H, Cb))     # hoisted

    # --- Stripe-wise accumulation over W rows -----------------------------------
    def body(w, carry):
        acc = bias_full                                  # bias-initialized accumulator
        for kh in range(3):
            slab = xpad_ref[w + kh]                      # (H, Cb) aligned f32 load
            acc = acc + slab * w_c[kh]
            acc = acc + pltpu.roll(slab, shift=1, axis=0) * w_l[kh]
            acc = acc + pltpu.roll(slab, shift=H - 1, axis=0) * w_r[kh]
        o_ref[w] = acc.astype(o_ref.dtype)
        return carry

    lax.fori_loop(0, W, body, 0, unroll=(W <= 32))


def _round_up(x, m):
    return (x + m - 1) // m * m


def dwconv_pallas(x, H, W, weight_hwc, bias, *, vmem_budget_bytes=36 * 1024 * 1024):
    """Depthwise 3x3 / stride 1 / pad 1 conv matching DWConv.forward.

    x:          (B, N, C) with N == H*W (W-major, matching `view(B, C, W, H)`).
    weight_hwc: (3, 3, C) with weight_hwc[kh, kw, c] == torch weight[c, 0, kh, kw].
    bias:       (C,)
    """
    B, N, C = x.shape
    assert N == H * W, "sequence length must equal H*W"

    # Lane-dense channels: pad C to a multiple of 128 so every store is an unmasked vst.
    LANE = 128
    C_pad = _round_up(C, LANE)
    if C_pad != C:
        x = jnp.pad(x, ((0, 0), (0, 0), (0, C_pad - C)))
        weight_hwc = jnp.pad(weight_hwc, ((0, 0), (0, 0), (0, C_pad - C)))
        bias = jnp.pad(bias, ((0, C_pad - C),))

    # (B, N, C) -> channels-last image (B, W, H, C): pure reshape, no extra HBM pass.
    img = x.reshape(B, W, H, C_pad)

    itemsize = x.dtype.itemsize
    p_itemsize = max(itemsize, weight_hwc.dtype.itemsize)

    def footprint(cb):  # double-buffered in/out blocks + params + f32 halo scratch
        blk = W * H * cb * itemsize
        params = (9 * cb + cb) * p_itemsize
        return 2 * (2 * blk + params) + (W + 2) * H * cb * 4

    Cb = LANE
    for cand in range(C_pad, LANE - 1, -LANE):
        if C_pad % cand == 0 and footprint(cand) <= vmem_budget_bytes:
            Cb = cand
            break
    n_cblk = C_pad // Cb

    vmem_limit = int(min(60 * 1024 * 1024, max(16 * 1024 * 1024, 2 * footprint(Cb))))

    out = pl.pallas_call(
        _dwconv_kernel,
        out_shape=jax.ShapeDtypeStruct((B, W, H, C_pad), x.dtype),
        # Grid (channel-block, batch): batch is the fast axis, so filter/bias block
        # indices stay constant across consecutive steps.
        grid=(n_cblk, B),
        in_specs=[
            pl.BlockSpec((None, W, H, Cb), lambda c, b: (b, 0, 0, c)),
            pl.BlockSpec((3, 3, Cb), lambda c, b: (0, 0, c)),
            pl.BlockSpec((1, Cb), lambda c, b: (0, c)),
        ],
        out_specs=pl.BlockSpec((None, W, H, Cb), lambda c, b: (b, 0, 0, c)),
        scratch_shapes=[pltpu.VMEM((W + 2, H, Cb), jnp.float32)],
        compiler_params=pltpu.CompilerParams(
            dimension_semantics=("parallel", "parallel"),
            vmem_limit_bytes=vmem_limit,
        ),
    )(img, weight_hwc, bias.reshape(1, C_pad))

    out = out.reshape(B, N, C_pad)
    if C_pad != C:
        out = out[:, :, :C]
    return out


def dwconv_reference(x, H, W, weight_hwc, bias):
    """Pure-JAX reference: depthwise conv via lax.conv_general_dilated (f32)."""
    B, N, C = x.shape
    img = x.reshape(B, W, H, C).astype(jnp.float32)
    rhs = weight_hwc.astype(jnp.float32).reshape(3, 3, 1, C)
    out = lax.conv_general_dilated(
        img, rhs, window_strides=(1, 1), padding=((1, 1), (1, 1)),
        dimension_numbers=("NHWC", "HWIO", "NHWC"),
        feature_group_count=C, precision=lax.Precision.HIGHEST,
    ) + bias.astype(jnp.float32)
    return out.astype(x.dtype).reshape(B, N, C)


if __name__ == "__main__":
    # Case 1: f32, square spatial, C a multiple of 128.
    B, H, W, C = 2, 16, 16, 256
    N = H * W
    kx, kw, kb = jax.random.split(jax.random.PRNGKey(0), 3)
    x = jax.random.normal(kx, (B, N, C), dtype=jnp.float32)
    # PyTorch weight (C, 1, 3, 3) stored here as (3, 3, C).
    weight_hwc = 0.1 * jax.random.normal(kw, (3, 3, C), dtype=jnp.float32)
    bias = 0.1 * jax.random.normal(kb, (C,), dtype=jnp.float32)

    y = jax.block_until_ready(dwconv_pallas(x, H, W, weight_hwc, bias))
    y_ref = dwconv_reference(x, H, W, weight_hwc, bias)
    assert y.shape == (B, N, C)
    assert jnp.allclose(y, y_ref, atol=1e-4, rtol=1e-4)

    # Case 2: bf16 activations with f32 params, non-square H != W (exercises the W-major
    # spatial ordering implied by `view(B, C, W, H)`).
    B2, H2, W2, C2 = 2, 8, 24, 128
    N2 = H2 * W2
    k2x, k2w, k2b = jax.random.split(jax.random.PRNGKey(1), 3)
    x2 = jax.random.normal(k2x, (B2, N2, C2), dtype=jnp.float32).astype(jnp.bfloat16)
    w2 = 0.1 * jax.random.normal(k2w, (3, 3, C2), dtype=jnp.float32)
    b2 = 0.1 * jax.random.normal(k2b, (C2,), dtype=jnp.float32)

    y2 = jax.block_until_ready(dwconv_pallas(x2, H2, W2, w2, b2))
    y2_ref = dwconv_reference(x2, H2, W2, w2, b2)
    assert y2.shape == (B2, N2, C2)
    assert jnp.allclose(y2.astype(jnp.float32), y2_ref.astype(jnp.float32),
                        atol=3e-2, rtol=3e-2)

    print("KERNEL_OK")
</pallas_src>

<mosaic_0001>
module attributes {stable_mosaic.version = 11 : i64} {
  func.func @_dwconv_kernel(%arg0: i32, %arg1: i32, %arg2: memref<1x16x16x256xf32, #tpu.memory_space<vmem>>, %arg3: memref<3x3x256xf32, #tpu.memory_space<vmem>>, %arg4: memref<1x256xf32, #tpu.memory_space<vmem>>, %arg5: memref<1x16x16x256xf32, #tpu.memory_space<vmem>>, %arg6: memref<18x16x256xf32, #tpu.memory_space<vmem>>) attributes {dimension_semantics = [#tpu.dimension_semantics<parallel>, #tpu.dimension_semantics<parallel>], iteration_bounds = array<i64: 1, 2>, scalar_prefetch = 0 : i64, scratch_operands = 1 : i64, tpu.core_type = #tpu.core_type<tc>, window_params = [{transform_indices = @transform_0, window_bounds = array<i64: 1, 16, 16, 256>}, {transform_indices = @transform_1, window_bounds = array<i64: 3, 3, 256>}, {transform_indices = @transform_2, window_bounds = array<i64: 1, 256>}, {transform_indices = @transform_3, window_bounds = array<i64: 1, 16, 16, 256>}]} {
    %cst = arith.constant 0.000000e+00 : f32
    %0 = vector.broadcast %cst : f32 to vector<16x256xf32>
    %c0 = arith.constant 0 : index
    %c0_0 = arith.constant 0 : index
    %c0_1 = arith.constant 0 : index
    %1 = vector.load %arg6[%c0, %c0_0, %c0_1] : memref<18x16x256xf32, #tpu.memory_space<vmem>>, vector<1x16x256xf32>
    %2 = vector.shape_cast %1 : vector<1x16x256xf32> to vector<16x256xf32>
    %3 = vector.shape_cast %0 : vector<16x256xf32> to vector<1x16x256xf32>
    tpu.vector_store %arg6[%c0, %c0_0, %c0_1], %3 {strides = array<i32>} : memref<18x16x256xf32, #tpu.memory_space<vmem>>, vector<1x16x256xf32>,
    %c17 = arith.constant 17 : index
    %c0_2 = arith.constant 0 : index
    %c0_3 = arith.constant 0 : index
    %4 = vector.load %arg6[%c17, %c0_2, %c0_3] : memref<18x16x256xf32, #tpu.memory_space<vmem>>, vector<1x16x256xf32>
    %5 = vector.shape_cast %4 : vector<1x16x256xf32> to vector<16x256xf32>
    %6 = vector.shape_cast %0 : vector<16x256xf32> to vector<1x16x256xf32>
    tpu.vector_store %arg6[%c17, %c0_2, %c0_3], %6 {strides = array<i32>} : memref<18x16x256xf32, #tpu.memory_space<vmem>>, vector<1x16x256xf32>,
    %c0_4 = arith.constant 0 : index
    %c0_5 = arith.constant 0 : index
    %c0_6 = arith.constant 0 : index
    %c0_7 = arith.constant 0 : index
    %7 = vector.load %arg2[%c0_4, %c0_5, %c0_6, %c0_7] : memref<1x16x16x256xf32, #tpu.memory_space<vmem>>, vector<1x16x16x256xf32>
    %8 = vector.shape_cast %7 : vector<1x16x16x256xf32> to vector<16x16x256xf32>
    %c1 = arith.constant 1 : index
    %c0_8 = arith.constant 0 : index
    %c0_9 = arith.constant 0 : index
    %9 = vector.load %arg6[%c1, %c0_8, %c0_9] : memref<18x16x256xf32, #tpu.memory_space<vmem>>, vector<16x16x256xf32>
    tpu.vector_store %arg6[%c1, %c0_8, %c0_9], %8 {strides = array<i32>} : memref<18x16x256xf32, #tpu.memory_space<vmem>>, vector<16x16x256xf32>,
    %10 = tpu.iota {dimensions = array<i32: 0>} : vector<16x1xi32>
    %c0_i32 = arith.constant 0 : i32
    %11 = vector.broadcast %c0_i32 : i32 to vector<16x1xi32>
    %12 = arith.cmpi sgt, %10, %11 : vector<16x1xi32>
    %13 = arith.extui %12 : vector<16x1xi1> to vector<16x1xi32>
    %14 = arith.sitofp %13 : vector<16x1xi32> to vector<16x1xf32>
    %c15_i32 = arith.constant 15 : i32
    %15 = vector.broadcast %c15_i32 : i32 to vector<16x1xi32>
    %16 = arith.cmpi slt, %10, %15 : vector<16x1xi32>
    %17 = arith.extui %16 : vector<16x1xi1> to vector<16x1xi32>
    %18 = arith.sitofp %17 : vector<16x1xi32> to vector<16x1xf32>
    %c0_10 = arith.constant 0 : index
    %c1_11 = arith.constant 1 : index
    %c0_12 = arith.constant 0 : index
    %19 = vector.load %arg3[%c0_10, %c1_11, %c0_12] : memref<3x3x256xf32, #tpu.memory_space<vmem>>, vector<1x1x256xf32>
    %20 = vector.shape_cast %19 : vector<1x1x256xf32> to vector<1x256xf32>
    %c0_13 = arith.constant 0 : index
    %c0_14 = arith.constant 0 : index
    %c0_15 = arith.constant 0 : index
    %21 = vector.load %arg3[%c0_13, %c0_14, %c0_15] : memref<3x3x256xf32, #tpu.memory_space<vmem>>, vector<1x1x256xf32>
    %22 = vector.shape_cast %21 : vector<1x1x256xf32> to vector<1x256xf32>
    %23 = vector.broadcast %22 : vector<1x256xf32> to vector<16x256xf32>
    %24 = vector.broadcast %14 : vector<16x1xf32> to vector<16x256xf32>
    %25 = arith.mulf %23, %24 : vector<16x256xf32>
    %c0_16 = arith.constant 0 : index
    %c2 = arith.constant 2 : index
    %c0_17 = arith.constant 0 : index
    %26 = vector.load %arg3[%c0_16, %c2, %c0_17] : memref<3x3x256xf32, #tpu.memory_space<vmem>>, vector<1x1x256xf32>
    %27 = vector.shape_cast %26 : vector<1x1x256xf32> to vector<1x256xf32>
    %28 = vector.broadcast %27 : vector<1x256xf32> to vector<16x256xf32>
    %29 = vector.broadcast %18 : vector<16x1xf32> to vector<16x256xf32>
    %30 = arith.mulf %28, %29 : vector<16x256xf32>
    %c1_18 = arith.constant 1 : index
    %c1_19 = arith.constant 1 : index
    %c0_20 = arith.constant 0 : index
    %31 = vector.load %arg3[%c1_18, %c1_19, %c0_20] : memref<3x3x256xf32, #tpu.memory_space<vmem>>, vector<1x1x256xf32>
    %32 = vector.shape_cast %31 : vector<1x1x256xf32> to vector<1x256xf32>
    %c1_21 = arith.constant 1 : index
    %c0_22 = arith.constant 0 : index
    %c0_23 = arith.constant 0 : index
    %33 = vector.load %arg3[%c1_21, %c0_22, %c0_23] : memref<3x3x256xf32, #tpu.memory_space<vmem>>, vector<1x1x256xf32>
    %34 = vector.shape_cast %33 : vector<1x1x256xf32> to vector<1x256xf32>
    %35 = vector.broadcast %34 : vector<1x256xf32> to vector<16x256xf32>
    %36 = vector.broadcast %14 : vector<16x1xf32> to vector<16x256xf32>
    %37 = arith.mulf %35, %36 : vector<16x256xf32>
    %c1_24 = arith.constant 1 : index
    %c2_25 = arith.constant 2 : index
    %c0_26 = arith.constant 0 : index
    %38 = vector.load %arg3[%c1_24, %c2_25, %c0_26] : memref<3x3x256xf32, #tpu.memory_space<vmem>>, vector<1x1x256xf32>
    %39 = vector.shape_cast %38 : vector<1x1x256xf32> to vector<1x256xf32>
    %40 = vector.broadcast %39 : vector<1x256xf32> to vector<16x256xf32>
    %41 = vector.broadcast %18 : vector<16x1xf32> to vector<16x256xf32>
    %42 = arith.mulf %40, %41 : vector<16x256xf32>
    %c2_27 = arith.constant 2 : index
    %c1_28 = arith.constant 1 : index
    %c0_29 = arith.constant 0 : index
    %43 = vector.load %arg3[%c2_27, %c1_28, %c0_29] : memref<3x3x256xf32, #tpu.memory_space<vmem>>, vector<1x1x256xf32>
    %44 = vector.shape_cast %43 : vector<1x1x256xf32> to vector<1x256xf32>
    %c2_30 = arith.constant 2 : index
    %c0_31 = arith.constant 0 : index
    %c0_32 = arith.constant 0 : index
    %45 = vector.load %arg3[%c2_30, %c0_31, %c0_32] : memref<3x3x256xf32, #tpu.memory_space<vmem>>, vector<1x1x256xf32>
    %46 = vector.shape_cast %45 : vector<1x1x256xf32> to vector<1x256xf32>
    %47 = vector.broadcast %46 : vector<1x256xf32> to vector<16x256xf32>
    %48 = vector.broadcast %14 : vector<16x1xf32> to vector<16x256xf32>
    %49 = arith.mulf %47, %48 : vector<16x256xf32>
    %c2_33 = arith.constant 2 : index
    %c2_34 = arith.constant 2 : index
    %c0_35 = arith.constant 0 : index
    %50 = vector.load %arg3[%c2_33, %c2_34, %c0_35] : memref<3x3x256xf32, #tpu.memory_space<vmem>>, vector<1x1x256xf32>
    %51 = vector.shape_cast %50 : vector<1x1x256xf32> to vector<1x256xf32>
    %52 = vector.broadcast %51 : vector<1x256xf32> to vector<16x256xf32>
    %53 = vector.broadcast %18 : vector<16x1xf32> to vector<16x256xf32>
    %54 = arith.mulf %52, %53 : vector<16x256xf32>
    %c0_36 = arith.constant 0 : index
    %c0_37 = arith.constant 0 : index
    %55 = vector.load %arg4[%c0_36, %c0_37] : memref<1x256xf32, #tpu.memory_space<vmem>>, vector<1x256xf32>
    %56 = vector.shape_cast %55 : vector<1x256xf32> to vector<1x256xf32>
    %57 = vector.broadcast %56 : vector<1x256xf32> to vector<16x256xf32>
    %c0_i32_38 = arith.constant 0 : i32
    %c0_i32_39 = arith.constant 0 : i32
    %58 = arith.addi %c0_i32_38, %c0_i32_39 : i32
    %59 = arith.index_cast %58 : i32 to index
    %c0_40 = arith.constant 0 : index
    %c0_41 = arith.constant 0 : index
    %60 = vector.load %arg6[%59, %c0_40, %c0_41] : memref<18x16x256xf32, #tpu.memory_space<vmem>>, vector<1x16x256xf32>
    %61 = vector.shape_cast %60 : vector<1x16x256xf32> to vector<16x256xf32>
    %62 = vector.broadcast %20 : vector<1x256xf32> to vector<16x256xf32>
    %63 = arith.mulf %61, %62 : vector<16x256xf32>
    %64 = arith.addf %57, %63 : vector<16x256xf32>
    %c1_i32 = arith.constant 1 : i32
    %65 = tpu.dynamic_rotate %61 by %c1_i32 dim 0 : vector<16x256xf32>, i32 -> vector<16x256xf32>
    %66 = arith.mulf %65, %25 : vector<16x256xf32>
    %67 = arith.addf %64, %66 : vector<16x256xf32>
    %c15_i32_42 = arith.constant 15 : i32
    %68 = tpu.dynamic_rotate %61 by %c15_i32_42 dim 0 : vector<16x256xf32>, i32 -> vector<16x256xf32>
    %69 = arith.mulf %68, %30 : vector<16x256xf32>
    %70 = arith.addf %67, %69 : vector<16x256xf32>
    %c1_i32_43 = arith.constant 1 : i32
    %71 = arith.addi %c0_i32_38, %c1_i32_43 : i32
    %72 = arith.index_cast %71 : i32 to index
    %c0_44 = arith.constant 0 : index
    %c0_45 = arith.constant 0 : index
    %73 = vector.load %arg6[%72, %c0_44, %c0_45] : memref<18x16x256xf32, #tpu.memory_space<vmem>>, vector<1x16x256xf32>
    %74 = vector.shape_cast %73 : vector<1x16x256xf32> to vector<16x256xf32>
    %75 = vector.broadcast %32 : vector<1x256xf32> to vector<16x256xf32>
    %76 = arith.mulf %74, %75 : vector<16x256xf32>
    %77 = arith.addf %70, %76 : vector<16x256xf32>
    %c1_i32_46 = arith.constant 1 : i32
    %78 = tpu.dynamic_rotate %74 by %c1_i32_46 dim 0 : vector<16x256xf32>, i32 -> vector<16x256xf32>
    %79 = arith.mulf %78, %37 : vector<16x256xf32>
    %80 = arith.addf %77, %79 : vector<16x256xf32>
    %c15_i32_47 = arith.constant 15 : i32
    %81 = tpu.dynamic_rotate %74 by %c15_i32_47 dim 0 : vector<16x256xf32>, i32 -> vector<16x256xf32>
    %82 = arith.mulf %81, %42 : vector<16x256xf32>
    %83 = arith.addf %80, %82 : vector<16x256xf32>
    %c2_i32 = arith.constant 2 : i32
    %84 = arith.addi %c0_i32_38, %c2_i32 : i32
    %85 = arith.index_cast %84 : i32 to index
    %c0_48 = arith.constant 0 : index
    %c0_49 = arith.constant 0 : index
    %86 = vector.load %arg6[%85, %c0_48, %c0_49] : memref<18x16x256xf32, #tpu.memory_space<vmem>>, vector<1x16x256xf32>
    %87 = vector.shape_cast %86 : vector<1x16x256xf32> to vector<16x256xf32>
    %88 = vector.broadcast %44 : vector<1x256xf32> to vector<16x256xf32>
    %89 = arith.mulf %87, %88 : vector<16x256xf32>
    %90 = arith.addf %83, %89 : vector<16x256xf32>
    %c1_i32_50 = arith.constant 1 : i32
    %91 = tpu.dynamic_rotate %87 by %c1_i32_50 dim 0 : vector<16x256xf32>, i32 -> vector<16x256xf32>
    %92 = arith.mulf %91, %49 : vector<16x256xf32>
    %93 = arith.addf %90, %92 : vector<16x256xf32>
    %c15_i32_51 = arith.constant 15 : i32
    %94 = tpu.dynamic_rotate %87 by %c15_i32_51 dim 0 : vector<16x256xf32>, i32 -> vector<16x256xf32>
    %95 = arith.mulf %94, %54 : vector<16x256xf32>
    %96 = arith.addf %93, %95 : vector<16x256xf32>
    %c0_52 = arith.constant 0 : index
    %97 = arith.index_cast %c0_i32_38 : i32 to index
    %c0_53 = arith.constant 0 : index
    %c0_54 = arith.constant 0 : index
    %98 = vector.load %arg5[%c0_52, %97, %c0_53, %c0_54] : memref<1x16x16x256xf32, #tpu.memory_space<vmem>>, vector<1x1x16x256xf32>
    %99 = vector.shape_cast %98 : vector<1x1x16x256xf32> to vector<16x256xf32>
    %100 = vector.shape_cast %96 : vector<16x256xf32> to vector<1x1x16x256xf32>
    tpu.vector_store %arg5[%c0_52, %97, %c0_53, %c0_54], %100 {strides = array<i32>} : memref<1x16x16x256xf32, #tpu.memory_space<vmem>>, vector<1x1x16x256xf32>,
    %c1_i32_55 = arith.constant 1 : i32
    %c0_i32_56 = arith.constant 0 : i32
    %101 = arith.addi %c1_i32_55, %c0_i32_56 : i32
    %102 = arith.index_cast %101 : i32 to index
    %c0_57 = arith.constant 0 : index
    %c0_58 = arith.constant 0 : index
    %103 = vector.load %arg6[%102, %c0_57, %c0_58] : memref<18x16x256xf32, #tpu.memory_space<vmem>>, vector<1x16x256xf32>
    %104 = vector.shape_cast %103 : vector<1x16x256xf32> to vector<16x256xf32>
    %105 = vector.broadcast %20 : vector<1x256xf32> to vector<16x256xf32>
    %106 = arith.mulf %104, %105 : vector<16x256xf32>
    %107 = arith.addf %57, %106 : vector<16x256xf32>
    %c1_i32_59 = arith.constant 1 : i32
    %108 = tpu.dynamic_rotate %104 by %c1_i32_59 dim 0 : vector<16x256xf32>, i32 -> vector<16x256xf32>
    %109 = arith.mulf %108, %25 : vector<16x256xf32>
    %110 = arith.addf %107, %109 : vector<16x256xf32>
    %c15_i32_60 = arith.constant 15 : i32
    %111 = tpu.dynamic_rotate %104 by %c15_i32_60 dim 0 : vector<16x256xf32>, i32 -> vector<16x256xf32>
    %112 = arith.mulf %111, %30 : vector<16x256xf32>
    %113 = arith.addf %110, %112 : vector<16x256xf32>
    %c1_i32_61 = arith.constant 1 : i32
    %114 = arith.addi %c1_i32_55, %c1_i32_61 : i32
    %115 = arith.index_cast %114 : i32 to index
    %c0_62 = arith.constant 0 : index
    %c0_63 = arith.constant 0 : index
    %116 = vector.load %arg6[%115, %c0_62, %c0_63] : memref<18x16x256xf32, #tpu.memory_space<vmem>>, vector<1x16x256xf32>
    %117 = vector.shape_cast %116 : vector<1x16x256xf32> to vector<16x256xf32>
    %118 = vector.broadcast %32 : vector<1x256xf32> to vector<16x256xf32>
    %119 = arith.mulf %117, %118 : vector<16x256xf32>
    %120 = arith.addf %113, %119 : vector<16x256xf32>
    %c1_i32_64 = arith.constant 1 : i32
    %121 = tpu.dynamic_rotate %117 by %c1_i32_64 dim 0 : vector<16x256xf32>, i32 -> vector<16x256xf32>
    %122 = arith.mulf %121, %37 : vector<16x256xf32>
    %123 = arith.addf %120, %122 : vector<16x256xf32>
    %c15_i32_65 = arith.constant 15 : i32
    %124 = tpu.dynamic_rotate %117 by %c15_i32_65 dim 0 : vector<16x256xf32>, i32 -> vector<16x256xf32>
    %125 = arith.mulf %124, %42 : vector<16x256xf32>
    %126 = arith.addf %123, %125 : vector<16x256xf32>
    %c2_i32_66 = arith.constant 2 : i32
    %127 = arith.addi %c1_i32_55, %c2_i32_66 : i32
    %128 = arith.index_cast %127 : i32 to index
    %c0_67 = arith.constant 0 : index
    %c0_68 = arith.constant 0 : index
    %129 = vector.load %arg6[%128, %c0_67, %c0_68] : memref<18x16x256xf32, #tpu.memory_space<vmem>>, vector<1x16x256xf32>
    %130 = vector.shape_cast %129 : vector<1x16x256xf32> to vector<16x256xf32>
    %131 = vector.broadcast %44 : vector<1x256xf32> to vector<16x256xf32>
    %132 = arith.mulf %130, %131 : vector<16x256xf32>
    %133 = arith.addf %126, %132 : vector<16x256xf32>
    %c1_i32_69 = arith.constant 1 : i32
    %134 = tpu.dynamic_rotate %130 by %c1_i32_69 dim 0 : vector<16x256xf32>, i32 -> vector<16x256xf32>
    %135 = arith.mulf %134, %49 : vector<16x256xf32>
    %136 = arith.addf %133, %135 : vector<16x256xf32>
    %c15_i32_70 = arith.constant 15 : i32
    %137 = tpu.dynamic_rotate %130 by %c15_i32_70 dim 0 : vector<16x256xf32>, i32 -> vector<16x256xf32>
    %138 = arith.mulf %137, %54 : vector<16x256xf32>
    %139 = arith.addf %136, %138 : vector<16x256xf32>
    %c0_71 = arith.constant 0 : index
    %140 = arith.index_cast %c1_i32_55 : i32 to index
    %c0_72 = arith.constant 0 : index
    %c0_73 = arith.constant 0 : index
    %141 = vector.load %arg5[%c0_71, %140, %c0_72, %c0_73] : memref<1x16x16x256xf32, #tpu.memory_space<vmem>>, vector<1x1x16x256xf32>
    %142 = vector.shape_cast %141 : vector<1x1x16x256xf32> to vector<16x256xf32>
    %143 = vector.shape_cast %139 : vector<16x256xf32> to vector<1x1x16x256xf32>
    tpu.vector_store %arg5[%c0_71, %140, %c0_72, %c0_73], %143 {strides = array<i32>} : memref<1x16x16x256xf32, #tpu.memory_space<vmem>>, vector<1x1x16x256xf32>,
    %c2_i32_74 = arith.constant 2 : i32
    %c0_i32_75 = arith.constant 0 : i32
    %144 = arith.addi %c2_i32_74, %c0_i32_75 : i32
    %145 = arith.index_cast %144 : i32 to index
    %c0_76 = arith.constant 0 : index
    %c0_77 = arith.constant 0 : index
    %146 = vector.load %arg6[%145, %c0_76, %c0_77] : memref<18x16x256xf32, #tpu.memory_space<vmem>>, vector<1x16x256xf32>
    %147 = vector.shape_cast %146 : vector<1x16x256xf32> to vector<16x256xf32>
    %148 = vector.broadcast %20 : vector<1x256xf32> to vector<16x256xf32>
    %149 = arith.mulf %147, %148 : vector<16x256xf32>
    %150 = arith.addf %57, %149 : vector<16x256xf32>
    %c1_i32_78 = arith.constant 1 : i32
    %151 = tpu.dynamic_rotate %147 by %c1_i32_78 dim 0 : vector<16x256xf32>, i32 -> vector<16x256xf32>
    %152 = arith.mulf %151, %25 : vector<16x256xf32>
    %153 = arith.addf %150, %152 : vector<16x256xf32>
    %c15_i32_79 = arith.constant 15 : i32
    %154 = tpu.dynamic_rotate %147 by %c15_i32_79 dim 0 : vector<16x256xf32>, i32 -> vector<16x256xf32>
    %155 = arith.mulf %154, %30 : vector<16x256xf32>
    %156 = arith.addf %153, %155 : vector<16x256xf32>
    %c1_i32_80 = arith.constant 1 : i32
    %157 = arith.addi %c2_i32_74, %c1_i32_80 : i32
    %158 = arith.index_cast %157 : i32 to index
    %c0_81 = arith.constant 0 : index
    %c0_82 = arith.constant 0 : index
    %159 = vector.load %arg6[%158, %c0_81, %c0_82] : memref<18x16x256xf32, #tpu.memory_space<vmem>>, vector<1x16x256xf32>
    %160 = vector.shape_cast %159 : vector<1x16x256xf32> to vector<16x256xf32>
    %161 = vector.broadcast %32 : vector<1x256xf32> to vector<16x256xf32>
    %162 = arith.mulf %160, %161 : vector<16x256xf32>
    %163 = arith.addf %156, %162 : vector<16x256xf32>
    %c1_i32_83 = arith.constant 1 : i32
    %164 = tpu.dynamic_rotate %160 by %c1_i32_83 dim 0 : vector<16x256xf32>, i32 -> vector<16x256xf32>
    %165 = arith.mulf %164, %37 : vector<16x256xf32>
    %166 = arith.addf %163, %165 : vector<16x256xf32>
    %c15_i32_84 = arith.constant 15 : i32
    %167 = tpu.dynamic_rotate %160 by %c15_i32_84 dim 0 : vector<16x256xf32>, i32 -> vector<16x256xf32>
    %168 = arith.mulf %167, %42 : vector<16x256xf32>
    %169 = arith.addf %166, %168 : vector<16x256xf32>
    %c2_i32_85 = arith.constant 2 : i32
    %170 = arith.addi %c2_i32_74, %c2_i32_85 : i32
    %171 = arith.index_cast %170 : i32 to index
    %c0_86 = arith.constant 0 : index
    %c0_87 = arith.constant 0 : index
    %172 = vector.load %arg6[%171, %c0_86, %c0_87] : memref<18x16x256xf32, #tpu.memory_space<vmem>>, vector<1x16x256xf32>
    %173 = vector.shape_cast %172 : vector<1x16x256xf32> to vector<16x256xf32>
    %174 = vector.broadcast %44 : vector<1x256xf32> to vector<16x256xf32>
    %175 = arith.mulf %173, %174 : vector<16x256xf32>
    %176 = arith.addf %169, %175 : vector<16x256xf32>
    %c1_i32_88 = arith.constant 1 : i32
    %177 = tpu.dynamic_rotate %173 by %c1_i32_88 dim 0 : vector<16x256xf32>, i32 -> vector<16x256xf32>
    %178 = arith.mulf %177, %49 : vector<16x256xf32>
    %179 = arith.addf %176, %178 : vector<16x256xf32>
    %c15_i32_89 = arith.constant 15 : i32
    %180 = tpu.dynamic_rotate %173 by %c15_i32_89 dim 0 : vector<16x256xf32>, i32 -> vector<16x256xf32>
    %181 = arith.mulf %180, %54 : vector<16x256xf32>
    %182 = arith.addf %179, %181 : vector<16x256xf32>
    %c0_90 = arith.constant 0 : index
    %183 = arith.index_cast %c2_i32_74 : i32 to index
    %c0_91 = arith.constant 0 : index
    %c0_92 = arith.constant 0 : index
    %184 = vector.load %arg5[%c0_90, %183, %c0_91, %c0_92] : memref<1x16x16x256xf32, #tpu.memory_space<vmem>>, vector<1x1x16x256xf32>
    %185 = vector.shape_cast %184 : vector<1x1x16x256xf32> to vector<16x256xf32>
    %186 = vector.shape_cast %182 : vector<16x256xf32> to vector<1x1x16x256xf32>
    tpu.vector_store %arg5[%c0_90, %183, %c0_91, %c0_92], %186 {strides = array<i32>} : memref<1x16x16x256xf32, #tpu.memory_space<vmem>>, vector<1x1x16x256xf32>,
    %c3_i32 = arith.constant 3 : i32
    %c0_i32_93 = arith.constant 0 : i32
    %187 = arith.addi %c3_i32, %c0_i32_93 : i32
    %188 = arith.index_cast %187 : i32 to index
    %c0_94 = arith.constant 0 : index
    %c0_95 = arith.constant 0 : index
    %189 = vector.load %arg6[%188, %c0_94, %c0_95] : memref<18x16x256xf32, #tpu.memory_space<vmem>>, vector<1x16x256xf32>
    %190 = vector.shape_cast %189 : vector<1x16x256xf32> to vector<16x256xf32>
    %191 = vector.broadcast %20 : vector<1x256xf32> to vector<16x256xf32>
    %192 = arith.mulf %190, %191 : vector<16x256xf32>
    %193 = arith.addf %57, %192 : vector<16x256xf32>
    %c1_i32_96 = arith.constant 1 : i32
    %194 = tpu.dynamic_rotate %190 by %c1_i32_96 dim 0 : vector<16x256xf32>, i32 -> vector<16x256xf32>
    %195 = arith.mulf %194, %25 : vector<16x256xf32>
    %196 = arith.addf %193, %195 : vector<16x256xf32>
    %c15_i32_97 = arith.constant 15 : i32
    %197 = tpu.dynamic_rotate %190 by %c15_i32_97 dim 0 : vector<16x256xf32>, i32 -> vector<16x256xf32>
    %198 = arith.mulf %197, %30 : vector<16x256xf32>
    %199 = arith.addf %196, %198 : vector<16x256xf32>
    %c1_i32_98 = arith.constant 1 : i32
    %200 = arith.addi %c3_i32, %c1_i32_98 : i32
    %201 = arith.index_cast %200 : i32 to index
    %c0_99 = arith.constant 0 : index
    %c0_100 = arith.constant 0 : index
    %202 = vector.load %arg6[%201, %c0_99, %c0_100] : memref<18x16x256xf32, #tpu.memory_space<vmem>>, vector<1x16x256xf32>
    %203 = vector.shape_cast %202 : vector<1x16x256xf32> to vector<16x256xf32>
    %204 = vector.broadcast %32 : vector<1x256xf32> to vector<16x256xf32>
    %205 = arith.mulf %203, %204 : vector<16x256xf32>
    %206 = arith.addf %199, %205 : vector<16x256xf32>
    %c1_i32_101 = arith.constant 1 : i32
    %207 = tpu.dynamic_rotate %203 by %c1_i32_101 dim 0 : vector<16x256xf32>, i32 -> vector<16x256xf32>
    %208 = arith.mulf %207, %37 : vector<16x256xf32>
    %209 = arith.addf %206, %208 : vector<16x256xf32>
    %c15_i32_102 = arith.constant 15 : i32
    %210 = tpu.dynamic_rotate %203 by %c15_i32_102 dim 0 : vector<16x256xf32>, i32 -> vector<16x256xf32>
    %211 = arith.mulf %210, %42 : vector<16x256xf32>
    %212 = arith.addf %209, %211 : vector<16x256xf32>
    %c2_i32_103 = arith.constant 2 : i32
    %213 = arith.addi %c3_i32, %c2_i32_103 : i32
    %214 = arith.index_cast %213 : i32 to index
    %c0_104 = arith.constant 0 : index
    %c0_105 = arith.constant 0 : index
    %215 = vector.load %arg6[%214, %c0_104, %c0_105] : memref<18x16x256xf32, #tpu.memory_space<vmem>>, vector<1x16x256xf32>
    %216 = vector.shape_cast %215 : vector<1x16x256xf32> to vector<16x256xf32>
    %217 = vector.broadcast %44 : vector<1x256xf32> to vector<16x256xf32>
    %218 = arith.mulf %216, %217 : vector<16x256xf32>
    %219 = arith.addf %212, %218 : vector<16x256xf32>
    %c1_i32_106 = arith.constant 1 : i32
    %220 = tpu.dynamic_rotate %216 by %c1_i32_106 dim 0 : vector<16x256xf32>, i32 -> vector<16x256xf32>
    %221 = arith.mulf %220, %49 : vector<16x256xf32>
    %222 = arith.addf %219, %221 : vector<16x256xf32>
    %c15_i32_107 = arith.constant 15 : i32
    %223 = tpu.dynamic_rotate %216 by %c15_i32_107 dim 0 : vector<16x256xf32>, i32 -> vector<16x256xf32>
    %224 = arith.mulf %223, %54 : vector<16x256xf32>
    %225 = arith.addf %222, %224 : vector<16x256xf32>
    %c0_108 = arith.constant 0 : index
    %226 = arith.index_cast %c3_i32 : i32 to index
    %c0_109 = arith.constant 0 : index
    %c0_110 = arith.constant 0 : index
    %227 = vector.load %arg5[%c0_108, %226, %c0_109, %c0_110] : memref<1x16x16x256xf32, #tpu.memory_space<vmem>>, vector<1x1x16x256xf32>
    %228 = vector.shape_cast %227 : vector<1x1x16x256xf32> to vector<16x256xf32>
    %229 = vector.shape_cast %225 : vector<16x256xf32> to vector<1x1x16x256xf32>
    tpu.vector_store %arg5[%c0_108, %226, %c0_109, %c0_110], %229 {strides = array<i32>} : memref<1x16x16x256xf32, #tpu.memory_space<vmem>>, vector<1x1x16x256xf32>,
    %c4_i32 = arith.constant 4 : i32
    %c0_i32_111 = arith.constant 0 : i32
    %230 = arith.addi %c4_i32, %c0_i32_111 : i32
    %231 = arith.index_cast %230 : i32 to index
    %c0_112 = arith.constant 0 : index
    %c0_113 = arith.constant 0 : index
    %232 = vector.load %arg6[%231, %c0_112, %c0_113] : memref<18x16x256xf32, #tpu.memory_space<vmem>>, vector<1x16x256xf32>
    %233 = vector.shape_cast %232 : vector<1x16x256xf32> to vector<16x256xf32>
    %234 = vector.broadcast %20 : vector<1x256xf32> to vector<16x256xf32>
    %235 = arith.mulf %233, %234 : vector<16x256xf32>
    %236 = arith.addf %57, %235 : vector<16x256xf32>
    %c1_i32_114 = arith.constant 1 : i32
    %237 = tpu.dynamic_rotate %233 by %c1_i32_114 dim 0 : vector<16x256xf32>, i32 -> vector<16x256xf32>
    %238 = arith.mulf %237, %25 : vector<16x256xf32>
    %239 = arith.addf %236, %238 : vector<16x256xf32>
    %c15_i32_115 = arith.constant 15 : i32
    %240 = tpu.dynamic_rotate %233 by %c15_i32_115 dim 0 : vector<16x256xf32>, i32 -> vector<16x256xf32>
    %241 = arith.mulf %240, %30 : vector<16x256xf32>
    %242 = arith.addf %239, %241 : vector<16x256xf32>
    %c1_i32_116 = arith.constant 1 : i32
    %243 = arith.addi %c4_i32, %c1_i32_116 : i32
    %244 = arith.index_cast %243 : i32 to index
    %c0_117 = arith.constant 0 : index
    %c0_118 = arith.constant 0 : index
    %245 = vector.load %arg6[%244, %c0_117, %c0_118] : memref<18x16x256xf32, #tpu.memory_space<vmem>>, vector<1x16x256xf32>
    %246 = vector.shape_cast %245 : vector<1x16x256xf32> to vector<16x256xf32>
    %247 = vector.broadcast %32 : vector<1x256xf32> to vector<16x256xf32>
    %248 = arith.mulf %246, %247 : vector<16x256xf32>
    %249 = arith.addf %242, %248 : vector<16x256xf32>
    %c1_i32_119 = arith.constant 1 : i32
    %250 = tpu.dynamic_rotate %246 by %c1_i32_119 dim 0 : vector<16x256xf32>, i32 -> vector<16x256xf32>
    %251 = arith.mulf %250, %37 : vector<16x256xf32>
    %252 = arith.addf %249, %251 : vector<16x256xf32>
    %c15_i32_120 = arith.constant 15 : i32
    %253 = tpu.dynamic_rotate %246 by %c15_i32_120 dim 0 : vector<16x256xf32>, i32 -> vector<16x256xf32>
    %254 = arith.mulf %253, %42 : vector<16x256xf32>
    %255 = arith.addf %252, %254 : vector<16x256xf32>
    %c2_i32_121 = arith.constant 2 : i32
    %256 = arith.addi %c4_i32, %c2_i32_121 : i32
    %257 = arith.index_cast %256 : i32 to index
    %c0_122 = arith.constant 0 : index
    %c0_123 = arith.constant 0 : index
    %258 = vector.load %arg6[%257, %c0_122, %c0_123] : memref<18x16x256xf32, #tpu.memory_space<vmem>>, vector<1x16x256xf32>
    %259 = vector.shape_cast %258 : vector<1x16x256xf32> to vector<16x256xf32>
    %260 = vector.broadcast %44 : vector<1x256xf32> to vector<16x256xf32>
    %261 = arith.mulf %259, %260 : vector<16x256xf32>
    %262 = arith.addf %255, %261 : vector<16x256xf32>
    %c1_i32_124 = arith.constant 1 : i32
    %263 = tpu.dynamic_rotate %259 by %c1_i32_124 dim 0 : vector<16x256xf32>, i32 -> vector<16x256xf32>
    %264 = arith.mulf %263, %49 : vector<16x256xf32>
    %265 = arith.addf %262, %264 : vector<16x256xf32>
    %c15_i32_125 = arith.constant 15 : i32
    %266 = tpu.dynamic_rotate %259 by %c15_i32_125 dim 0 : vector<16x256xf32>, i32 -> vector<16x256xf32>
    %267 = arith.mulf %266, %54 : vector<16x256xf32>
    %268 = arith.addf %265, %267 : vector<16x256xf32>
    %c0_126 = arith.constant 0 : index
    %269 = arith.index_cast %c4_i32 : i32 to index
    %c0_127 = arith.constant 0 : index
    %c0_128 = arith.constant 0 : index
    %270 = vector.load %arg5[%c0_126, %269, %c0_127, %c0_128] : memref<1x16x16x256xf32, #tpu.memory_space<vmem>>, vector<1x1x16x256xf32>
    %271 = vector.shape_cast %270 : vector<1x1x16x256xf32> to vector<16x256xf32>
    %272 = vector.shape_cast %268 : vector<16x256xf32> to vector<1x1x16x256xf32>
    tpu.vector_store %arg5[%c0_126, %269, %c0_127, %c0_128], %272 {strides = array<i32>} : memref<1x16x16x256xf32, #tpu.memory_space<vmem>>, vector<1x1x16x256xf32>,
    %c5_i32 = arith.constant 5 : i32
    %c0_i32_129 = arith.constant 0 : i32
    %273 = arith.addi %c5_i32, %c0_i32_129 : i32
    %274 = arith.index_cast %273 : i32 to index
    %c0_130 = arith.constant 0 : index
    %c0_131 = arith.constant 0 : index
    %275 = vector.load %arg6[%274, %c0_130, %c0_131] : memref<18x16x256xf32, #tpu.memory_space<vmem>>, vector<1x16x256xf32>
    %276 = vector.shape_cast %275 : vector<1x16x256xf32> to vector<16x256xf32>
    %277 = vector.broadcast %20 : vector<1x256xf32> to vector<16x256xf32>
    %278 = arith.mulf %276, %277 : vector<16x256xf32>
    %279 = arith.addf %57, %278 : vector<16x256xf32>
    %c1_i32_132 = arith.constant 1 : i32
    %280 = tpu.dynamic_rotate %276 by %c1_i32_132 dim 0 : vector<16x256xf32>, i32 -> vector<16x256xf32>
    %281 = arith.mulf %280, %25 : vector<16x256xf32>
    %282 = arith.addf %279, %281 : vector<16x256xf32>
    %c15_i32_133 = arith.constant 15 : i32
    %283 = tpu.dynamic_rotate %276 by %c15_i32_133 dim 0 : vector<16x256xf32>, i32 -> vector<16x256xf32>
    %284 = arith.mulf %283, %30 : vector<16x256xf32>
    %285 = arith.addf %282, %284 : vector<16x256xf32>
    %c1_i32_134 = arith.constant 1 : i32
    %286 = arith.addi %c5_i32, %c1_i32_134 : i32
    %287 = arith.index_cast %286 : i32 to index
    %c0_135 = arith.constant 0 : index
    %c0_136 = arith.constant 0 : index
    %288 = vector.load %arg6[%287, %c0_135, %c0_136] : memref<18x16x256xf32, #tpu.memory_space<vmem>>, vector<1x16x256xf32>
    %289 = vector.shape_cast %288 : vector<1x16x256xf32> to vector<16x256xf32>
    %290 = vector.broadcast %32 : vector<1x256xf32> to vector<16x256xf32>
    %291 = arith.mulf %289, %290 : vector<16x256xf32>
    %292 = arith.addf %285, %291 : vector<16x256xf32>
    %c1_i32_137 = arith.constant 1 : i32
    %293 = tpu.dynamic_rotate %289 by %c1_i32_137 dim 0 : vector<16x256xf32>, i32 -> vector<16x256xf32>
    %294 = arith.mulf %293, %37 : vector<16x256xf32>
    %295 = arith.addf %292, %294 : vector<16x256xf32>
    %c15_i32_138 = arith.constant 15 : i32
    %296 = tpu.dynamic_rotate %289 by %c15_i32_138 dim 0 : vector<16x256xf32>, i32 -> vector<16x256xf32>
    %297 = arith.mulf %296, %42 : vector<16x256xf32>
    %298 = arith.addf %295, %297 : vector<16x256xf32>
    %c2_i32_139 = arith.constant 2 : i32
    %299 = arith.addi %c5_i32, %c2_i32_139 : i32
    %300 = arith.index_cast %299 : i32 to index
    %c0_140 = arith.constant 0 : index
    %c0_141 = arith.constant 0 : index
    %301 = vector.load %arg6[%300, %c0_140, %c0_141] : memref<18x16x256xf32, #tpu.memory_space<vmem>>, vector<1x16x256xf32>
    %302 = vector.shape_cast %301 : vector<1x16x256xf32> to vector<16x256xf32>
    %303 = vector.broadcast %44 : vector<1x256xf32> to vector<16x256xf32>
    %304 = arith.mulf %302, %303 : vector<16x256xf32>
    %305 = arith.addf %298, %304 : vector<16x256xf32>
    %c1_i32_142 = arith.constant 1 : i32
    %306 = tpu.dynamic_rotate %302 by %c1_i32_142 dim 0 : vector<16x256xf32>, i32 -> vector<16x256xf32>
    %307 = arith.mulf %306, %49 : vector<16x256xf32>
    %308 = arith.addf %305, %307 : vector<16x256xf32>
    %c15_i32_143 = arith.constant 15 : i32
    %309 = tpu.dynamic_rotate %302 by %c15_i32_143 dim 0 : vector<16x256xf32>, i32 -> vector<16x256xf32>
    %310 = arith.mulf %309, %54 : vector<16x256xf32>
    %311 = arith.addf %308, %310 : vector<16x256xf32>
    %c0_144 = arith.constant 0 : index
    %312 = arith.index_cast %c5_i32 : i32 to index
    %c0_145 = arith.constant 0 : index
    %c0_146 = arith.constant 0 : index
    %313 = vector.load %arg5[%c0_144, %312, %c0_145, %c0_146] : memref<1x16x16x256xf32, #tpu.memory_space<vmem>>, vector<1x1x16x256xf32>
    %314 = vector.shape_cast %313 : vector<1x1x16x256xf32> to vector<16x256xf32>
    %315 = vector.shape_cast %311 : vector<16x256xf32> to vector<1x1x16x256xf32>
    tpu.vector_store %arg5[%c0_144, %312, %c0_145, %c0_146], %315 {strides = array<i32>} : memref<1x16x16x256xf32, #tpu.memory_space<vmem>>, vector<1x1x16x256xf32>,
    %c6_i32 = arith.constant 6 : i32
    %c0_i32_147 = arith.constant 0 : i32
    %316 = arith.addi %c6_i32, %c0_i32_147 : i32
    %317 = arith.index_cast %316 : i32 to index
    %c0_148 = arith.constant 0 : index
    %c0_149 = arith.constant 0 : index
    %318 = vector.load %arg6[%317, %c0_148, %c0_149] : memref<18x16x256xf32, #tpu.memory_space<vmem>>, vector<1x16x256xf32>
    %319 = vector.shape_cast %318 : vector<1x16x256xf32> to vector<16x256xf32>
    %320 = vector.broadcast %20 : vector<1x256xf32> to vector<16x256xf32>
    %321 = arith.mulf %319, %320 : vector<16x256xf32>
    %322 = arith.addf %57, %321 : vector<16x256xf32>
    %c1_i32_150 = arith.constant 1 : i32
    %323 = tpu.dynamic_rotate %319 by %c1_i32_150 dim 0 : vector<16x256xf32>, i32 -> vector<16x256xf32>
    %324 = arith.mulf %323, %25 : vector<16x256xf32>
    %325 = arith.addf %322, %324 : vector<16x256xf32>
    %c15_i32_151 = arith.constant 15 : i32
    %326 = tpu.dynamic_rotate %319 by %c15_i32_151 dim 0 : vector<16x256xf32>, i32 -> vector<16x256xf32>
    %327 = arith.mulf %326, %30 : vector<16x256xf32>
    %328 = arith.addf %325, %327 : vector<16x256xf32>
    %c1_i32_152 = arith.constant 1 : i32
    %329 = arith.addi %c6_i32, %c1_i32_152 : i32
    %330 = arith.index_cast %329 : i32 to index
    %c0_153 = arith.constant 0 : index
    %c0_154 = arith.constant 0 : index
    %331 = vector.load %arg6[%330, %c0_153, %c0_154] : memref<18x16x256xf32, #tpu.memory_space<vmem>>, vector<1x16x256xf32>
    %332 = vector.shape_cast %331 : vector<1x16x256xf32> to vector<16x256xf32>
    %333 = vector.broadcast %32 : vector<1x256xf32> to vector<16x256xf32>
    %334 = arith.mulf %332, %333 : vector<16x256xf32>
    %335 = arith.addf %328, %334 : vector<16x256xf32>
    %c1_i32_155 = arith.constant 1 : i32
    %336 = tpu.dynamic_rotate %332 by %c1_i32_155 dim 0 : vector<16x256xf32>, i32 -> vector<16x256xf32>
    %337 = arith.mulf %336, %37 : vector<16x256xf32>
    %338 = arith.addf %335, %337 : vector<16x256xf32>
    %c15_i32_156 = arith.constant 15 : i32
    %339 = tpu.dynamic_rotate %332 by %c15_i32_156 dim 0 : vector<16x256xf32>, i32 -> vector<16x256xf32>
    %340 = arith.mulf %339, %42 : vector<16x256xf32>
    %341 = arith.addf %338, %340 : vector<16x256xf32>
    %c2_i32_157 = arith.constant 2 : i32
    %342 = arith.addi %c6_i32, %c2_i32_157 : i32
    %343 = arith.index_cast %342 : i32 to index
    %c0_158 = arith.constant 0 : index
    %c0_159 = arith.constant 0 : index
    %344 = vector.load %arg6[%343, %c0_158, %c0_159] : memref<18x16x256xf32, #tpu.memory_space<vmem>>, vector<1x16x256xf32>
    %345 = vector.shape_cast %344 : vector<1x16x256xf32> to vector<16x256xf32>
    %346 = vector.broadcast %44 : vector<1x256xf32> to vector<16x256xf32>
    %347 = arith.mulf %345, %346 : vector<16x256xf32>
    %348 = arith.addf %341, %347 : vector<16x256xf32>
    %c1_i32_160 = arith.constant 1 : i32
    %349 = tpu.dynamic_rotate %345 by %c1_i32_160 dim 0 : vector<16x256xf32>, i32 -> vector<16x256xf32>
    %350 = arith.mulf %349, %49 : vector<16x256xf32>
    %351 = arith.addf %348, %350 : vector<16x256xf32>
    %c15_i32_161 = arith.constant 15 : i32
    %352 = tpu.dynamic_rotate %345 by %c15_i32_161 dim 0 : vector<16x256xf32>, i32 -> vector<16x256xf32>
    %353 = arith.mulf %352, %54 : vector<16x256xf32>
    %354 = arith.addf %351, %353 : vector<16x256xf32>
    %c0_162 = arith.constant 0 : index
    %355 = arith.index_cast %c6_i32 : i32 to index
    %c0_163 = arith.constant 0 : index
    %c0_164 = arith.constant 0 : index
    %356 = vector.load %arg5[%c0_162, %355, %c0_163, %c0_164] : memref<1x16x16x256xf32, #tpu.memory_space<vmem>>, vector<1x1x16x256xf32>
    %357 = vector.shape_cast %356 : vector<1x1x16x256xf32> to vector<16x256xf32>
    %358 = vector.shape_cast %354 : vector<16x256xf32> to vector<1x1x16x256xf32>
    tpu.vector_store %arg5[%c0_162, %355, %c0_163, %c0_164], %358 {strides = array<i32>} : memref<1x16x16x256xf32, #tpu.memory_space<vmem>>, vector<1x1x16x256xf32>,
    %c7_i32 = arith.constant 7 : i32
    %c0_i32_165 = arith.constant 0 : i32
    %359 = arith.addi %c7_i32, %c0_i32_165 : i32
    %360 = arith.index_cast %359 : i32 to index
    %c0_166 = arith.constant 0 : index
    %c0_167 = arith.constant 0 : index
    %361 = vector.load %arg6[%360, %c0_166, %c0_167] : memref<18x16x256xf32, #tpu.memory_space<vmem>>, vector<1x16x256xf32>
    %362 = vector.shape_cast %361 : vector<1x16x256xf32> to vector<16x256xf32>
    %363 = vector.broadcast %20 : vector<1x256xf32> to vector<16x256xf32>
    %364 = arith.mulf %362, %363 : vector<16x256xf32>
    %365 = arith.addf %57, %364 : vector<16x256xf32>
    %c1_i32_168 = arith.constant 1 : i32
    %366 = tpu.dynamic_rotate %362 by %c1_i32_168 dim 0 : vector<16x256xf32>, i32 -> vector<16x256xf32>
    %367 = arith.mulf %366, %25 : vector<16x256xf32>
    %368 = arith.addf %365, %367 : vector<16x256xf32>
    %c15_i32_169 = arith.constant 15 : i32
    %369 = tpu.dynamic_rotate %362 by %c15_i32_169 dim 0 : vector<16x256xf32>, i32 -> vector<16x256xf32>
    %370 = arith.mulf %369, %30 : vector<16x256xf32>
    %371 = arith.addf %368, %370 : vector<16x256xf32>
    %c1_i32_170 = arith.constant 1 : i32
    %372 = arith.addi %c7_i32, %c1_i32_170 : i32
    %373 = arith.index_cast %372 : i32 to index
    %c0_171 = arith.constant 0 : index
    %c0_172 = arith.constant 0 : index
    %374 = vector.load %arg6[%373, %c0_171, %c0_172] : memref<18x16x256xf32, #tpu.memory_space<vmem>>, vector<1x16x256xf32>
    %375 = vector.shape_cast %374 : vector<1x16x256xf32> to vector<16x256xf32>
    %376 = vector.broadcast %32 : vector<1x256xf32> to vector<16x256xf32>
    %377 = arith.mulf %375, %376 : vector<16x256xf32>
    %378 = arith.addf %371, %377 : vector<16x256xf32>
    %c1_i32_173 = arith.constant 1 : i32
    %379 = tpu.dynamic_rotate %375 by %c1_i32_173 dim 0 : vector<16x256xf32>, i32 -> vector<16x256xf32>
    %380 = arith.mulf %379, %37 : vector<16x256xf32>
    %381 = arith.addf %378, %380 : vector<16x256xf32>
    %c15_i32_174 = arith.constant 15 : i32
    %382 = tpu.dynamic_rotate %375 by %c15_i32_174 dim 0 : vector<16x256xf32>, i32 -> vector<16x256xf32>
    %383 = arith.mulf %382, %42 : vector<16x256xf32>
    %384 = arith.addf %381, %383 : vector<16x256xf32>
    %c2_i32_175 = arith.constant 2 : i32
    %385 = arith.addi %c7_i32, %c2_i32_175 : i32
    %386 = arith.index_cast %385 : i32 to index
    %c0_176 = arith.constant 0 : index
    %c0_177 = arith.constant 0 : index
    %387 = vector.load %arg6[%386, %c0_176, %c0_177] : memref<18x16x256xf32, #tpu.memory_space<vmem>>, vector<1x16x256xf32>
    %388 = vector.shape_cast %387 : vector<1x16x256xf32> to vector<16x256xf32>
    %389 = vector.broadcast %44 : vector<1x256xf32> to vector<16x256xf32>
    %390 = arith.mulf %388, %389 : vector<16x256xf32>
    %391 = arith.addf %384, %390 : vector<16x256xf32>
    %c1_i32_178 = arith.constant 1 : i32
    %392 = tpu.dynamic_rotate %388 by %c1_i32_178 dim 0 : vector<16x256xf32>, i32 -> vector<16x256xf32>
    %393 = arith.mulf %392, %49 : vector<16x256xf32>
    %394 = arith.addf %391, %393 : vector<16x256xf32>
    %c15_i32_179 = arith.constant 15 : i32
    %395 = tpu.dynamic_rotate %388 by %c15_i32_179 dim 0 : vector<16x256xf32>, i32 -> vector<16x256xf32>
    %396 = arith.mulf %395, %54 : vector<16x256xf32>
    %397 = arith.addf %394, %396 : vector<16x256xf32>
    %c0_180 = arith.constant 0 : index
    %398 = arith.index_cast %c7_i32 : i32 to index
    %c0_181 = arith.constant 0 : index
    %c0_182 = arith.constant 0 : index
    %399 = vector.load %arg5[%c0_180, %398, %c0_181, %c0_182] : memref<1x16x16x256xf32, #tpu.memory_space<vmem>>, vector<1x1x16x256xf32>
    %400 = vector.shape_cast %399 : vector<1x1x16x256xf32> to vector<16x256xf32>
    %401 = vector.shape_cast %397 : vector<16x256xf32> to vector<1x1x16x256xf32>
    tpu.vector_store %arg5[%c0_180, %398, %c0_181, %c0_182], %401 {strides = array<i32>} : memref<1x16x16x256xf32, #tpu.memory_space<vmem>>, vector<1x1x16x256xf32>,
    %c8_i32 = arith.constant 8 : i32
    %c0_i32_183 = arith.constant 0 : i32
    %402 = arith.addi %c8_i32, %c0_i32_183 : i32
    %403 = arith.index_cast %402 : i32 to index
    %c0_184 = arith.constant 0 : index
    %c0_185 = arith.constant 0 : index
    %404 = vector.load %arg6[%403, %c0_184, %c0_185] : memref<18x16x256xf32, #tpu.memory_space<vmem>>, vector<1x16x256xf32>
    %405 = vector.shape_cast %404 : vector<1x16x256xf32> to vector<16x256xf32>
    %406 = vector.broadcast %20 : vector<1x256xf32> to vector<16x256xf32>
    %407 = arith.mulf %405, %406 : vector<16x256xf32>
    %408 = arith.addf %57, %407 : vector<16x256xf32>
    %c1_i32_186 = arith.constant 1 : i32
    %409 = tpu.dynamic_rotate %405 by %c1_i32_186 dim 0 : vector<16x256xf32>, i32 -> vector<16x256xf32>
    %410 = arith.mulf %409, %25 : vector<16x256xf32>
    %411 = arith.addf %408, %410 : vector<16x256xf32>
    %c15_i32_187 = arith.constant 15 : i32
    %412 = tpu.dynamic_rotate %405 by %c15_i32_187 dim 0 : vector<16x256xf32>, i32 -> vector<16x256xf32>
    %413 = arith.mulf %412, %30 : vector<16x256xf32>
    %414 = arith.addf %411, %413 : vector<16x256xf32>
    %c1_i32_188 = arith.constant 1 : i32
    %415 = arith.addi %c8_i32, %c1_i32_188 : i32
    %416 = arith.index_cast %415 : i32 to index
    %c0_189 = arith.constant 0 : index
    %c0_190 = arith.constant 0 : index
    %417 = vector.load %arg6[%416, %c0_189, %c0_190] : memref<18x16x256xf32, #tpu.memory_space<vmem>>, vector<1x16x256xf32>
    %418 = vector.shape_cast %417 : vector<1x16x256xf32> to vector<16x256xf32>
    %419 = vector.broadcast %32 : vector<1x256xf32> to vector<16x256xf32>
    %420 = arith.mulf %418, %419 : vector<16x256xf32>
    %421 = arith.addf %414, %420 : vector<16x256xf32>
    %c1_i32_191 = arith.constant 1 : i32
    %422 = tpu.dynamic_rotate %418 by %c1_i32_191 dim 0 : vector<16x256xf32>, i32 -> vector<16x256xf32>
    %423 = arith.mulf %422, %37 : vector<16x256xf32>
    %424 = arith.addf %421, %423 : vector<16x256xf32>
    %c15_i32_192 = arith.constant 15 : i32
    %425 = tpu.dynamic_rotate %418 by %c15_i32_192 dim 0 : vector<16x256xf32>, i32 -> vector<16x256xf32>
    %426 = arith.mulf %425, %42 : vector<16x256xf32>
    %427 = arith.addf %424, %426 : vector<16x256xf32>
    %c2_i32_193 = arith.constant 2 : i32
    %428 = arith.addi %c8_i32, %c2_i32_193 : i32
    %429 = arith.index_cast %428 : i32 to index
    %c0_194 = arith.constant 0 : index
    %c0_195 = arith.constant 0 : index
    %430 = vector.load %arg6[%429, %c0_194, %c0_195] : memref<18x16x256xf32, #tpu.memory_space<vmem>>, vector<1x16x256xf32>
    %431 = vector.shape_cast %430 : vector<1x16x256xf32> to vector<16x256xf32>
    %432 = vector.broadcast %44 : vector<1x256xf32> to vector<16x256xf32>
    %433 = arith.mulf %431, %432 : vector<16x256xf32>
    %434 = arith.addf %427, %433 : vector<16x256xf32>
    %c1_i32_196 = arith.constant 1 : i32
    %435 = tpu.dynamic_rotate %431 by %c1_i32_196 dim 0 : vector<16x256xf32>, i32 -> vector<16x256xf32>
    %436 = arith.mulf %435, %49 : vector<16x256xf32>
    %437 = arith.addf %434, %436 : vector<16x256xf32>
    %c15_i32_197 = arith.constant 15 : i32
    %438 = tpu.dynamic_rotate %431 by %c15_i32_197 dim 0 : vector<16x256xf32>, i32 -> vector<16x256xf32>
    %439 = arith.mulf %438, %54 : vector<16x256xf32>
    %440 = arith.addf %437, %439 : vector<16x256xf32>
    %c0_198 = arith.constant 0 : index
    %441 = arith.index_cast %c8_i32 : i32 to index
    %c0_199 = arith.constant 0 : index
    %c0_200 = arith.constant 0 : index
    %442 = vector.load %arg5[%c0_198, %441, %c0_199, %c0_200] : memref<1x16x16x256xf32, #tpu.memory_space<vmem>>, vector<1x1x16x256xf32>
    %443 = vector.shape_cast %442 : vector<1x1x16x256xf32> to vector<16x256xf32>
    %444 = vector.shape_cast %440 : vector<16x256xf32> to vector<1x1x16x256xf32>
    tpu.vector_store %arg5[%c0_198, %441, %c0_199, %c0_200], %444 {strides = array<i32>} : memref<1x16x16x256xf32, #tpu.memory_space<vmem>>, vector<1x1x16x256xf32>,
    %c9_i32 = arith.constant 9 : i32
    %c0_i32_201 = arith.constant 0 : i32
    %445 = arith.addi %c9_i32, %c0_i32_201 : i32
    %446 = arith.index_cast %445 : i32 to index
    %c0_202 = arith.constant 0 : index
    %c0_203 = arith.constant 0 : index
    %447 = vector.load %arg6[%446, %c0_202, %c0_203] : memref<18x16x256xf32, #tpu.memory_space<vmem>>, vector<1x16x256xf32>
    %448 = vector.shape_cast %447 : vector<1x16x256xf32> to vector<16x256xf32>
    %449 = vector.broadcast %20 : vector<1x256xf32> to vector<16x256xf32>
    %450 = arith.mulf %448, %449 : vector<16x256xf32>
    %451 = arith.addf %57, %450 : vector<16x256xf32>
    %c1_i32_204 = arith.constant 1 : i32
    %452 = tpu.dynamic_rotate %448 by %c1_i32_204 dim 0 : vector<16x256xf32>, i32 -> vector<16x256xf32>
    %453 = arith.mulf %452, %25 : vector<16x256xf32>
    %454 = arith.addf %451, %453 : vector<16x256xf32>
    %c15_i32_205 = arith.constant 15 : i32
    %455 = tpu.dynamic_rotate %448 by %c15_i32_205 dim 0 : vector<16x256xf32>, i32 -> vector<16x256xf32>
    %456 = arith.mulf %455, %30 : vector<16x256xf32>
    %457 = arith.addf %454, %456 : vector<16x256xf32>
    %c1_i32_206 = arith.constant 1 : i32
    %458 = arith.addi %c9_i32, %c1_i32_206 : i32
    %459 = arith.index_cast %458 : i32 to index
    %c0_207 = arith.constant 0 : index
    %c0_208 = arith.constant 0 : index
    %460 = vector.load %arg6[%459, %c0_207, %c0_208] : memref<18x16x256xf32, #tpu.memory_space<vmem>>, vector<1x16x256xf32>
    %461 = vector.shape_cast %460 : vector<1x16x256xf32> to vector<16x256xf32>
    %462 = vector.broadcast %32 : vector<1x256xf32> to vector<16x256xf32>
    %463 = arith.mulf %461, %462 : vector<16x256xf32>
    %464 = arith.addf %457, %463 : vector<16x256xf32>
    %c1_i32_209 = arith.constant 1 : i32
    %465 = tpu.dynamic_rotate %461 by %c1_i32_209 dim 0 : vector<16x256xf32>, i32 -> vector<16x256xf32>
    %466 = arith.mulf %465, %37 : vector<16x256xf32>
    %467 = arith.addf %464, %466 : vector<16x256xf32>
    %c15_i32_210 = arith.constant 15 : i32
    %468 = tpu.dynamic_rotate %461 by %c15_i32_210 dim 0 : vector<16x256xf32>, i32 -> vector<16x256xf32>
    %469 = arith.mulf %468, %42 : vector<16x256xf32>
    %470 = arith.addf %467, %469 : vector<16x256xf32>
    %c2_i32_211 = arith.constant 2 : i32
    %471 = arith.addi %c9_i32, %c2_i32_211 : i32
    %472 = arith.index_cast %471 : i32 to index
    %c0_212 = arith.constant 0 : index
    %c0_213 = arith.constant 0 : index
    %473 = vector.load %arg6[%472, %c0_212, %c0_213] : memref<18x16x256xf32, #tpu.memory_space<vmem>>, vector<1x16x256xf32>
    %474 = vector.shape_cast %473 : vector<1x16x256xf32> to vector<16x256xf32>
    %475 = vector.broadcast %44 : vector<1x256xf32> to vector<16x256xf32>
    %476 = arith.mulf %474, %475 : vector<16x256xf32>
    %477 = arith.addf %470, %476 : vector<16x256xf32>
    %c1_i32_214 = arith.constant 1 : i32
    %478 = tpu.dynamic_rotate %474 by %c1_i32_214 dim 0 : vector<16x256xf32>, i32 -> vector<16x256xf32>
    %479 = arith.mulf %478, %49 : vector<16x256xf32>
    %480 = arith.addf %477, %479 : vector<16x256xf32>
    %c15_i32_215 = arith.constant 15 : i32
    %481 = tpu.dynamic_rotate %474 by %c15_i32_215 dim 0 : vector<16x256xf32>, i32 -> vector<16x256xf32>
    %482 = arith.mulf %481, %54 : vector<16x256xf32>
    %483 = arith.addf %480, %482 : vector<16x256xf32>
    %c0_216 = arith.constant 0 : index
    %484 = arith.index_cast %c9_i32 : i32 to index
    %c0_217 = arith.constant 0 : index
    %c0_218 = arith.constant 0 : index
    %485 = vector.load %arg5[%c0_216, %484, %c0_217, %c0_218] : memref<1x16x16x256xf32, #tpu.memory_space<vmem>>, vector<1x1x16x256xf32>
    %486 = vector.shape_cast %485 : vector<1x1x16x256xf32> to vector<16x256xf32>
    %487 = vector.shape_cast %483 : vector<16x256xf32> to vector<1x1x16x256xf32>
    tpu.vector_store %arg5[%c0_216, %484, %c0_217, %c0_218], %487 {strides = array<i32>} : memref<1x16x16x256xf32, #tpu.memory_space<vmem>>, vector<1x1x16x256xf32>,
    %c10_i32 = arith.constant 10 : i32
    %c0_i32_219 = arith.constant 0 : i32
    %488 = arith.addi %c10_i32, %c0_i32_219 : i32
    %489 = arith.index_cast %488 : i32 to index
    %c0_220 = arith.constant 0 : index
    %c0_221 = arith.constant 0 : index
    %490 = vector.load %arg6[%489, %c0_220, %c0_221] : memref<18x16x256xf32, #tpu.memory_space<vmem>>, vector<1x16x256xf32>
    %491 = vector.shape_cast %490 : vector<1x16x256xf32> to vector<16x256xf32>
    %492 = vector.broadcast %20 : vector<1x256xf32> to vector<16x256xf32>
    %493 = arith.mulf %491, %492 : vector<16x256xf32>
    %494 = arith.addf %57, %493 : vector<16x256xf32>
    %c1_i32_222 = arith.constant 1 : i32
    %495 = tpu.dynamic_rotate %491 by %c1_i32_222 dim 0 : vector<16x256xf32>, i32 -> vector<16x256xf32>
    %496 = arith.mulf %495, %25 : vector<16x256xf32>
    %497 = arith.addf %494, %496 : vector<16x256xf32>
    %c15_i32_223 = arith.constant 15 : i32
    %498 = tpu.dynamic_rotate %491 by %c15_i32_223 dim 0 : vector<16x256xf32>, i32 -> vector<16x256xf32>
    %499 = arith.mulf %498, %30 : vector<16x256xf32>
    %500 = arith.addf %497, %499 : vector<16x256xf32>
    %c1_i32_224 = arith.constant 1 : i32
    %501 = arith.addi %c10_i32, %c1_i32_224 : i32
    %502 = arith.index_cast %501 : i32 to index
    %c0_225 = arith.constant 0 : index
    %c0_226 = arith.constant 0 : index
    %503 = vector.load %arg6[%502, %c0_225, %c0_226] : memref<18x16x256xf32, #tpu.memory_space<vmem>>, vector<1x16x256xf32>
    %504 = vector.shape_cast %503 : vector<1x16x256xf32> to vector<16x256xf32>
    %505 = vector.broadcast %32 : vector<1x256xf32> to vector<16x256xf32>
    %506 = arith.mulf %504, %505 : vector<16x256xf32>
    %507 = arith.addf %500, %506 : vector<16x256xf32>
    %c1_i32_227 = arith.constant 1 : i32
    %508 = tpu.dynamic_rotate %504 by %c1_i32_227 dim 0 : vector<16x256xf32>, i32 -> vector<16x256xf32>
    %509 = arith.mulf %508, %37 : vector<16x256xf32>
    %510 = arith.addf %507, %509 : vector<16x256xf32>
    %c15_i32_228 = arith.constant 15 : i32
    %511 = tpu.dynamic_rotate %504 by %c15_i32_228 dim 0 : vector<16x256xf32>, i32 -> vector<16x256xf32>
    %512 = arith.mulf %511, %42 : vector<16x256xf32>
    %513 = arith.addf %510, %512 : vector<16x256xf32>
    %c2_i32_229 = arith.constant 2 : i32
    %514 = arith.addi %c10_i32, %c2_i32_229 : i32
    %515 = arith.index_cast %514 : i32 to index
    %c0_230 = arith.constant 0 : index
    %c0_231 = arith.constant 0 : index
    %516 = vector.load %arg6[%515, %c0_230, %c0_231] : memref<18x16x256xf32, #tpu.memory_space<vmem>>, vector<1x16x256xf32>
    %517 = vector.shape_cast %516 : vector<1x16x256xf32> to vector<16x256xf32>
    %518 = vector.broadcast %44 : vector<1x256xf32> to vector<16x256xf32>
    %519 = arith.mulf %517, %518 : vector<16x256xf32>
    %520 = arith.addf %513, %519 : vector<16x256xf32>
    %c1_i32_232 = arith.constant 1 : i32
    %521 = tpu.dynamic_rotate %517 by %c1_i32_232 dim 0 : vector<16x256xf32>, i32 -> vector<16x256xf32>
    %522 = arith.mulf %521, %49 : vector<16x256xf32>
    %523 = arith.addf %520, %522 : vector<16x256xf32>
    %c15_i32_233 = arith.constant 15 : i32
    %524 = tpu.dynamic_rotate %517 by %c15_i32_233 dim 0 : vector<16x256xf32>, i32 -> vector<16x256xf32>
    %525 = arith.mulf %524, %54 : vector<16x256xf32>
    %526 = arith.addf %523, %525 : vector<16x256xf32>
    %c0_234 = arith.constant 0 : index
    %527 = arith.index_cast %c10_i32 : i32 to index
    %c0_235 = arith.constant 0 : index
    %c0_236 = arith.constant 0 : index
    %528 = vector.load %arg5[%c0_234, %527, %c0_235, %c0_236] : memref<1x16x16x256xf32, #tpu.memory_space<vmem>>, vector<1x1x16x256xf32>
    %529 = vector.shape_cast %528 : vector<1x1x16x256xf32> to vector<16x256xf32>
    %530 = vector.shape_cast %526 : vector<16x256xf32> to vector<1x1x16x256xf32>
    tpu.vector_store %arg5[%c0_234, %527, %c0_235, %c0_236], %530 {strides = array<i32>} : memref<1x16x16x256xf32, #tpu.memory_space<vmem>>, vector<1x1x16x256xf32>,
    %c11_i32 = arith.constant 11 : i32
    %c0_i32_237 = arith.constant 0 : i32
    %531 = arith.addi %c11_i32, %c0_i32_237 : i32
    %532 = arith.index_cast %531 : i32 to index
    %c0_238 = arith.constant 0 : index
    %c0_239 = arith.constant 0 : index
    %533 = vector.load %arg6[%532, %c0_238, %c0_239] : memref<18x16x256xf32, #tpu.memory_space<vmem>>, vector<1x16x256xf32>
    %534 = vector.shape_cast %533 : vector<1x16x256xf32> to vector<16x256xf32>
    %535 = vector.broadcast %20 : vector<1x256xf32> to vector<16x256xf32>
    %536 = arith.mulf %534, %535 : vector<16x256xf32>
    %537 = arith.addf %57, %536 : vector<16x256xf32>
    %c1_i32_240 = arith.constant 1 : i32
    %538 = tpu.dynamic_rotate %534 by %c1_i32_240 dim 0 : vector<16x256xf32>, i32 -> vector<16x256xf32>
    %539 = arith.mulf %538, %25 : vector<16x256xf32>
    %540 = arith.addf %537, %539 : vector<16x256xf32>
    %c15_i32_241 = arith.constant 15 : i32
    %541 = tpu.dynamic_rotate %534 by %c15_i32_241 dim 0 : vector<16x256xf32>, i32 -> vector<16x256xf32>
    %542 = arith.mulf %541, %30 : vector<16x256xf32>
    %543 = arith.addf %540, %542 : vector<16x256xf32>
    %c1_i32_242 = arith.constant 1 : i32
    %544 = arith.addi %c11_i32, %c1_i32_242 : i32
    %545 = arith.index_cast %544 : i32 to index
    %c0_243 = arith.constant 0 : index
    %c0_244 = arith.constant 0 : index
    %546 = vector.load %arg6[%545, %c0_243, %c0_244] : memref<18x16x256xf32, #tpu.memory_space<vmem>>, vector<1x16x256xf32>
    %547 = vector.shape_cast %546 : vector<1x16x256xf32> to vector<16x256xf32>
    %548 = vector.broadcast %32 : vector<1x256xf32> to vector<16x256xf32>
    %549 = arith.mulf %547, %548 : vector<16x256xf32>
    %550 = arith.addf %543, %549 : vector<16x256xf32>
    %c1_i32_245 = arith.constant 1 : i32
    %551 = tpu.dynamic_rotate %547 by %c1_i32_245 dim 0 : vector<16x256xf32>, i32 -> vector<16x256xf32>
    %552 = arith.mulf %551, %37 : vector<16x256xf32>
    %553 = arith.addf %550, %552 : vector<16x256xf32>
    %c15_i32_246 = arith.constant 15 : i32
    %554 = tpu.dynamic_rotate %547 by %c15_i32_246 dim 0 : vector<16x256xf32>, i32 -> vector<16x256xf32>
    %555 = arith.mulf %554, %42 : vector<16x256xf32>
    %556 = arith.addf %553, %555 : vector<16x256xf32>
    %c2_i32_247 = arith.constant 2 : i32
    %557 = arith.addi %c11_i32, %c2_i32_247 : i32
    %558 = arith.index_cast %557 : i32 to index
    %c0_248 = arith.constant 0 : index
    %c0_249 = arith.constant 0 : index
    %559 = vector.load %arg6[%558, %c0_248, %c0_249] : memref<18x16x256xf32, #tpu.memory_space<vmem>>, vector<1x16x256xf32>
    %560 = vector.shape_cast %559 : vector<1x16x256xf32> to vector<16x256xf32>
    %561 = vector.broadcast %44 : vector<1x256xf32> to vector<16x256xf32>
    %562 = arith.mulf %560, %561 : vector<16x256xf32>
    %563 = arith.addf %556, %562 : vector<16x256xf32>
    %c1_i32_250 = arith.constant 1 : i32
    %564 = tpu.dynamic_rotate %560 by %c1_i32_250 dim 0 : vector<16x256xf32>, i32 -> vector<16x256xf32>
    %565 = arith.mulf %564, %49 : vector<16x256xf32>
    %566 = arith.addf %563, %565 : vector<16x256xf32>
    %c15_i32_251 = arith.constant 15 : i32
    %567 = tpu.dynamic_rotate %560 by %c15_i32_251 dim 0 : vector<16x256xf32>, i32 -> vector<16x256xf32>
    %568 = arith.mulf %567, %54 : vector<16x256xf32>
    %569 = arith.addf %566, %568 : vector<16x256xf32>
    %c0_252 = arith.constant 0 : index
    %570 = arith.index_cast %c11_i32 : i32 to index
    %c0_253 = arith.constant 0 : index
    %c0_254 = arith.constant 0 : index
    %571 = vector.load %arg5[%c0_252, %570, %c0_253, %c0_254] : memref<1x16x16x256xf32, #tpu.memory_space<vmem>>, vector<1x1x16x256xf32>
    %572 = vector.shape_cast %571 : vector<1x1x16x256xf32> to vector<16x256xf32>
    %573 = vector.shape_cast %569 : vector<16x256xf32> to vector<1x1x16x256xf32>
    tpu.vector_store %arg5[%c0_252, %570, %c0_253, %c0_254], %573 {strides = array<i32>} : memref<1x16x16x256xf32, #tpu.memory_space<vmem>>, vector<1x1x16x256xf32>,
    %c12_i32 = arith.constant 12 : i32
    %c0_i32_255 = arith.constant 0 : i32
    %574 = arith.addi %c12_i32, %c0_i32_255 : i32
    %575 = arith.index_cast %574 : i32 to index
    %c0_256 = arith.constant 0 : index
    %c0_257 = arith.constant 0 : index
    %576 = vector.load %arg6[%575, %c0_256, %c0_257] : memref<18x16x256xf32, #tpu.memory_space<vmem>>, vector<1x16x256xf32>
    %577 = vector.shape_cast %576 : vector<1x16x256xf32> to vector<16x256xf32>
    %578 = vector.broadcast %20 : vector<1x256xf32> to vector<16x256xf32>
    %579 = arith.mulf %577, %578 : vector<16x256xf32>
    %580 = arith.addf %57, %579 : vector<16x256xf32>
    %c1_i32_258 = arith.constant 1 : i32
    %581 = tpu.dynamic_rotate %577 by %c1_i32_258 dim 0 : vector<16x256xf32>, i32 -> vector<16x256xf32>
    %582 = arith.mulf %581, %25 : vector<16x256xf32>
    %583 = arith.addf %580, %582 : vector<16x256xf32>
    %c15_i32_259 = arith.constant 15 : i32
    %584 = tpu.dynamic_rotate %577 by %c15_i32_259 dim 0 : vector<16x256xf32>, i32 -> vector<16x256xf32>
    %585 = arith.mulf %584, %30 : vector<16x256xf32>
    %586 = arith.addf %583, %585 : vector<16x256xf32>
    %c1_i32_260 = arith.constant 1 : i32
    %587 = arith.addi %c12_i32, %c1_i32_260 : i32
    %588 = arith.index_cast %587 : i32 to index
    %c0_261 = arith.constant 0 : index
    %c0_262 = arith.constant 0 : index
    %589 = vector.load %arg6[%588, %c0_261, %c0_262] : memref<18x16x256xf32, #tpu.memory_space<vmem>>, vector<1x16x256xf32>
    %590 = vector.shape_cast %589 : vector<1x16x256xf32> to vector<16x256xf32>
    %591 = vector.broadcast %32 : vector<1x256xf32> to vector<16x256xf32>
    %592 = arith.mulf %590, %591 : vector<16x256xf32>
    %593 = arith.addf %586, %592 : vector<16x256xf32>
    %c1_i32_263 = arith.constant 1 : i32
    %594 = tpu.dynamic_rotate %590 by %c1_i32_263 dim 0 : vector<16x256xf32>, i32 -> vector<16x256xf32>
    %595 = arith.mulf %594, %37 : vector<16x256xf32>
    %596 = arith.addf %593, %595 : vector<16x256xf32>
    %c15_i32_264 = arith.constant 15 : i32
    %597 = tpu.dynamic_rotate %590 by %c15_i32_264 dim 0 : vector<16x256xf32>, i32 -> vector<16x256xf32>
    %598 = arith.mulf %597, %42 : vector<16x256xf32>
    %599 = arith.addf %596, %598 : vector<16x256xf32>
    %c2_i32_265 = arith.constant 2 : i32
    %600 = arith.addi %c12_i32, %c2_i32_265 : i32
    %601 = arith.index_cast %600 : i32 to index
    %c0_266 = arith.constant 0 : index
    %c0_267 = arith.constant 0 : index
    %602 = vector.load %arg6[%601, %c0_266, %c0_267] : memref<18x16x256xf32, #tpu.memory_space<vmem>>, vector<1x16x256xf32>
    %603 = vector.shape_cast %602 : vector<1x16x256xf32> to vector<16x256xf32>
    %604 = vector.broadcast %44 : vector<1x256xf32> to vector<16x256xf32>
    %605 = arith.mulf %603, %604 : vector<16x256xf32>
    %606 = arith.addf %599, %605 : vector<16x256xf32>
    %c1_i32_268 = arith.constant 1 : i32
    %607 = tpu.dynamic_rotate %603 by %c1_i32_268 dim 0 : vector<16x256xf32>, i32 -> vector<16x256xf32>
    %608 = arith.mulf %607, %49 : vector<16x256xf32>
    %609 = arith.addf %606, %608 : vector<16x256xf32>
    %c15_i32_269 = arith.constant 15 : i32
    %610 = tpu.dynamic_rotate %603 by %c15_i32_269 dim 0 : vector<16x256xf32>, i32 -> vector<16x256xf32>
    %611 = arith.mulf %610, %54 : vector<16x256xf32>
    %612 = arith.addf %609, %611 : vector<16x256xf32>
    %c0_270 = arith.constant 0 : index
    %613 = arith.index_cast %c12_i32 : i32 to index
    %c0_271 = arith.constant 0 : index
    %c0_272 = arith.constant 0 : index
    %614 = vector.load %arg5[%c0_270, %613, %c0_271, %c0_272] : memref<1x16x16x256xf32, #tpu.memory_space<vmem>>, vector<1x1x16x256xf32>
    %615 = vector.shape_cast %614 : vector<1x1x16x256xf32> to vector<16x256xf32>
    %616 = vector.shape_cast %612 : vector<16x256xf32> to vector<1x1x16x256xf32>
    tpu.vector_store %arg5[%c0_270, %613, %c0_271, %c0_272], %616 {strides = array<i32>} : memref<1x16x16x256xf32, #tpu.memory_space<vmem>>, vector<1x1x16x256xf32>,
    %c13_i32 = arith.constant 13 : i32
    %c0_i32_273 = arith.constant 0 : i32
    %617 = arith.addi %c13_i32, %c0_i32_273 : i32
    %618 = arith.index_cast %617 : i32 to index
    %c0_274 = arith.constant 0 : index
    %c0_275 = arith.constant 0 : index
    %619 = vector.load %arg6[%618, %c0_274, %c0_275] : memref<18x16x256xf32, #tpu.memory_space<vmem>>, vector<1x16x256xf32>
    %620 = vector.shape_cast %619 : vector<1x16x256xf32> to vector<16x256xf32>
    %621 = vector.broadcast %20 : vector<1x256xf32> to vector<16x256xf32>
    %622 = arith.mulf %620, %621 : vector<16x256xf32>
    %623 = arith.addf %57, %622 : vector<16x256xf32>
    %c1_i32_276 = arith.constant 1 : i32
    %624 = tpu.dynamic_rotate %620 by %c1_i32_276 dim 0 : vector<16x256xf32>, i32 -> vector<16x256xf32>
    %625 = arith.mulf %624, %25 : vector<16x256xf32>
    %626 = arith.addf %623, %625 : vector<16x256xf32>
    %c15_i32_277 = arith.constant 15 : i32
    %627 = tpu.dynamic_rotate %620 by %c15_i32_277 dim 0 : vector<16x256xf32>, i32 -> vector<16x256xf32>
    %628 = arith.mulf %627, %30 : vector<16x256xf32>
    %629 = arith.addf %626, %628 : vector<16x256xf32>
    %c1_i32_278 = arith.constant 1 : i32
    %630 = arith.addi %c13_i32, %c1_i32_278 : i32
    %631 = arith.index_cast %630 : i32 to index
    %c0_279 = arith.constant 0 : index
    %c0_280 = arith.constant 0 : index
    %632 = vector.load %arg6[%631, %c0_279, %c0_280] : memref<18x16x256xf32, #tpu.memory_space<vmem>>, vector<1x16x256xf32>
    %633 = vector.shape_cast %632 : vector<1x16x256xf32> to vector<16x256xf32>
    %634 = vector.broadcast %32 : vector<1x256xf32> to vector<16x256xf32>
    %635 = arith.mulf %633, %634 : vector<16x256xf32>
    %636 = arith.addf %629, %635 : vector<16x256xf32>
    %c1_i32_281 = arith.constant 1 : i32
    %637 = tpu.dynamic_rotate %633 by %c1_i32_281 dim 0 : vector<16x256xf32>, i32 -> vector<16x256xf32>
    %638 = arith.mulf %637, %37 : vector<16x256xf32>
    %639 = arith.addf %636, %638 : vector<16x256xf32>
    %c15_i32_282 = arith.constant 15 : i32
    %640 = tpu.dynamic_rotate %633 by %c15_i32_282 dim 0 : vector<16x256xf32>, i32 -> vector<16x256xf32>
    %641 = arith.mulf %640, %42 : vector<16x256xf32>
    %642 = arith.addf %639, %641 : vector<16x256xf32>
    %c2_i32_283 = arith.constant 2 : i32
    %643 = arith.addi %c13_i32, %c2_i32_283 : i32
    %644 = arith.index_cast %643 : i32 to index
    %c0_284 = arith.constant 0 : index
    %c0_285 = arith.constant 0 : index
    %645 = vector.load %arg6[%644, %c0_284, %c0_285] : memref<18x16x256xf32, #tpu.memory_space<vmem>>, vector<1x16x256xf32>
    %646 = vector.shape_cast %645 : vector<1x16x256xf32> to vector<16x256xf32>
    %647 = vector.broadcast %44 : vector<1x256xf32> to vector<16x256xf32>
    %648 = arith.mulf %646, %647 : vector<16x256xf32>
    %649 = arith.addf %642, %648 : vector<16x256xf32>
    %c1_i32_286 = arith.constant 1 : i32
    %650 = tpu.dynamic_rotate %646 by %c1_i32_286 dim 0 : vector<16x256xf32>, i32 -> vector<16x256xf32>
    %651 = arith.mulf %650, %49 : vector<16x256xf32>
    %652 = arith.addf %649, %651 : vector<16x256xf32>
    %c15_i32_287 = arith.constant 15 : i32
    %653 = tpu.dynamic_rotate %646 by %c15_i32_287 dim 0 : vector<16x256xf32>, i32 -> vector<16x256xf32>
    %654 = arith.mulf %653, %54 : vector<16x256xf32>
    %655 = arith.addf %652, %654 : vector<16x256xf32>
    %c0_288 = arith.constant 0 : index
    %656 = arith.index_cast %c13_i32 : i32 to index
    %c0_289 = arith.constant 0 : index
    %c0_290 = arith.constant 0 : index
    %657 = vector.load %arg5[%c0_288, %656, %c0_289, %c0_290] : memref<1x16x16x256xf32, #tpu.memory_space<vmem>>, vector<1x1x16x256xf32>
    %658 = vector.shape_cast %657 : vector<1x1x16x256xf32> to vector<16x256xf32>
    %659 = vector.shape_cast %655 : vector<16x256xf32> to vector<1x1x16x256xf32>
    tpu.vector_store %arg5[%c0_288, %656, %c0_289, %c0_290], %659 {strides = array<i32>} : memref<1x16x16x256xf32, #tpu.memory_space<vmem>>, vector<1x1x16x256xf32>,
    %c14_i32 = arith.constant 14 : i32
    %c0_i32_291 = arith.constant 0 : i32
    %660 = arith.addi %c14_i32, %c0_i32_291 : i32
    %661 = arith.index_cast %660 : i32 to index
    %c0_292 = arith.constant 0 : index
    %c0_293 = arith.constant 0 : index
    %662 = vector.load %arg6[%661, %c0_292, %c0_293] : memref<18x16x256xf32, #tpu.memory_space<vmem>>, vector<1x16x256xf32>
    %663 = vector.shape_cast %662 : vector<1x16x256xf32> to vector<16x256xf32>
    %664 = vector.broadcast %20 : vector<1x256xf32> to vector<16x256xf32>
    %665 = arith.mulf %663, %664 : vector<16x256xf32>
    %666 = arith.addf %57, %665 : vector<16x256xf32>
    %c1_i32_294 = arith.constant 1 : i32
    %667 = tpu.dynamic_rotate %663 by %c1_i32_294 dim 0 : vector<16x256xf32>, i32 -> vector<16x256xf32>
    %668 = arith.mulf %667, %25 : vector<16x256xf32>
    %669 = arith.addf %666, %668 : vector<16x256xf32>
    %c15_i32_295 = arith.constant 15 : i32
    %670 = tpu.dynamic_rotate %663 by %c15_i32_295 dim 0 : vector<16x256xf32>, i32 -> vector<16x256xf32>
    %671 = arith.mulf %670, %30 : vector<16x256xf32>
    %672 = arith.addf %669, %671 : vector<16x256xf32>
    %c1_i32_296 = arith.constant 1 : i32
    %673 = arith.addi %c14_i32, %c1_i32_296 : i32
    %674 = arith.index_cast %673 : i32 to index
    %c0_297 = arith.constant 0 : index
    %c0_298 = arith.constant 0 : index
    %675 = vector.load %arg6[%674, %c0_297, %c0_298] : memref<18x16x256xf32, #tpu.memory_space<vmem>>, vector<1x16x256xf32>
    %676 = vector.shape_cast %675 : vector<1x16x256xf32> to vector<16x256xf32>
    %677 = vector.broadcast %32 : vector<1x256xf32> to vector<16x256xf32>
    %678 = arith.mulf %676, %677 : vector<16x256xf32>
    %679 = arith.addf %672, %678 : vector<16x256xf32>
    %c1_i32_299 = arith.constant 1 : i32
    %680 = tpu.dynamic_rotate %676 by %c1_i32_299 dim 0 : vector<16x256xf32>, i32 -> vector<16x256xf32>
    %681 = arith.mulf %680, %37 : vector<16x256xf32>
    %682 = arith.addf %679, %681 : vector<16x256xf32>
    %c15_i32_300 = arith.constant 15 : i32
    %683 = tpu.dynamic_rotate %676 by %c15_i32_300 dim 0 : vector<16x256xf32>, i32 -> vector<16x256xf32>
    %684 = arith.mulf %683, %42 : vector<16x256xf32>
    %685 = arith.addf %682, %684 : vector<16x256xf32>
    %c2_i32_301 = arith.constant 2 : i32
    %686 = arith.addi %c14_i32, %c2_i32_301 : i32
    %687 = arith.index_cast %686 : i32 to index
    %c0_302 = arith.constant 0 : index
    %c0_303 = arith.constant 0 : index
    %688 = vector.load %arg6[%687, %c0_302, %c0_303] : memref<18x16x256xf32, #tpu.memory_space<vmem>>, vector<1x16x256xf32>
    %689 = vector.shape_cast %688 : vector<1x16x256xf32> to vector<16x256xf32>
    %690 = vector.broadcast %44 : vector<1x256xf32> to vector<16x256xf32>
    %691 = arith.mulf %689, %690 : vector<16x256xf32>
    %692 = arith.addf %685, %691 : vector<16x256xf32>
    %c1_i32_304 = arith.constant 1 : i32
    %693 = tpu.dynamic_rotate %689 by %c1_i32_304 dim 0 : vector<16x256xf32>, i32 -> vector<16x256xf32>
    %694 = arith.mulf %693, %49 : vector<16x256xf32>
    %695 = arith.addf %692, %694 : vector<16x256xf32>
    %c15_i32_305 = arith.constant 15 : i32
    %696 = tpu.dynamic_rotate %689 by %c15_i32_305 dim 0 : vector<16x256xf32>, i32 -> vector<16x256xf32>
    %697 = arith.mulf %696, %54 : vector<16x256xf32>
    %698 = arith.addf %695, %697 : vector<16x256xf32>
    %c0_306 = arith.constant 0 : index
    %699 = arith.index_cast %c14_i32 : i32 to index
    %c0_307 = arith.constant 0 : index
    %c0_308 = arith.constant 0 : index
    %700 = vector.load %arg5[%c0_306, %699, %c0_307, %c0_308] : memref<1x16x16x256xf32, #tpu.memory_space<vmem>>, vector<1x1x16x256xf32>
    %701 = vector.shape_cast %700 : vector<1x1x16x256xf32> to vector<16x256xf32>
    %702 = vector.shape_cast %698 : vector<16x256xf32> to vector<1x1x16x256xf32>
    tpu.vector_store %arg5[%c0_306, %699, %c0_307, %c0_308], %702 {strides = array<i32>} : memref<1x16x16x256xf32, #tpu.memory_space<vmem>>, vector<1x1x16x256xf32>,
    %c15_i32_309 = arith.constant 15 : i32
    %c0_i32_310 = arith.constant 0 : i32
    %703 = arith.addi %c15_i32_309, %c0_i32_310 : i32
    %704 = arith.index_cast %703 : i32 to index
    %c0_311 = arith.constant 0 : index
    %c0_312 = arith.constant 0 : index
    %705 = vector.load %arg6[%704, %c0_311, %c0_312] : memref<18x16x256xf32, #tpu.memory_space<vmem>>, vector<1x16x256xf32>
    %706 = vector.shape_cast %705 : vector<1x16x256xf32> to vector<16x256xf32>
    %707 = vector.broadcast %20 : vector<1x256xf32> to vector<16x256xf32>
    %708 = arith.mulf %706, %707 : vector<16x256xf32>
    %709 = arith.addf %57, %708 : vector<16x256xf32>
    %c1_i32_313 = arith.constant 1 : i32
    %710 = tpu.dynamic_rotate %706 by %c1_i32_313 dim 0 : vector<16x256xf32>, i32 -> vector<16x256xf32>
    %711 = arith.mulf %710, %25 : vector<16x256xf32>
    %712 = arith.addf %709, %711 : vector<16x256xf32>
    %c15_i32_314 = arith.constant 15 : i32
    %713 = tpu.dynamic_rotate %706 by %c15_i32_314 dim 0 : vector<16x256xf32>, i32 -> vector<16x256xf32>
    %714 = arith.mulf %713, %30 : vector<16x256xf32>
    %715 = arith.addf %712, %714 : vector<16x256xf32>
    %c1_i32_315 = arith.constant 1 : i32
    %716 = arith.addi %c15_i32_309, %c1_i32_315 : i32
    %717 = arith.index_cast %716 : i32 to index
    %c0_316 = arith.constant 0 : index
    %c0_317 = arith.constant 0 : index
    %718 = vector.load %arg6[%717, %c0_316, %c0_317] : memref<18x16x256xf32, #tpu.memory_space<vmem>>, vector<1x16x256xf32>
    %719 = vector.shape_cast %718 : vector<1x16x256xf32> to vector<16x256xf32>
    %720 = vector.broadcast %32 : vector<1x256xf32> to vector<16x256xf32>
    %721 = arith.mulf %719, %720 : vector<16x256xf32>
    %722 = arith.addf %715, %721 : vector<16x256xf32>
    %c1_i32_318 = arith.constant 1 : i32
    %723 = tpu.dynamic_rotate %719 by %c1_i32_318 dim 0 : vector<16x256xf32>, i32 -> vector<16x256xf32>
    %724 = arith.mulf %723, %37 : vector<16x256xf32>
    %725 = arith.addf %722, %724 : vector<16x256xf32>
    %c15_i32_319 = arith.constant 15 : i32
    %726 = tpu.dynamic_rotate %719 by %c15_i32_319 dim 0 : vector<16x256xf32>, i32 -> vector<16x256xf32>
    %727 = arith.mulf %726, %42 : vector<16x256xf32>
    %728 = arith.addf %725, %727 : vector<16x256xf32>
    %c2_i32_320 = arith.constant 2 : i32
    %729 = arith.addi %c15_i32_309, %c2_i32_320 : i32
    %730 = arith.index_cast %729 : i32 to index
    %c0_321 = arith.constant 0 : index
    %c0_322 = arith.constant 0 : index
    %731 = vector.load %arg6[%730, %c0_321, %c0_322] : memref<18x16x256xf32, #tpu.memory_space<vmem>>, vector<1x16x256xf32>
    %732 = vector.shape_cast %731 : vector<1x16x256xf32> to vector<16x256xf32>
    %733 = vector.broadcast %44 : vector<1x256xf32> to vector<16x256xf32>
    %734 = arith.mulf %732, %733 : vector<16x256xf32>
    %735 = arith.addf %728, %734 : vector<16x256xf32>
    %c1_i32_323 = arith.constant 1 : i32
    %736 = tpu.dynamic_rotate %732 by %c1_i32_323 dim 0 : vector<16x256xf32>, i32 -> vector<16x256xf32>
    %737 = arith.mulf %736, %49 : vector<16x256xf32>
    %738 = arith.addf %735, %737 : vector<16x256xf32>
    %c15_i32_324 = arith.constant 15 : i32
    %739 = tpu.dynamic_rotate %732 by %c15_i32_324 dim 0 : vector<16x256xf32>, i32 -> vector<16x256xf32>
    %740 = arith.mulf %739, %54 : vector<16x256xf32>
    %741 = arith.addf %738, %740 : vector<16x256xf32>
    %c0_325 = arith.constant 0 : index
    %742 = arith.index_cast %c15_i32_309 : i32 to index
    %c0_326 = arith.constant 0 : index
    %c0_327 = arith.constant 0 : index
    %743 = vector.load %arg5[%c0_325, %742, %c0_326, %c0_327] : memref<1x16x16x256xf32, #tpu.memory_space<vmem>>, vector<1x1x16x256xf32>
    %744 = vector.shape_cast %743 : vector<1x1x16x256xf32> to vector<16x256xf32>
    %745 = vector.shape_cast %741 : vector<16x256xf32> to vector<1x1x16x256xf32>
    tpu.vector_store %arg5[%c0_325, %742, %c0_326, %c0_327], %745 {strides = array<i32>} : memref<1x16x16x256xf32, #tpu.memory_space<vmem>>, vector<1x1x16x256xf32>,
    %c16_i32 = arith.constant 16 : i32
    return
  }
  func.func @transform_0(%arg0: i32, %arg1: i32) -> (i32, i32, i32, i32) {
    %c0_i32 = arith.constant 0 : i32
    %c0_i32_0 = arith.constant 0 : i32
    %c0_i32_1 = arith.constant 0 : i32
    return %arg1, %c0_i32, %c0_i32_0, %arg0 : i32, i32, i32, i32
  }
  func.func @transform_1(%arg0: i32, %arg1: i32) -> (i32, i32, i32) {
    %c0_i32 = arith.constant 0 : i32
    %c0_i32_0 = arith.constant 0 : i32
    %c0_i32_1 = arith.constant 0 : i32
    return %c0_i32, %c0_i32_0, %arg0 : i32, i32, i32
  }
  func.func @transform_2(%arg0: i32, %arg1: i32) -> (i32, i32) {
    %c0_i32 = arith.constant 0 : i32
    %c0_i32_0 = arith.constant 0 : i32
    return %c0_i32, %arg0 : i32, i32
  }
  func.func @transform_3(%arg0: i32, %arg1: i32) -> (i32, i32, i32, i32) {
    %c0_i32 = arith.constant 0 : i32
    %c0_i32_0 = arith.constant 0 : i32
    %c0_i32_1 = arith.constant 0 : i32
    return %arg1, %c0_i32, %c0_i32_0, %arg0 : i32, i32, i32, i32
  }
}

</mosaic_0001>

<bundles_post_ra>
// kernel: tpu_custom_call.1
= control target key start
LH: loop header
LB: loop body
LE: loop exit
PB: predicated region body
PF: predicated region fallthrough
CT: control target
= control target key end

     0   :  { %8 = vsyncpa [#allocation4], 0  ;;  %s5694_s0 = inlined_call_operand.hbm [shape: f32[2,16,16,256], index: 0, kind: input, shape index: {}]   ;;  %s5695_s1 = inlined_call_operand.hbm [shape: f32[3,3,256], index: 1, kind: input, shape index: {}]   ;;  %s5696_s2 = inlined_call_operand.vmem [shape: f32[1,256], index: 2, kind: input, shape index: {}]   ;;  %s5697_s3 = inlined_call_operand.hbm [shape: f32[2,16,16,256], index: 3, kind: output, shape index: {}]  }
   0x1   :  { %10 = vsyncpa [#allocation4 + $0x1], 0 }
   0x2   :  { %11 = vsyncpa [#allocation7], 0 }
   0x3   :  { %12 = vsyncpa [#allocation5], 0 }
   0x4   :  { %14 = vsyncpa [#allocation5 + $0x1], 0  ;;  %s3234_s12 = smov 0   ;;  %s3236_s13 = smov 0  }
   0x5   :  { %s3238_s14 = smov 0   ;;  %s3240_s15 = smov 0  }
   0x6   :  { %s3242_s16 = smov 0   ;;  %s3244_s17 = smov 0  }
   0x7 LB: > { %s2896_s18 = sadd.s32 4294967295, %s3202_s17   ;;  %s2897_s19 = sadd.s32 4294967294, %s3202_s17   ;;  %s3202_s17 = sphi %s3244_s17, %s20_s17   ;;  %s3198_s16 = sphi %s3242_s16, %s6197_s16   ;;  %s3194_s15 = sphi %s3240_s15, %s6196_s15   ;;  %s3190_s14 = sphi %s3238_s14, %s6195_s14   ;;  %s3186_s13 = sphi %s3236_s13, %s6194_s13   ;;  %s3182_s12 = sphi %s3234_s12, %s6193_s12  }
   0x8   : > { %p54_p0 = scmp.ne.s32.totalorder %s3186_s13, %s3182_s12  ;;  %p3268_p1 = scmp.eq.s32.totalorder %s2896_s18, 0 }
   0x9   : > { %p3272_p2 = scmp.eq.s32.totalorder %s2896_s18, 1  ;;  %p138_p3 = scmp.eq.s32.totalorder %s2897_s19, 1 }
   0xa   : > { %s5792_s20 = scalar_select %p3268_p1, 1, 0 }
   0xb   : > { %s5793_s21 = scalar_select %p3272_p2, 1, 0 }
   0xc   : > { %p3278_p4 = por %p3268_p1, %p54_p0  ;;  %p2898_p5 = scmp.ge.s32.totalorder %s3202_s17, 1 }
   0xd   : > { %p3283_p6 = por %p138_p3, %p54_p0  ;;  %p145_p7 = scmp.lt.s32.totalorder %s3202_s17, 3 }
   0xe   : > { %s5794_s22 = scalar_select %p3278_p4, 1, 0 }
   0xf   : > { %s5795_s23 = scalar_select %p3283_p6, 1, 0 }
  0x10   : > { %p3288_p8 = pnand %p2898_p5, %p145_p7  ;;  %s3204_s25 = smov [#allocation6]  }
  0x11   : > { %s160_s26 = sshll.u32 %s3204_s25, 4  ;;  %s29_s28 = sadd.s32 1, %s3198_s16  ;;  %s161_s26 = int_to_ptr.vmem [resolvable:$true] %s160_s26 }
  0x12   : > { %s5796_s24 = scalar_select %p3288_p8, 1, 0 }
  0x13   : > { %p2986_p9 = pneg %p3288_p8  ;;  %s3058_s4 = scalar_lea.hbm %s5695_s1, 384 }
  0x14   : > { %p3059_p12 = scmp.ne.s32.totalorder %s5695_s1, %s3058_s4  ;;  %p3065_p5 = scmp.lt.u32.totalorder %s3058_s4, %s5695_s1 }
  0x15   : > { %p3297_p11 = pnand %p2986_p9, %p3268_p1 }
  0x17   : > { %p3060_p13 = pneg %p3297_p11 }
  0x19   : > { %p3061_p0 = pnand %p3060_p13, %p3059_p12 }
  0x1b   : > { %p3062_p3 = pneg %p3061_p0 }
  0x1d   : > { %p3067_p7 = pnand %p3065_p5, %p3062_p3 }
  0x1f   : > { %3070 = shalt.err (!%p3067_p7)
}
  0x20   : > { %s3071_s9 = scalar_lea.vmem %s161_s26, 384  ;;  %p3079_p1 = scmp.lt.s32.totalorder %s161_s26, %s161_s26 }
  0x21   : > { %p3072_p9 = scmp.ne.s32.totalorder %s161_s26, %s3071_s9  ;;  %p3080_p4 = scmp.lt.s32.totalorder %s3071_s9, %s3071_s9 }
  0x23   : > { %p3074_p10 = pnand %p3072_p9, %p3060_p13  ;;  %p3081_p8 = por %p3080_p4, %p3079_p1 }
  0x25   : > { %p3075_p6 = pneg %p3074_p10 }
  0x27   : > { %p3082_p2 = pnand %p3081_p8, %p3075_p6 }
  0x29   : > { %3085 = shalt.err (!%p3082_p2)
}
  0x2a   : > { %s3205_s10 = smov 128   ;;  %s3206_s11 = smov 8  }
  0x2b   : > { %2989 = dma.hbm_to_vmem [thread:$0]  (!%p3297_p11), %s5695_s1, 384, %s161_s26, [#allocation7], %s3205_s10, %s3205_s10, %s3206_s11  }
  0x2c   : > { %p30_p1 = scmp.ge.s32.totalorder %s29_s28, 2  ;;  %s41_s25 = sadd.s32 1, %s3190_s14 }
  0x2d   : > { %p48_p2 = scmp.ne.s32.totalorder %s3190_s14, %s3186_s13  ;;  %p49_p4 = scmp.eq.s32.totalorder %s3202_s17, 0 }
  0x2e   : > { %s6199_s28 = smov (%p30_p1, %s29_s28), 0  ;;  %p5799_p8 = scmp.ne.s32.totalorder %s5793_s21, 0 }
  0x2f   : > { %p3324_p6 = por %p49_p4, %p48_p2  ;;  %s36_s27 = ssub.s32 %s3198_s16, %s6199_s28 }
  0x30   : > { %p3330_p10 = por %p5799_p8, %p48_p2  ;;  %p2999_p12 = scmp.lt.s32.totalorder %s3202_s17, 2 }
  0x31   : > { %p39_p11 = scmp.eq.s32.totalorder %s36_s27, 0  ;;  %s182_s26 = sand.u32 1, %s3190_s14  }
  0x32   : > { %s2902_s4 = sshll.u32 %s182_s26, 9  ;;  %s2976_s6 = sshll.u32 %s3198_s16, 13 }
  0x33   : > { %s3339_s5 = scalar_select %p39_p11, %s3190_s14, %s41_s25  }
  0x34   : > { %s3345_s9 = scalar_lea.hbm %s5694_s0, %s2976_s6  ;;  %s186_s21 = scalar_lea.vmem [#allocation3], %s2902_s4 }
  0x35   : > { %s195_s10 = sshll.u32 %s186_s21, 4  ;;  %p3351_p13 = pnand %p2999_p12, %p3324_p6  ;;  %s3347_s10 = int_to_ptr.vmem [resolvable:$true] %s195_s10 }
  0x36   : > { %s3355_s18 = scalar_lea.sflag [#allocation4], %s182_s26  ;;  %s3086_s19 = scalar_lea.hbm %s3345_s9, 8192 }
  0x37   : > { %p3087_p0 = scmp.ne.s32.totalorder %s3345_s9, %s3086_s19  ;;  %p3088_p3 = pneg %p3351_p13 }
  0x38   : > { %s3091_s29 = scalar_lea.hbm %s5694_s0, 16384  ;;  %p3092_p9 = scmp.lt.u32.totalorder %s3345_s9, %s5694_s0 }
  0x39   : > { %p3089_p5 = pnand %p3088_p3, %p3087_p0  ;;  %p3093_p1 = scmp.lt.u32.totalorder %s3091_s29, %s3086_s19 }
  0x3a   : > { %p3095_p4 = scmp.lt.u32.totalorder %s3086_s19, %s3345_s9 }
  0x3b   : > { %p3090_p7 = pneg %p3089_p5  ;;  %p3094_p2 = por %p3093_p1, %p3092_p9 }
  0x3d   : > { %p3096_p6 = por %p3095_p4, %p3094_p2 }
  0x3f   : > { %p3097_p8 = pnand %p3096_p6, %p3090_p7 }
  0x41   : > { %3100 = shalt.err (!%p3097_p8)
}
  0x42   : > { %s3101_s26 = scalar_lea.vmem %s3347_s10, 8192  ;;  %s3207_s7 = smov [#allocation3]  }
  0x43   : > { %p3102_p12 = scmp.ne.s32.totalorder %s3347_s10, %s3101_s26  ;;  %s3106_s8 = sshll.u32 %s3207_s7, 4  ;;  %s3107_s8 = int_to_ptr.vmem [resolvable:$false] %s3106_s8 }
  0x44   : > { %s3108_s21 = scalar_lea.vmem %s3107_s8, 16384  ;;  %p3109_p5 = scmp.lt.s32.totalorder %s3347_s10, %s3107_s8 }
  0x45   : > { %p3104_p11 = pnand %p3102_p12, %p3088_p3  ;;  %p3110_p9 = scmp.lt.s32.totalorder %s3108_s21, %s3101_s26 }
  0x47   : > { %p3105_p0 = pneg %p3104_p11  ;;  %p3111_p1 = por %p3110_p9, %p3109_p5 }
  0x49   : > { %p3112_p2 = pnand %p3111_p1, %p3105_p0 }
  0x4b   : > { %3115 = shalt.err (!%p3112_p2)
}
  0x4c   : > { %s3208_s19 = smov 256   ;;  %s3209_s25 = smov 16  }
  0x4d   : > { %2993 = dma.hbm_to_vmem [thread:$0]  (!%p3351_p13), %s3345_s9, 8192, %s3347_s10, %s3355_s18, %s3208_s19, %s3208_s19, %s3209_s25  }
  0x4e   : > { %p5802_p3 = scmp.ne.s32.totalorder %s5796_s24, 0 }
  0x50   : > { %207 = sbr.rel (%p5802_p3) target bundleno = 495 (0x1ef), region = 32 }
  0x57   : > { %s3386_s27 = sand.u32 1, %s3186_s13   ;;  %p5803_p7 = scmp.ne.s32.totalorder %s5794_s22, 0 }
  0x58   : > { %s2906_s29 = sshll.u32 %s3386_s27, 9  ;;  %s210_s4 = scalar_lea.sflag [#allocation4], %s3386_s27 }
  0x59   : > { %s3392_s6 = scalar_lea.vmem [#allocation3], %s2906_s29 }
  0x5a   : > { %3169 = dma.done.wait (%p5803_p7), %s210_s4, 8192  }
  0x5b   : > { %3171 = vsyncadd (%p5803_p7), %s210_s4, 4294959104  ;;  %p5804_p13 = scmp.ne.s32.totalorder %s5792_s20, 0 }
  0x5d   : > { %3173 = dma.done.wait (%p5804_p13), [#allocation7], 384  }
  0x5e   : > { %3175 = vsyncadd (%p5804_p13), [#allocation7], 4294966912  ;;  %v390_v0 = vlaneseq  ;;  %v3210_v5 = vmov 0.0   ;;  %v406_v8 = vld [vmem:[#allocation6 + $0x1] ss:$4 sm:$0x3] }
  0x5f   : > { %v3412_v7 = vrot.slane %v3210_v5, 7  ;;  %v512_v9 = vld [vmem:[%s5696_s2] sm:$0x3]  ;;  %v424_v11 = vld [vmem:[#allocation6 + $0x2] ss:$4 sm:$0x3] }
  0x60   : > { %v3402_v1 = vshrl.u32 %v390_v0, 7  ;;  %v407_v10 = vld [vmem:[#allocation6] ss:$4 sm:$0x3]  ;;  %v3442_v23 = vrot.slane %v3210_v5, 1  ;;  %v3473_v36 = vld [vmem:[%s3392_s6 + $0x10] sm:$0xff] }
  0x61   : > { %5805 = vst [vmem:[#allocation12_spill] sm:$0xff] %v3412_v7  ;;  %v442_v16 = vld [vmem:[#allocation6 + $0x9] ss:$4 sm:$0x3]  ;;  %v3458_v30 = vld [vmem:[%s3392_s6] sm:$0xff]  ;;  %v3488_v42 = vld [vmem:[%s3392_s6 + $0x30] sm:$0xff] }
  0x62   : > { %v392_v2 = vadd.s32 8, %v3402_v1  ;;  %vm393_vm0 = vcmp.gt.s32.totalorder %v3402_v1, 0  ;;  %v3407_v3 = vsub.s32 0, %v3402_v1  ;;  %v3410_v4 = vsub.s32 1, %v3402_v1  ;;  %5813 = vst [vmem:[#allocation20_spill] sm:$0xff] %v3442_v23  ;;  %v3485_v41 = vld [vmem:[%s3392_s6 + $0x20] sm:$0xff] }
  0x63   : > { %v2909_v6 = vsel %vm393_vm0, 1.0, %v3210_v5  ;;  %v443_v17 = vld [vmem:[#allocation6 + $0x8] ss:$4 sm:$0x3]  ;;  %vm551_vm2 = vcmp.lt.s32.totalorder %v3402_v1, 1  ;;  %vm568_vm3 = vcmp.lt.s32.totalorder %v3402_v1, 7 }
  0x64   : > { %vm400_vm1 = vcmp.lt.s32.totalorder %v392_v2, 15  ;;  %v3418_v12 = vrot.slane %v407_v10, %v3407_v3  ;;  %v3421_v13 = vrot.slane %v407_v10, %v3410_v4  ;;  %v3424_v14 = vrot.slane %v424_v11, %v3407_v3  ;;  %v460_v24 = vld [vmem:[#allocation6 + $0xa] ss:$4 sm:$0x3]  ;;  %s3653_s24 = scalar_lea.vmem [#allocation8], %s2906_s29  ;;  %s2977_s9 = sshll.u32 %s3194_s15, 13 }
  0x65   : > { %v3427_v15 = vrot.slane %v424_v11, %v3410_v4  ;;  %v2910_v18 = vsel %vm400_vm1, 1.0, %v3210_v5  ;;  %v3430_v19 = vrot.slane %v443_v17, %v3407_v3  ;;  %v3433_v20 = vrot.slane %v443_v17, %v3410_v4  ;;  %v479_v25 = vld [vmem:[#allocation6 + $0x10] ss:$4 sm:$0x3]  ;;  %s2781_s10 = sshll.u32 %s3653_s24, 4  ;;  %s5641_s26 = scalar_lea.hbm %s5697_s3, %s2977_s9  ;;  %s5643_s10 = int_to_ptr.vmem [resolvable:$true] %s2781_s10 }
  0x66   : > { %5806 = vst [vmem:[#allocation13_spill] sm:$0xff] %v3418_v12  ;;  %5807 = vst [vmem:[#allocation14_spill] sm:$0xff] %v3421_v13  ;;  %v3436_v21 = vrot.slane %v406_v8, %v3407_v3  ;;  %v3439_v22 = vmul.f32 %v2909_v6, %v3418_v12  ;;  %v3446_v26 = vrot.slane %v512_v9, %v3407_v3  ;;  %v496_v34 = vld [vmem:[#allocation6 + $0x12] ss:$4 sm:$0x3]  ;;  %v5706_v50 = vrot.slane %v3458_v30, 7 }
  0x67   : > { %5808 = vst [vmem:[#allocation15_spill] sm:$0xff] %v3424_v14  ;;  %5809 = vst [vmem:[#allocation16_spill] sm:$0xff] %v3427_v15  ;;  %v3449_v27 = vrot.slane %v512_v9, %v3410_v4  ;;  %v3452_v28 = vrot.slane %v406_v8, %v3410_v4  ;;  %v3455_v29 = vrot.slane %v442_v16, %v3407_v3  ;;  %v478_v51 = vld [vmem:[#allocation6 + $0x11] ss:$4 sm:$0x3]  ;;  %v5707_v53 = vrot.slane %v3473_v36, 7 }
  0x68   : > { %5810 = vst [vmem:[#allocation17_spill] sm:$0xff] %v3430_v19  ;;  %5811 = vst [vmem:[#allocation18_spill] sm:$0xff] %v3433_v20  ;;  %v3461_v31 = vmul.f32 %v2909_v6, %v3421_v13  ;;  %v3464_v32 = vmul.f32 %v2910_v18, %v3424_v14  ;;  %v3467_v33 = vmul.f32 %v2910_v18, %v3427_v15  ;;  %v539_v39 = vmul.f32 0.0, %v3436_v21  ;;  %s2766_s15 = scalar_lea.sflag [#allocation5], %s3386_s27  ;;  %s3116_s7 = scalar_lea.vmem %s5643_s10, 8192 }
  0x69   : > { %5812 = vst [vmem:[#allocation19_spill] sm:$0xff] %v3439_v22  ;;  %v3470_v35 = vrot.slane %v442_v16, %v3410_v4  ;;  %v3476_v37 = vmul.f32 %v2909_v6, %v3430_v19  ;;  %v3479_v38 = vmul.f32 %v2909_v6, %v3433_v20  ;;  %v556_v40 = vmul.f32 %v3412_v7, %v3439_v22  ;;  %p3117_p4 = scmp.ne.s32.totalorder %s5643_s10, %s3116_s7  ;;  %s3211_s8 = smov [#allocation8]  }
  0x6a   : > { %5814 = vst [vmem:[#allocation21_spill] sm:$0xff] %v3461_v31  ;;  %5815 = vst [vmem:[#allocation22_spill] sm:$0xff] %v3464_v32  ;;  %v3491_v43 = vrot.slane %v460_v24, %v3407_v3  ;;  %v3494_v44 = vrot.slane %v460_v24, %v3410_v4  ;;  %v3497_v45 = vrot.slane %v479_v25, %v3407_v3  ;;  %v5705_v54 = vrot.slane %v3458_v30, 1  ;;  %s3120_s21 = sshll.u32 %s3211_s8, 4  ;;  %s3121_s21 = int_to_ptr.vmem [resolvable:$false] %s3120_s21 }
  0x6b   : > { %5816 = vst [vmem:[#allocation23_spill] sm:$0xff] %v3467_v33  ;;  %5817 = vst [vmem:[#allocation24_spill] sm:$0xff] %v3479_v38  ;;  %v3500_v46 = vrot.slane %v479_v25, %v3410_v4  ;;  %v3503_v47 = vrot.slane %v496_v34, %v3407_v3  ;;  %v3506_v48 = vadd.f32 %v539_v39, %v3446_v26  ;;  %v5704_v55 = vrot.slane %v3473_v36, 1  ;;  %v3565_v25 = vld [vmem:[%s3392_s6 + $0x8] sm:$0xff]  ;;  %p3118_p6 = pnand %p3117_p4, %p3330_p10  ;;  %s3122_s19 = scalar_lea.vmem %s3121_s21, 16384 }
  0x6c   : > { %5818 = vst [vmem:[#allocation25_spill] sm:$0xff] %v3491_v43  ;;  %5819 = vst [vmem:[#allocation26_spill] sm:$0xff] %v3494_v44  ;;  %v573_v49 = vmul.f32 %v3442_v23, %v3424_v14  ;;  %v3512_v52 = vrot.slane %v496_v34, %v3410_v4  ;;  %v596_v57 = vmul.f32 %v3455_v29, %v3458_v30  ;;  %v5702_v58 = vrot.slane %v3485_v41, 7  ;;  %p3123_p12 = scmp.lt.s32.totalorder %s5643_s10, %s3121_s21  ;;  %p3124_p11 = scmp.lt.s32.totalorder %s3122_s19, %s3116_s7 }
  0x6d   : > { %5820 = vst [vmem:[#allocation27_spill] sm:$0xff] %v3497_v45  ;;  %5821 = vst [vmem:[#allocation28_spill] sm:$0xff] %v3500_v46  ;;  %v560_v56 = vadd.f32 %v556_v40, %v3506_v48  ;;  %v5703_v59 = vrot.slane %v3488_v42, 7  ;;  %v3523_v60 = vmul.f32 %v2910_v18, %v3491_v43  ;;  %v3526_v61 = vmul.f32 %v2910_v18, %v3494_v44  ;;  %v3574_v40 = vld [vmem:[%s3392_s6 + $0x18] sm:$0xff]  ;;  %p3119_p8 = pneg %p3118_p6 }
  0x6e   : > { %5822 = vst [vmem:[#allocation29_spill] sm:$0xff] %v3503_v47  ;;  %v3529_v62 = vmul.f32 %v2909_v6, %v3497_v45  ;;  %v610_v63 = vsel %vm551_vm2, %v5707_v53, %v5706_v50  ;;  %v3538_v0 = vmul.f32 %v2909_v6, %v3500_v46  ;;  %v3542_v8 = vrot.slane %v478_v51, %v3407_v3  ;;  %p3125_p0 = por %p3124_p11, %p3123_p12 }
  0x6f   : > { %5823 = vst [vmem:[#allocation30_spill] sm:$0xff] %v3523_v60  ;;  %5824 = vst [vmem:[#allocation31_spill] sm:$0xff] %v3526_v61  ;;  %v577_v2 = vadd.f32 %v573_v49, %v560_v56  ;;  %v612_v5 = vmul.f32 %v610_v63, %v3476_v37  ;;  %v624_v9 = vsel %vm568_vm3, %v5705_v54, %v5704_v55  ;;  %v5712_v10 = vrot.slane %v3485_v41, 1 }
  0x70   : > { %5825 = vst [vmem:[#allocation32_spill] sm:$0xff] %v3529_v62  ;;  %5826 = vst [vmem:[#allocation33_spill] sm:$0xff] %v3538_v0  ;;  %v666_v6 = vsel %vm551_vm2, %v5703_v59, %v5702_v58  ;;  %v5711_v3 = vrot.slane %v3488_v42, 1  ;;  %v3559_v11 = vmul.f32 %v2910_v18, %v3503_v47  ;;  %v628_v17 = vmul.f32 %v624_v9, %v3491_v43  ;;  %p3126_p5 = pnand %p3125_p0, %p3119_p8 }
  0x71   : > { %v600_v16 = vadd.f32 %v596_v57, %v577_v2  ;;  %v838_v24 = vmul.f32 %v3436_v21, %v3485_v41  ;;  %v3568_v34 = vmul.f32 %v2910_v18, %v3512_v52  ;;  %v3571_v39 = vrot.slane %v478_v51, %v3410_v4  ;;  %v3584_v18 = vld [vmem:[%s3392_s6 + $0x28] sm:$0xff]  ;;  %v3593_v51 = vld [vmem:[%s3392_s6 + $0x38] sm:$0xff] }
  0x72   : > { %5827 = vst [vmem:[#allocation34_spill] sm:$0xff] %v3559_v11  ;;  %v540_v49 = vmul.f32 0.0, %v3452_v28  ;;  %v557_v56 = vmul.f32 %v3412_v7, %v3461_v31  ;;  %v652_v2 = vmul.f32 %v3542_v8, %v3485_v41  ;;  %v668_v58 = vmul.f32 %v666_v6, %v3529_v62  ;;  %5829 = vst [vmem:[#allocation36_spill] sm:$0xff] %v3593_v51 }
  0x73   : > { %5828 = vst [vmem:[#allocation35_spill] sm:$0xff] %v3568_v34  ;;  %v616_v57 = vadd.f32 %v612_v5, %v600_v16  ;;  %v854_v59 = vmul.f32 %v666_v6, %v3439_v22  ;;  %v680_v4 = vsel %vm568_vm3, %v5712_v10, %v5711_v3  ;;  %v574_v16 = vmul.f32 %v3442_v23, %v3427_v15 }
  0x74   : > { %v3596_v5 = vadd.f32 %v540_v49, %v3449_v27  ;;  %v5718_v55 = vrot.slane %v3565_v25, 7  ;;  %v842_v50 = vadd.f32 %v838_v24, %v3446_v26  ;;  %v5719_v53 = vrot.slane %v3574_v40, 7 }
  0x75   : > { %v632_v54 = vadd.f32 %v628_v17, %v616_v57  ;;  %v597_v3 = vmul.f32 %v3470_v35, %v3565_v25  ;;  %v5723_v49 = vrot.slane %v3574_v40, 1  ;;  %v684_v61 = vmul.f32 %v680_v4, %v3503_v47 }
  0x76   : > { %v561_v34 = vadd.f32 %v557_v56, %v3596_v5  ;;  %v611_v17 = vsel %vm551_vm2, %v5719_v53, %v5718_v55  ;;  %v5722_v24 = vrot.slane %v3593_v51, 7  ;;  %v3618_v56 = vmul.f32 %v610_v63, %v3439_v22 }
  0x77   : > { %v656_v46 = vadd.f32 %v652_v2, %v632_v54  ;;  %v613_v62 = vmul.f32 %v611_v17, %v3479_v38  ;;  %v5831_v54 = vrot.slane %v3565_v25, 1  ;;  %v5832_v47 = vrot.slane %v3584_v18, 7 }
  0x78   : > { %5830 = vst [vmem:[#allocation37_spill] sm:$0xff] %v3618_v56  ;;  %v578_v57 = vadd.f32 %v574_v16, %v561_v34  ;;  %v5725_v34 = vrot.slane %v3584_v18, 1  ;;  %v5724_v16 = vrot.slane %v3593_v51, 1  ;;  %v858_v55 = vadd.f32 %v854_v59, %v842_v50 }
  0x79   : > { %v625_v2 = vsel %vm568_vm3, %v5831_v54, %v5723_v49  ;;  %v672_v10 = vadd.f32 %v668_v58, %v656_v46  ;;  %v667_v63 = vsel %vm551_vm2, %v5722_v24, %v5832_v47  ;;  %v870_v53 = vmul.f32 %v680_v4, %v3424_v14 }
  0x7a   : > { %v601_v22 = vadd.f32 %v597_v3, %v578_v57  ;;  %v629_v56 = vmul.f32 %v625_v2, %v3494_v44  ;;  %v3638_v46 = vmul.f32 %v624_v9, %v3424_v14  ;;  %v3641_v58 = vmul.f32 %v666_v6, %v3476_v37 }
  0x7b   : > { %v688_v54 = vadd.f32 %v684_v61, %v672_v10  ;;  %v839_v47 = vmul.f32 %v3452_v28, %v3584_v18  ;;  %v3646_v24 = vmul.f32 %v680_v4, %v3491_v43  ;;  %v653_v50 = vmul.f32 %v3571_v39, %v3584_v18 }
  0x7c   : > { %v617_v49 = vadd.f32 %v613_v62, %v601_v22  ;;  %v855_v59 = vmul.f32 %v667_v63, %v3461_v31  ;;  %v681_v61 = vsel %vm568_vm3, %v5725_v34, %v5724_v16  ;;  %v558_v22 = vmul.f32 %v3412_v7, %v3418_v12 }
  0x7d   : > { %692 = vst [vmem:[%s3653_s24] sm:$0xff] %v688_v54  ;;  %v843_v9 = vadd.f32 %v839_v47, %v3449_v27  ;;  %v575_v62 = vmul.f32 %v3442_v23, %v3464_v32  ;;  %v3667_v6 = vadd.f32 %v870_v53, %v858_v55  ;;  %v669_v3 = vmul.f32 %v667_v63, %v3538_v0 }
  0x7e   : > { %v633_v10 = vadd.f32 %v629_v56, %v617_v49  ;;  %v3671_v4 = vmul.f32 %v611_v17, %v3461_v31  ;;  %v685_v57 = vmul.f32 %v681_v61, %v3512_v52  ;;  %v3675_v54 = vmul.f32 %v625_v2, %v3427_v15 }
  0x7f   : > { %5833 = vst [vmem:[#allocation38_spill] sm:$0xff] %v3667_v6  ;;  %v562_v47 = vadd.f32 %v558_v22, %v3506_v48  ;;  %v598_v16 = vmul.f32 %v3455_v29, %v3473_v36  ;;  %v859_v43 = vadd.f32 %v855_v59, %v843_v9  ;;  %v871_v53 = vmul.f32 %v681_v61, %v3427_v15 }
  0x80   : > { %v657_v34 = vadd.f32 %v653_v50, %v633_v10  ;;  %v5834_v55 = vrot.slane %v3473_v36, 7  ;;  %v5835_v49 = vrot.slane %v3458_v30, 7  ;;  %v3688_v56 = vmul.f32 %v667_v63, %v3479_v38 }
  0x81   : > { %v579_v2 = vadd.f32 %v575_v62, %v562_v47  ;;  %v5836_v22 = vrot.slane %v3458_v30, 1  ;;  %v5837_v50 = vrot.slane %v3473_v36, 1  ;;  %v3698_v10 = vmul.f32 %v681_v61, %v3494_v44 }
  0x82   : > { %v608_v17 = vsel %vm551_vm2, %v5835_v49, %v5834_v55  ;;  %v673_v9 = vadd.f32 %v669_v3, %v657_v34  ;;  %v654_v63 = vmul.f32 %v3542_v8, %v3488_v42  ;;  %v5839_v47 = vrot.slane %v3488_v42, 7 }
  0x83   : > { %v614_v48 = vmul.f32 %v608_v17, %v3430_v19  ;;  %v626_v59 = vsel %vm568_vm3, %v5837_v50, %v5836_v22  ;;  %5838 = vst [vmem:[#allocation39_spill] sm:$0xff] %v3698_v10  ;;  %v602_v62 = vadd.f32 %v598_v16, %v579_v2  ;;  %v5840_v49 = vrot.slane %v3485_v41, 7 }
  0x84   : > { %v630_v55 = vmul.f32 %v626_v59, %v3523_v60  ;;  %v5841_v22 = vrot.slane %v3485_v41, 1  ;;  %v5842_v34 = vrot.slane %v3488_v42, 1  ;;  %v840_v3 = vmul.f32 %v3436_v21, %v3488_v42 }
  0x85   : > { %v664_v6 = vsel %vm551_vm2, %v5840_v49, %v5839_v47  ;;  %v689_v50 = vadd.f32 %v685_v57, %v673_v9  ;;  %v3717_v44 = vadd.f32 %v871_v53, %v859_v43  ;;  %v559_v16 = vmul.f32 %v3412_v7, %v3421_v13 }
  0x86   : > { %v682_v61 = vsel %vm568_vm3, %v5842_v34, %v5841_v22  ;;  %v576_v2 = vmul.f32 %v3442_v23, %v3467_v33  ;;  %v618_v47 = vadd.f32 %v614_v48, %v602_v62  ;;  %v670_v49 = vmul.f32 %v664_v6, %v3497_v45 }
  0x87   : > { %5843 = vst [vmem:[#allocation40_spill] sm:$0xff] %v3717_v44  ;;  %v686_v38 = vmul.f32 %v682_v61, %v3559_v11  ;;  %v3726_v10 = vmul.f32 %v608_v17, %v3418_v12  ;;  %693 = vst [vmem:[%s3653_s24 + $0x8] sm:$0xff] %v689_v50  ;;  %v844_v22 = vadd.f32 %v840_v3, %v3446_v26  ;;  %v5845_v17 = vrot.slane %v3574_v40, 7 }
  0x88   : > { %v856_v43 = vmul.f32 %v664_v6, %v3418_v12  ;;  %v563_v57 = vadd.f32 %v559_v16, %v3596_v5  ;;  %v599_v53 = vmul.f32 %v3470_v35, %v3574_v40  ;;  %v634_v9 = vadd.f32 %v630_v55, %v618_v47 }
  0x89   : > { %v3735_v48 = vmul.f32 %v626_v59, %v3464_v32  ;;  %v3738_v62 = vmul.f32 %v664_v6, %v3430_v19  ;;  %v5846_v34 = vrot.slane %v3565_v25, 7  ;;  %v3747_v5 = vmul.f32 %v682_v61, %v3523_v60 }
  0x8a   : > { %v872_v55 = vmul.f32 %v682_v61, %v3464_v32  ;;  %v580_v50 = vadd.f32 %v576_v2, %v563_v57  ;;  %v658_v16 = vadd.f32 %v654_v63, %v634_v9  ;;  %v5848_v47 = vrot.slane %v3565_v25, 1  ;;  %v5852_v63 = vld [vmem:[#allocation31_spill] sm:$0xff]  ;;  %v5853_v32 = vld [vmem:[#allocation28_spill] sm:$0xff] }
  0x8b   : > { %5844 = vst [vmem:[#allocation41_spill] sm:$0xff] %v3738_v62  ;;  %v609_v3 = vsel %vm551_vm2, %v5846_v34, %v5845_v17  ;;  %5847 = vst [vmem:[#allocation42_spill] sm:$0xff] %v3747_v5  ;;  %v5849_v6 = vrot.slane %v3574_v40, 1  ;;  %v655_v7 = vmul.f32 %v3571_v39, %v3593_v51  ;;  %v5850_v17 = vrot.slane %v3593_v51, 7  ;;  %v3769_v5 = vld [vmem:[%s3392_s6 + $0x40] sm:$0xff] }
  0x8c   : > { %v615_v59 = vmul.f32 %v609_v3, %v3433_v20  ;;  %v5851_v34 = vrot.slane %v3584_v18, 7  ;;  %v860_v2 = vadd.f32 %v856_v43, %v844_v22  ;;  %v603_v57 = vadd.f32 %v599_v53, %v580_v50 }
  0x8d   : > { %v627_v23 = vsel %vm568_vm3, %v5849_v6, %v5848_v47  ;;  %v841_v44 = vmul.f32 %v3452_v28, %v3593_v51  ;;  %v3772_v47 = vld [vmem:[%s3392_s6 + $0x50] sm:$0xff]  ;;  %v674_v6 = vadd.f32 %v670_v49, %v658_v16  ;;  %v5854_v62 = vrot.slane %v3584_v18, 1 }
  0x8e   : > { %v665_v61 = vsel %vm551_vm2, %v5851_v34, %v5850_v17  ;;  %v631_v9 = vmul.f32 %v627_v23, %v5852_v63  ;;  %v5855_v11 = vrot.slane %v3593_v51, 1  ;;  %v700_v43 = vmul.f32 %v3436_v21, %v3458_v30 }
  0x8f   : > { %v671_v60 = vmul.f32 %v665_v61, %v5853_v32  ;;  %v619_v53 = vadd.f32 %v615_v59, %v603_v57  ;;  %v3784_v50 = vmul.f32 %v609_v3, %v3421_v13  ;;  %v845_v17 = vadd.f32 %v841_v44, %v3449_v27  ;;  %v5856_v44 = vld [vmem:[#allocation37_spill] sm:$0xff] }
  0x90   : > { %v683_v22 = vsel %vm568_vm3, %v5855_v11, %v5854_v62  ;;  %v857_v49 = vmul.f32 %v665_v61, %v3421_v13  ;;  %v690_v16 = vadd.f32 %v686_v38, %v674_v6  ;;  %v704_v34 = vadd.f32 %v700_v43, %v3446_v26  ;;  %v5858_v6 = vld [vmem:[#allocation35_spill] sm:$0xff] }
  0x91   : > { %v5747_v32 = vrot.slane %v3769_v5, 7  ;;  %v5748_v51 = vrot.slane %v3772_v47, 7  ;;  %v635_v12 = vadd.f32 %v631_v9, %v619_v53  ;;  %v744_v11 = vmul.f32 %v3455_v29, %v3485_v41 }
  0x92   : > { %v5746_v30 = vrot.slane %v3769_v5, 1  ;;  %v5745_v62 = vrot.slane %v3772_v47, 1  ;;  %694 = vst [vmem:[%s3653_s24 + $0x10] sm:$0xff] %v690_v16  ;;  %v720_v3 = vadd.f32 %v5856_v44, %v704_v34  ;;  %v976_v59 = vmul.f32 %v3436_v21, %v3769_v5 }
  0x93   : > { %v803_v38 = vsel %vm551_vm2, %v5748_v51, %v5747_v32  ;;  %v701_v41 = vmul.f32 %v3452_v28, %v3565_v25  ;;  %v3807_v57 = vadd.f32 %v872_v55, %v860_v2  ;;  %v659_v9 = vadd.f32 %v655_v7, %v635_v12  ;;  %v3825_v7 = vld [vmem:[%s3392_s6 + $0x48] sm:$0xff]  ;;  %v3828_v12 = vld [vmem:[%s3392_s6 + $0x58] sm:$0xff] }
  0x94   : > { %v687_v43 = vmul.f32 %v683_v22, %v5858_v6  ;;  %v817_v53 = vsel %vm568_vm3, %v5746_v30, %v5745_v62  ;;  %v3817_v16 = vmul.f32 %v627_v23, %v3467_v33  ;;  %v3820_v34 = vmul.f32 %v665_v61, %v3433_v20  ;;  %v5859_v23 = vld [vmem:[#allocation19_spill] sm:$0xff] }
  0x95   : > { %5857 = vst [vmem:[#allocation37_spill] sm:$0xff] %v3807_v57  ;;  %v873_v25 = vmul.f32 %v683_v22, %v3467_v33  ;;  %v736_v55 = vadd.f32 %v3638_v46, %v720_v3  ;;  %v675_v2 = vadd.f32 %v671_v60, %v659_v9  ;;  %v789_v44 = vmul.f32 %v3542_v8, %v3769_v5 }
  0x96   : > { %v980_v62 = vadd.f32 %v976_v59, %v3446_v26  ;;  %v992_v30 = vmul.f32 %v803_v38, %v5859_v23  ;;  %v861_v32 = vadd.f32 %v857_v49, %v845_v17  ;;  %v1008_v51 = vmul.f32 %v817_v53, %v3424_v14 }
  0x97   : > { %v748_v61 = vadd.f32 %v744_v11, %v736_v55  ;;  %v705_v57 = vadd.f32 %v701_v41, %v3449_v27  ;;  %v691_v46 = vadd.f32 %v687_v43, %v675_v2  ;;  %v745_v3 = vmul.f32 %v3470_v35, %v3584_v18 }
  0x98   : > { %v798_v60 = vrot.slane %v3825_v7, 7  ;;  %v800_v9 = vrot.slane %v3828_v12, 7  ;;  %v5752_v23 = vrot.slane %v3825_v7, 1  ;;  %v5751_v17 = vrot.slane %v3828_v12, 1 }
  0x99   : > { %v764_v20 = vadd.f32 %v3641_v58, %v748_v61  ;;  %v721_v59 = vadd.f32 %v3671_v4, %v705_v57  ;;  %695 = vst [vmem:[%s3653_s24 + $0x18] sm:$0xff] %v691_v46  ;;  %v996_v49 = vadd.f32 %v992_v30, %v980_v62  ;;  %v977_v18 = vmul.f32 %v3452_v28, %v3825_v7  ;;  %v5860_v4 = vld [vmem:[#allocation32_spill] sm:$0xff]  ;;  %v5862_v30 = vld [vmem:[#allocation29_spill] sm:$0xff] }
  0x9a   : > { %v804_v11 = vsel %vm551_vm2, %v800_v9, %v798_v60  ;;  %v702_v41 = vmul.f32 %v3436_v21, %v3473_v36  ;;  %v3852_v43 = vmul.f32 %v683_v22, %v5852_v63  ;;  %v805_v57 = vmul.f32 %v803_v38, %v5860_v4 }
  0x9b   : > { %v780_v58 = vadd.f32 %v3646_v24, %v764_v20  ;;  %v737_v55 = vadd.f32 %v3675_v54, %v721_v59  ;;  %v3857_v2 = vadd.f32 %v873_v25, %v861_v32  ;;  %v821_v62 = vmul.f32 %v817_v53, %v5862_v30  ;;  %v5863_v32 = vld [vmem:[#allocation25_spill] sm:$0xff] }
  0x9c   : > { %v3861_v61 = vmul.f32 %v803_v38, %v3476_v37  ;;  %v818_v36 = vsel %vm568_vm3, %v5752_v23, %v5751_v17  ;;  %v981_v24 = vadd.f32 %v977_v18, %v3449_v27  ;;  %v993_v54 = vmul.f32 %v804_v11, %v3461_v31  ;;  %v5868_v23 = vld [vmem:[#allocation24_spill] sm:$0xff] }
  0x9d   : > { %5861 = vst [vmem:[#allocation43_spill] sm:$0xff] %v3857_v2  ;;  %v793_v22 = vadd.f32 %v789_v44, %v780_v58  ;;  %v749_v20 = vadd.f32 %v745_v3, %v737_v55  ;;  %v3872_v25 = vmul.f32 %v817_v53, %v5863_v32  ;;  %v3874_v46 = vadd.f32 %v1008_v51, %v996_v49 }
  0x9e   : > { %v790_v38 = vmul.f32 %v3571_v39, %v3825_v7  ;;  %v706_v59 = vadd.f32 %v702_v41, %v3446_v26  ;;  %v806_v44 = vmul.f32 %v804_v11, %v3538_v0  ;;  %v822_v3 = vmul.f32 %v818_v36, %v3512_v52  ;;  %v5865_v41 = vld [vmem:[#allocation39_spill] sm:$0xff] }
  0x9f   : > { %5864 = vst [vmem:[#allocation25_spill] sm:$0xff] %v3874_v46  ;;  %v809_v2 = vadd.f32 %v805_v57, %v793_v22  ;;  %v765_v17 = vadd.f32 %v3688_v56, %v749_v20  ;;  %v1009_v18 = vmul.f32 %v818_v36, %v3427_v15  ;;  %v746_v51 = vmul.f32 %v3455_v29, %v3488_v42 }
  0xa0   : > { %v722_v53 = vadd.f32 %v3726_v10, %v706_v59  ;;  %v978_v49 = vmul.f32 %v3436_v21, %v3772_v47  ;;  %v997_v55 = vadd.f32 %v993_v54, %v981_v24  ;;  %v5866_v56 = vrot.slane %v3772_v47, 7  ;;  %v5869_v10 = vld [vmem:[#allocation26_spill] sm:$0xff] }
  0xa1   : > { %v825_v58 = vadd.f32 %v821_v62, %v809_v2  ;;  %v781_v57 = vadd.f32 %v5865_v41, %v765_v17  ;;  %v5867_v22 = vrot.slane %v3769_v5, 7  ;;  %v3896_v46 = vmul.f32 %v804_v11, %v5868_v23 }
  0xa2   : > { %v3899_v59 = vmul.f32 %v818_v36, %v5869_v10  ;;  %v738_v42 = vadd.f32 %v3735_v48, %v722_v53  ;;  %v791_v2 = vmul.f32 %v3542_v8, %v3772_v47  ;;  %v5870_v24 = vrot.slane %v3769_v5, 1  ;;  %v5872_v53 = vld [vmem:[#allocation13_spill] sm:$0xff] }
  0xa3   : > { %v801_v20 = vsel %vm551_vm2, %v5867_v22, %v5866_v56  ;;  %2911 = vst [vmem:[%s3653_s24 + $0x20] sm:$0xff] %v825_v58  ;;  %v794_v17 = vadd.f32 %v790_v38, %v781_v57  ;;  %v5871_v54 = vrot.slane %v3772_v47, 1  ;;  %v703_v36 = vmul.f32 %v3452_v28, %v3574_v40  ;;  %v5874_v22 = vld [vmem:[#allocation34_spill] sm:$0xff] }
  0xa4   : > { %v807_v62 = vmul.f32 %v801_v20, %v3497_v45  ;;  %v750_v41 = vadd.f32 %v746_v51, %v738_v42  ;;  %v3915_v48 = vmul.f32 %v801_v20, %v3430_v19  ;;  %v982_v38 = vadd.f32 %v978_v49, %v3446_v26  ;;  %v5876_v40 = vld [vmem:[#allocation30_spill] sm:$0xff] }
  0xa5   : > { %v819_v11 = vsel %vm568_vm3, %v5871_v54, %v5870_v24  ;;  %v994_v58 = vmul.f32 %v801_v20, %v5872_v53  ;;  %v810_v57 = vadd.f32 %v806_v44, %v794_v17  ;;  %v3919_v56 = vadd.f32 %v1009_v18, %v997_v55  ;;  %v5875_v54 = vld [vmem:[#allocation41_spill] sm:$0xff]  ;;  %v5877_v42 = vld [vmem:[#allocation22_spill] sm:$0xff]  ;;  %v5878_v20 = vld [vmem:[#allocation36_spill] sm:$0xff] }
  0xa6   : > { %v823_v45 = vmul.f32 %v819_v11, %v5874_v22  ;;  %v707_v24 = vadd.f32 %v703_v36, %v3449_v27  ;;  %v766_v15 = vadd.f32 %v5875_v54, %v750_v41  ;;  %v3925_v51 = vmul.f32 %v819_v11, %v5876_v40  ;;  %v3935_v44 = vld [vmem:[%s3392_s6 + $0x60] sm:$0xff]  ;;  %v3943_v41 = vld [vmem:[%s3392_s6 + $0x70] sm:$0xff]  ;;  %v5879_v54 = vld [vmem:[#allocation42_spill] sm:$0xff] }
  0xa7   : > { %5873 = vst [vmem:[#allocation39_spill] sm:$0xff] %v3919_v56  ;;  %v3928_v19 = vmul.f32 %v819_v11, %v5877_v42  ;;  %v3932_v49 = vsel %vm551_vm2, %v798_v60, %v800_v9  ;;  %v826_v18 = vadd.f32 %v822_v3, %v810_v57  ;;  %v747_v17 = vmul.f32 %v3470_v35, %v5878_v20  ;;  %v5882_v20 = vld [vmem:[#allocation38_spill] sm:$0xff] }
  0xa8   : > { %v723_v55 = vadd.f32 %v3784_v50, %v707_v24  ;;  %v979_v36 = vmul.f32 %v3452_v28, %v3828_v12  ;;  %v782_v11 = vadd.f32 %v5879_v54, %v766_v15  ;;  %v998_v56 = vadd.f32 %v994_v58, %v982_v38 }
  0xa9   : > { %v792_v60 = vmul.f32 %v3571_v39, %v3828_v12  ;;  %v882_v9 = vmul.f32 %v3455_v29, %v3769_v5  ;;  %2912 = vst [vmem:[%s3653_s24 + $0x28] sm:$0xff] %v826_v18  ;;  %v5880_v3 = vrot.slane %v3825_v7, 1  ;;  %v5881_v57 = vrot.slane %v3828_v12, 1 }
  0xaa   : > { %v739_v50 = vadd.f32 %v3817_v16, %v723_v55  ;;  %v995_v15 = vmul.f32 %v3932_v49, %v3421_v13  ;;  %v795_v58 = vadd.f32 %v791_v2, %v782_v11  ;;  %v5762_v5 = vrot.slane %v3943_v41, 7 }
  0xab   : > { %v820_v24 = vsel %vm568_vm3, %v5881_v57, %v5880_v3  ;;  %v886_v54 = vadd.f32 %v882_v9, %v5882_v20  ;;  %v5765_v18 = vrot.slane %v3935_v44, 1  ;;  %v983_v55 = vadd.f32 %v979_v36, %v3449_v27  ;;  %v5883_v9 = vld [vmem:[#allocation28_spill] sm:$0xff] }
  0xac   : > { %v751_v16 = vadd.f32 %v747_v17, %v739_v50  ;;  %v927_v3 = vmul.f32 %v3542_v8, %v3935_v44  ;;  %v5764_v57 = vrot.slane %v3943_v41, 1  ;;  %v811_v13 = vadd.f32 %v807_v62, %v795_v58 }
  0xad   : > { %v902_v38 = vadd.f32 %v3861_v61, %v886_v54  ;;  %v1114_v2 = vmul.f32 %v3436_v21, %v3935_v44  ;;  %v883_v11 = vmul.f32 %v3470_v35, %v3825_v7  ;;  %v808_v36 = vmul.f32 %v3932_v49, %v5883_v9  ;;  %v3992_v7 = vld [vmem:[%s3392_s6 + $0x68] sm:$0xff] }
  0xae   : > { %v767_v17 = vadd.f32 %v3820_v34, %v751_v16  ;;  %v824_v50 = vmul.f32 %v820_v24, %v5858_v6  ;;  %v5884_v20 = vrot.slane %v3935_v44, 7  ;;  %v827_v62 = vadd.f32 %v823_v45, %v811_v13  ;;  %v3995_v16 = vld [vmem:[%s3392_s6 + $0x78] sm:$0xff] }
  0xaf   : > { %v918_v58 = vadd.f32 %v3872_v25, %v902_v38  ;;  %v955_v34 = vsel %vm568_vm3, %v5765_v18, %v5764_v57  ;;  %v999_v9 = vadd.f32 %v995_v15, %v983_v55  ;;  %v1011_v13 = vmul.f32 %v820_v24, %v3467_v33 }
  0xb0   : > { %v941_v61 = vsel %vm551_vm2, %v5762_v5, %v5884_v20  ;;  %v783_v6 = vadd.f32 %v3852_v43, %v767_v17  ;;  %v959_v45 = vmul.f32 %v955_v34, %v5862_v30  ;;  %2913 = vst [vmem:[%s3653_s24 + $0x30] sm:$0xff] %v827_v62  ;;  %v1118_v38 = vadd.f32 %v1114_v2, %v3446_v26  ;;  %v5885_v20 = vld [vmem:[#allocation19_spill] sm:$0xff] }
  0xb1   : > { %v943_v54 = vmul.f32 %v941_v61, %v5860_v4  ;;  %v931_v25 = vadd.f32 %v927_v3, %v918_v58  ;;  %v1130_v5 = vmul.f32 %v941_v61, %v5885_v20  ;;  %v5886_v4 = vld [vmem:[#allocation40_spill] sm:$0xff]  ;;  %v928_v18 = vmul.f32 %v3571_v39, %v3992_v7 }
  0xb2   : > { %v887_v42 = vadd.f32 %v883_v11, %v5886_v4  ;;  %v796_v57 = vadd.f32 %v792_v60, %v783_v6  ;;  %v936_v40 = vrot.slane %v3992_v7, 7  ;;  %v938_v43 = vrot.slane %v3995_v16, 7 }
  0xb3   : > { %v947_v15 = vadd.f32 %v943_v54, %v931_v25  ;;  %v952_v3 = vrot.slane %v3992_v7, 1  ;;  %v954_v2 = vrot.slane %v3995_v16, 1  ;;  %v1146_v62 = vmul.f32 %v955_v34, %v3424_v14 }
  0xb4   : > { %v903_v55 = vadd.f32 %v3896_v46, %v887_v42  ;;  %v812_v17 = vadd.f32 %v808_v36, %v796_v57  ;;  %v942_v6 = vsel %vm551_vm2, %v938_v43, %v936_v40  ;;  %v1115_v4 = vmul.f32 %v3452_v28, %v3992_v7  ;;  %v5887_v57 = vld [vmem:[#allocation18_spill] sm:$0xff] }
  0xb5   : > { %v963_v60 = vadd.f32 %v959_v45, %v947_v15  ;;  %v1134_v11 = vadd.f32 %v1130_v5, %v1118_v38  ;;  %v944_v46 = vmul.f32 %v942_v6, %v3538_v0  ;;  %v4019_v42 = vadd.f32 %v3928_v19, %v998_v56 }
  0xb6   : > { %v919_v58 = vadd.f32 %v3899_v59, %v903_v55  ;;  %v828_v54 = vadd.f32 %v824_v50, %v812_v17  ;;  %v901_v36 = vmul.f32 %v3932_v49, %v5887_v57  ;;  %v956_v25 = vsel %vm568_vm3, %v952_v3, %v954_v2 }
  0xb7   : > { %2915 = vst [vmem:[%s3653_s24 + $0x40] sm:$0xff] %v963_v60  ;;  %v960_v20 = vmul.f32 %v956_v25, %v3512_v52  ;;  %v1119_v5 = vadd.f32 %v1115_v4, %v3449_v27  ;;  %v1131_v59 = vmul.f32 %v942_v6, %v3461_v31  ;;  %v917_v45 = vmul.f32 %v820_v24, %v5852_v63  ;;  %v5890_v24 = vld [vmem:[#allocation37_spill] sm:$0xff] }
  0xb8   : > { %v932_v14 = vadd.f32 %v928_v18, %v919_v58  ;;  %2914 = vst [vmem:[%s3653_s24 + $0x38] sm:$0xff] %v828_v54  ;;  %v4031_v19 = vadd.f32 %v1011_v13, %v999_v9  ;;  %v1036_v56 = vmul.f32 %v941_v61, %v3476_v37  ;;  %v884_v49 = vmul.f32 %v3455_v29, %v3772_v47 }
  0xb9   : > { %v1052_v50 = vmul.f32 %v955_v34, %v5863_v32  ;;  %v4037_v18 = vadd.f32 %v1146_v62, %v1134_v11  ;;  %v4040_v15 = vmul.f32 %v942_v6, %v5868_v23  ;;  %v4043_v55 = vmul.f32 %v956_v25, %v5869_v10  ;;  %v5893_v62 = vld [vmem:[#allocation16_spill] sm:$0xff]  ;;  %v5894_v11 = vld [vmem:[#allocation27_spill] sm:$0xff] }
  0xba   : > { %5888 = vst [vmem:[#allocation24_spill] sm:$0xff] %v4031_v19  ;;  %v948_v38 = vadd.f32 %v944_v46, %v932_v14  ;;  %v888_v9 = vadd.f32 %v884_v49, %v5890_v24  ;;  %v5891_v13 = vrot.slane %v3943_v41, 7  ;;  %v5892_v61 = vrot.slane %v3935_v44, 7  ;;  %v5897_v24 = vld [vmem:[#allocation17_spill] sm:$0xff] }
  0xbb   : > { %5889 = vst [vmem:[#allocation26_spill] sm:$0xff] %v4037_v18  ;;  %v1116_v34 = vmul.f32 %v3436_v21, %v3943_v41  ;;  %v1135_v14 = vadd.f32 %v1131_v59, %v1119_v5  ;;  %v1147_v6 = vmul.f32 %v956_v25, %v5893_v62  ;;  %v929_v4 = vmul.f32 %v3542_v8, %v3943_v41 }
  0xbc   : > { %v939_v47 = vsel %vm551_vm2, %v5892_v61, %v5891_v13  ;;  %v964_v17 = vadd.f32 %v960_v20, %v948_v38  ;;  %v904_v60 = vadd.f32 %v3915_v48, %v888_v9  ;;  %v5895_v46 = vrot.slane %v3935_v44, 1  ;;  %v5898_v13 = vld [vmem:[#allocation30_spill] sm:$0xff] }
  0xbd   : > { %v945_v58 = vmul.f32 %v939_v47, %v5894_v11  ;;  %v5896_v54 = vrot.slane %v3943_v41, 1  ;;  %v885_v20 = vmul.f32 %v3470_v35, %v3828_v12  ;;  %v1120_v5 = vadd.f32 %v1116_v34, %v3446_v26  ;;  %v5901_v34 = vld [vmem:[#allocation22_spill] sm:$0xff] }
  0xbe   : > { %2916 = vst [vmem:[%s3653_s24 + $0x48] sm:$0xff] %v964_v17  ;;  %v1132_v48 = vmul.f32 %v939_v47, %v5872_v53  ;;  %v1020_v59 = vmul.f32 %v3455_v29, %v3935_v44  ;;  %v920_v38 = vadd.f32 %v3925_v51, %v904_v60  ;;  %v4075_v9 = vmul.f32 %v939_v47, %v5897_v24  ;;  %v4082_v17 = vld [vmem:[%s3392_s6 + $0x80] sm:$0xff]  ;;  %v4092_v44 = vld [vmem:[%s3392_s6 + $0x90] sm:$0xff] }
  0xbf   : > { %v957_v49 = vsel %vm568_vm3, %v5896_v54, %v5895_v46  ;;  %v5899_v46 = vld [vmem:[#allocation43_spill] sm:$0xff]  ;;  %v4084_v54 = vadd.f32 %v1147_v6, %v1135_v14  ;;  %v930_v19 = vmul.f32 %v3571_v39, %v3995_v16  ;;  %v940_v51 = vsel %vm551_vm2, %v936_v40, %v938_v43  ;;  %v5902_v6 = vld [vmem:[#allocation28_spill] sm:$0xff] }
  0xc0   : > { %v961_v25 = vmul.f32 %v957_v49, %v5874_v22  ;;  %v4078_v61 = vmul.f32 %v957_v49, %v5898_v13  ;;  %v889_v12 = vadd.f32 %v885_v20, %v5899_v46  ;;  %v1148_v18 = vmul.f32 %v957_v49, %v5901_v34  ;;  %v5903_v49 = vld [vmem:[#allocation25_spill] sm:$0xff] }
  0xc1   : > { %5900 = vst [vmem:[#allocation34_spill] sm:$0xff] %v4084_v54  ;;  %v933_v47 = vadd.f32 %v929_v4, %v920_v38  ;;  %v958_v13 = vsel %vm568_vm3, %v954_v2, %v952_v3  ;;  %v1117_v20 = vmul.f32 %v3452_v28, %v3995_v16  ;;  %v1136_v14 = vadd.f32 %v1132_v48, %v1120_v5 }
  0xc2   : > { %v905_v60 = vadd.f32 %v901_v36, %v889_v12  ;;  %v946_v46 = vmul.f32 %v940_v51, %v5902_v6  ;;  %v1024_v54 = vadd.f32 %v1020_v59, %v5903_v49  ;;  %v5769_v34 = vrot.slane %v4082_v17, 7  ;;  %v5905_v12 = vld [vmem:[#allocation14_spill] sm:$0xff] }
  0xc3   : > { %v949_v53 = vadd.f32 %v945_v58, %v933_v47  ;;  %v1065_v43 = vmul.f32 %v3542_v8, %v4082_v17  ;;  %v5770_v3 = vrot.slane %v4092_v44, 7  ;;  %v5774_v4 = vrot.slane %v4092_v44, 1  ;;  %v5904_v58 = vld [vmem:[#allocation35_spill] sm:$0xff]  ;;  %v4119_v36 = vld [vmem:[%s3392_s6 + $0x88] sm:$0xff] }
  0xc4   : > { %v921_v40 = vadd.f32 %v917_v45, %v905_v60  ;;  %v1040_v2 = vadd.f32 %v1036_v56, %v1024_v54  ;;  %v1252_v5 = vmul.f32 %v3436_v21, %v4082_v17  ;;  %v962_v38 = vmul.f32 %v958_v13, %v5904_v58  ;;  %v5906_v60 = vld [vmem:[#allocation32_spill] sm:$0xff]  ;;  %v5910_v58 = vld [vmem:[#allocation39_spill] sm:$0xff] }
  0xc5   : > { %v965_v48 = vadd.f32 %v961_v25, %v949_v53  ;;  %v1079_v45 = vsel %vm551_vm2, %v5770_v3, %v5769_v34  ;;  %v1121_v56 = vadd.f32 %v1117_v20, %v3449_v27  ;;  %v1133_v54 = vmul.f32 %v940_v51, %v5905_v12  ;;  %v4122_v53 = vld [vmem:[%s3392_s6 + $0x98] sm:$0xff] }
  0xc6   : > { %v934_v59 = vadd.f32 %v930_v19, %v921_v40  ;;  %v1056_v47 = vadd.f32 %v1052_v50, %v1040_v2  ;;  %v1081_v49 = vmul.f32 %v1079_v45, %v5906_v60  ;;  %v4126_v25 = vmul.f32 %v940_v51, %v5887_v57  ;;  %v5909_v51 = vld [vmem:[#allocation19_spill] sm:$0xff] }
  0xc7   : > { %2917 = vst [vmem:[%s3653_s24 + $0x50] sm:$0xff] %v965_v48  ;;  %v1149_v40 = vmul.f32 %v958_v13, %v3467_v33  ;;  %v5908_v20 = vrot.slane %v4082_v17, 1  ;;  %v1256_v3 = vadd.f32 %v1252_v5, %v3446_v26  ;;  %v1074_v57 = vrot.slane %v4119_v36, 7 }
  0xc8   : > { %v950_v19 = vadd.f32 %v946_v46, %v934_v59  ;;  %5907 = vst [vmem:[#allocation41_spill] sm:$0xff] %v4126_v25  ;;  %v1069_v2 = vadd.f32 %v1065_v43, %v1056_v47  ;;  %v1021_v46 = vmul.f32 %v3470_v35, %v3992_v7  ;;  %v1268_v59 = vmul.f32 %v1079_v45, %v5909_v51 }
  0xc9   : > { %v1093_v50 = vsel %vm568_vm3, %v5908_v20, %v5774_v4  ;;  %v1076_v60 = vrot.slane %v4122_v53, 7  ;;  %v1137_v33 = vadd.f32 %v1133_v54, %v1121_v56  ;;  %v1090_v43 = vrot.slane %v4119_v36, 1  ;;  %v5911_v56 = vld [vmem:[#allocation15_spill] sm:$0xff] }
  0xca   : > { %v1097_v34 = vmul.f32 %v1093_v50, %v5862_v30  ;;  %v966_v48 = vadd.f32 %v962_v38, %v950_v19  ;;  %v1085_v12 = vadd.f32 %v1081_v49, %v1069_v2  ;;  %v1025_v25 = vadd.f32 %v1021_v46, %v5910_v58 }
  0xcb   : > { %v1080_v5 = vsel %vm551_vm2, %v1076_v60, %v1074_v57  ;;  %v1092_v7 = vrot.slane %v4122_v53, 1  ;;  %v1253_v38 = vmul.f32 %v3452_v28, %v4119_v36  ;;  %v1022_v47 = vmul.f32 %v3455_v29, %v3943_v41 }
  0xcc   : > { %2918 = vst [vmem:[%s3653_s24 + $0x58] sm:$0xff] %v966_v48  ;;  %v1101_v19 = vadd.f32 %v1097_v34, %v1085_v12  ;;  %v1284_v54 = vmul.f32 %v1093_v50, %v5911_v56  ;;  %v1041_v58 = vadd.f32 %v4040_v15, %v1025_v25  ;;  %v1066_v49 = vmul.f32 %v3571_v39, %v4119_v36 }
  0xcd   : > { %v1272_v20 = vadd.f32 %v1268_v59, %v1256_v3  ;;  %v1094_v2 = vsel %vm568_vm3, %v1090_v43, %v1092_v7  ;;  %v1257_v46 = vadd.f32 %v1253_v38, %v3449_v27  ;;  %v1269_v48 = vmul.f32 %v1080_v5, %v3461_v31 }
  0xce   : > { %v4160_v4 = vadd.f32 %v1148_v18, %v1136_v14  ;;  %v1055_v41 = vmul.f32 %v958_v13, %v5852_v63  ;;  %2919 = vst [vmem:[%s3653_s24 + $0x60] sm:$0xff] %v1101_v19  ;;  %v1057_v34 = vadd.f32 %v4043_v55, %v1041_v58  ;;  %v1082_v15 = vmul.f32 %v1080_v5, %v3538_v0 }
  0xcf   : > { %v4166_v12 = vadd.f32 %v1149_v40, %v1137_v33  ;;  %v1174_v3 = vmul.f32 %v1079_v45, %v3476_v37  ;;  %v1190_v25 = vmul.f32 %v1093_v50, %v5863_v32  ;;  %v1026_v59 = vadd.f32 %v1022_v47, %v4019_v42 }
  0xd0   : > { %v1070_v38 = vadd.f32 %v1066_v49, %v1057_v34  ;;  %v1098_v31 = vmul.f32 %v1094_v2, %v3512_v52  ;;  %v1273_v18 = vadd.f32 %v1269_v48, %v1257_v46  ;;  %v1285_v14 = vmul.f32 %v1094_v2, %v5893_v62 }
  0xd1   : > { %5912 = vst [vmem:[#allocation36_spill] sm:$0xff] %v4166_v12  ;;  %v4173_v13 = vadd.f32 %v1284_v54, %v1272_v20  ;;  %v4176_v55 = vmul.f32 %v1080_v5, %v5868_v23  ;;  %v1042_v33 = vadd.f32 %v4075_v9, %v1026_v59  ;;  %v1067_v45 = vmul.f32 %v3542_v8, %v4092_v44  ;;  %v5919_v59 = vld [vmem:[#allocation13_spill] sm:$0xff]  ;;  %v4253_v12 = vld [vmem:[%s3392_s6 + $0xa8] sm:$0xff] }
  0xd2   : > { %v1086_v40 = vadd.f32 %v1082_v15, %v1070_v38  ;;  %v4182_v42 = vmul.f32 %v1094_v2, %v5869_v10  ;;  %v5914_v50 = vrot.slane %v4092_v44, 7  ;;  %v5915_v47 = vrot.slane %v4082_v17, 7 }
  0xd3   : > { %5913 = vst [vmem:[#allocation42_spill] sm:$0xff] %v4173_v13  ;;  %v1254_v5 = vmul.f32 %v3436_v21, %v4092_v44  ;;  %v1058_v9 = vadd.f32 %v4078_v61, %v1042_v33  ;;  %v5916_v58 = vrot.slane %v4082_v17, 1  ;;  %v5917_v49 = vrot.slane %v4092_v44, 1  ;;  %v5920_v33 = vld [vmem:[#allocation24_spill] sm:$0xff] }
  0xd4   : > { %v1077_v19 = vsel %vm551_vm2, %v5915_v47, %v5914_v50  ;;  %v1023_v2 = vmul.f32 %v3470_v35, %v3995_v16  ;;  %v1102_v46 = vadd.f32 %v1098_v31, %v1086_v40  ;;  %v4202_v48 = vadd.f32 %v1285_v14, %v1273_v18 }
  0xd5   : > { %v1083_v54 = vmul.f32 %v1077_v19, %v5894_v11  ;;  %v1095_v20 = vsel %vm568_vm3, %v5917_v49, %v5916_v58  ;;  %v4206_v61 = vmul.f32 %v1077_v19, %v5897_v24  ;;  %v1071_v15 = vadd.f32 %v1067_v45, %v1058_v9  ;;  %v4213_v58 = vld [vmem:[%s3392_s6 + $0xa0] sm:$0xff]  ;;  %v4223_v45 = vld [vmem:[%s3392_s6 + $0xb0] sm:$0xff] }
  0xd6   : > { %5918 = vst [vmem:[#allocation38_spill] sm:$0xff] %v4202_v48  ;;  %v1099_v34 = vmul.f32 %v1095_v20, %v5874_v22  ;;  %v1270_v38 = vmul.f32 %v1077_v19, %v5919_v59  ;;  %v1027_v50 = vadd.f32 %v1023_v2, %v5920_v33  ;;  %v1078_v47 = vsel %vm551_vm2, %v1074_v57, %v1076_v60  ;;  %v5921_v19 = vld [vmem:[#allocation41_spill] sm:$0xff]  ;;  %v4257_v59 = vld [vmem:[%s3392_s6 + $0xb8] sm:$0xff] }
  0xd7   : > { %2920 = vst [vmem:[%s3653_s24 + $0x68] sm:$0xff] %v1102_v46  ;;  %v1258_v31 = vadd.f32 %v1254_v5, %v3446_v26  ;;  %v1068_v16 = vmul.f32 %v3571_v39, %v4122_v53  ;;  %v1084_v18 = vmul.f32 %v1078_v47, %v5902_v6  ;;  %v1255_v14 = vmul.f32 %v3452_v28, %v4122_v53  ;;  %v5922_v5 = vld [vmem:[#allocation35_spill] sm:$0xff]  ;;  %v5923_v46 = vld [vmem:[#allocation14_spill] sm:$0xff] }
  0xd8   : > { %v1087_v40 = vadd.f32 %v1083_v54, %v1071_v15  ;;  %v1043_v9 = vadd.f32 %v5921_v19, %v1027_v50  ;;  %v1096_v57 = vsel %vm568_vm3, %v1092_v7, %v1090_v43  ;;  %v1158_v60 = vmul.f32 %v3455_v29, %v4082_v17  ;;  %v5924_v54 = vld [vmem:[#allocation26_spill] sm:$0xff] }
  0xd9   : > { %v1100_v49 = vmul.f32 %v1096_v57, %v5922_v5  ;;  %v1259_v2 = vadd.f32 %v1255_v14, %v3449_v27  ;;  %v1271_v33 = vmul.f32 %v1078_v47, %v5923_v46  ;;  %v5778_v48 = vrot.slane %v4213_v58, 7  ;;  %v5926_v17 = vld [vmem:[#allocation22_spill] sm:$0xff]  ;;  %v5927_v5 = vld [vmem:[#allocation23_spill] sm:$0xff] }
  0xda   : > { %v1103_v13 = vadd.f32 %v1099_v34, %v1087_v40  ;;  %v1059_v6 = vadd.f32 %v1055_v41, %v1043_v9  ;;  %v1162_v15 = vadd.f32 %v1158_v60, %v5924_v54  ;;  %v1213_v50 = vrot.slane %v4223_v45, 7  ;;  %v5925_v9 = vld [vmem:[#allocation30_spill] sm:$0xff] }
  0xdb   : > { %v1203_v43 = vmul.f32 %v3542_v8, %v4213_v58  ;;  %v1390_v14 = vmul.f32 %v3436_v21, %v4213_v58  ;;  %v1159_v40 = vmul.f32 %v3470_v35, %v4119_v36  ;;  %v1192_v60 = vmul.f32 %v1095_v20, %v5925_v9 }
  0xdc   : > { %2921 = vst [vmem:[%s3653_s24 + $0x70] sm:$0xff] %v1103_v13  ;;  %v1072_v19 = vadd.f32 %v1068_v16, %v1059_v6  ;;  %v1178_v34 = vadd.f32 %v1174_v3, %v1162_v15  ;;  %v1217_v41 = vsel %vm551_vm2, %v1213_v50, %v5778_v48  ;;  %v1274_v54 = vadd.f32 %v1270_v38, %v1258_v31  ;;  %v5928_v16 = vld [vmem:[#allocation32_spill] sm:$0xff] }
  0xdd   : > { %v1286_v7 = vmul.f32 %v1095_v20, %v5926_v17  ;;  %v1287_v46 = vmul.f32 %v1096_v57, %v5927_v5  ;;  %v1275_v6 = vadd.f32 %v1271_v33, %v1259_v2  ;;  %v1219_v15 = vmul.f32 %v1217_v41, %v5928_v16  ;;  %v5931_v5 = vld [vmem:[#allocation34_spill] sm:$0xff] }
  0xde   : > { %v1088_v13 = vadd.f32 %v1084_v18, %v1072_v19  ;;  %v1194_v3 = vadd.f32 %v1190_v25, %v1178_v34  ;;  %v5929_v48 = vrot.slane %v4223_v45, 1  ;;  %v5930_v36 = vrot.slane %v4213_v58, 1 }
  0xdf   : > { %v1394_v20 = vadd.f32 %v1390_v14, %v3446_v26  ;;  %v1406_v31 = vmul.f32 %v1217_v41, %v5909_v51  ;;  %v1163_v18 = vadd.f32 %v1159_v40, %v5931_v5  ;;  %v1212_v19 = vrot.slane %v4253_v12, 7 }
  0xe0   : > { %v1231_v38 = vsel %vm568_vm3, %v5930_v36, %v5929_v48  ;;  %v1104_v2 = vadd.f32 %v1100_v49, %v1088_v13  ;;  %v1207_v33 = vadd.f32 %v1203_v43, %v1194_v3  ;;  %v1204_v16 = vmul.f32 %v3571_v39, %v4253_v12  ;;  %v5932_v3 = vld [vmem:[#allocation18_spill] sm:$0xff] }
  0xe1   : > { %v1235_v25 = vmul.f32 %v1231_v38, %v5862_v30  ;;  %v1179_v34 = vadd.f32 %v4176_v55, %v1163_v18  ;;  %v1214_v17 = vrot.slane %v4257_v59, 7  ;;  %v1228_v48 = vrot.slane %v4253_v12, 1 }
  0xe2   : > { %2922 = vst [vmem:[%s3653_s24 + $0x78] sm:$0xff] %v1104_v2  ;;  %v1223_v14 = vadd.f32 %v1219_v15, %v1207_v33  ;;  %v1230_v36 = vrot.slane %v4257_v59, 1  ;;  %v1391_v5 = vmul.f32 %v3452_v28, %v4253_v12  ;;  %v1160_v49 = vmul.f32 %v3455_v29, %v4092_v44 }
  0xe3   : > { %v1410_v43 = vadd.f32 %v1406_v31, %v1394_v20  ;;  %v1422_v55 = vmul.f32 %v1231_v38, %v5911_v56  ;;  %v1195_v40 = vadd.f32 %v4182_v42, %v1179_v34  ;;  %v1218_v13 = vsel %vm551_vm2, %v1214_v17, %v1212_v19  ;;  %v5934_v34 = vld [vmem:[#allocation21_spill] sm:$0xff] }
  0xe4   : > { %v1177_v18 = vmul.f32 %v1078_v47, %v5932_v3  ;;  %v1239_v15 = vadd.f32 %v1235_v25, %v1223_v14  ;;  %v1220_v2 = vmul.f32 %v1218_v13, %v3538_v0  ;;  %v1232_v33 = vsel %vm568_vm3, %v1228_v48, %v1230_v36 }
  0xe5   : > { %v1193_v51 = vmul.f32 %v1096_v57, %v5852_v63  ;;  %v1208_v30 = vadd.f32 %v1204_v16, %v1195_v40  ;;  %v1236_v44 = vmul.f32 %v1232_v33, %v3512_v52  ;;  %v1395_v20 = vadd.f32 %v1391_v5, %v3449_v27 }
  0xe6   : > { %v4292_v31 = vadd.f32 %v1286_v7, %v1274_v54  ;;  %v4294_v42 = vadd.f32 %v1287_v46, %v1275_v6  ;;  %2923 = vst [vmem:[%s3653_s24 + $0x80] sm:$0xff] %v1239_v15  ;;  %v1407_v47 = vmul.f32 %v1218_v13, %v5934_v34  ;;  %v1164_v25 = vadd.f32 %v1160_v49, %v4160_v4 }
  0xe7   : > { %v1312_v14 = vmul.f32 %v1217_v41, %v3476_v37  ;;  %v1328_v3 = vmul.f32 %v1231_v38, %v5863_v32  ;;  %v4301_v57 = vadd.f32 %v1422_v55, %v1410_v43  ;;  %v1224_v16 = vadd.f32 %v1220_v2, %v1208_v30 }
  0xe8   : > { %5933 = vst [vmem:[#allocation40_spill] sm:$0xff] %v4294_v42  ;;  %v4304_v40 = vmul.f32 %v1218_v13, %v5868_v23  ;;  %v1180_v7 = vadd.f32 %v4206_v61, %v1164_v25  ;;  %v1205_v46 = vmul.f32 %v3542_v8, %v4223_v45  ;;  %v5936_v54 = vrot.slane %v4213_v58, 7 }
  0xe9   : > { %5935 = vst [vmem:[#allocation37_spill] sm:$0xff] %v4301_v57  ;;  %v1240_v41 = vadd.f32 %v1236_v44, %v1224_v16  ;;  %v1411_v6 = vadd.f32 %v1407_v47, %v1395_v20  ;;  %v1423_v38 = vmul.f32 %v1232_v33, %v5893_v62  ;;  %v5937_v49 = vrot.slane %v4213_v58, 1  ;;  %v5939_v47 = vld [vmem:[#allocation13_spill] sm:$0xff]  ;;  %v5940_v16 = vld [vmem:[#allocation36_spill] sm:$0xff] }
  0xea   : > { %v1215_v4 = vsel %vm551_vm2, %v5936_v54, %v1213_v50  ;;  %v1196_v5 = vadd.f32 %v1192_v60, %v1180_v7  ;;  %v5938_v61 = vrot.slane %v4223_v45, 1  ;;  %v1392_v55 = vmul.f32 %v3436_v21, %v4223_v45  ;;  %v4341_v7 = vld [vmem:[%s3392_s6 + $0xc0] sm:$0xff]  ;;  %v5942_v54 = vld [vmem:[#allocation22_spill] sm:$0xff] }
  0xeb   : > { %v1221_v30 = vmul.f32 %v1215_v4, %v5894_v11  ;;  %v1161_v50 = vmul.f32 %v3470_v35, %v4122_v53  ;;  %2924 = vst [vmem:[%s3653_s24 + $0x88] sm:$0xff] %v1240_v41  ;;  %v4327_v13 = vmul.f32 %v1232_v33, %v5869_v10  ;;  %v4331_v15 = vmul.f32 %v1215_v4, %v5897_v24 }
  0xec   : > { %v1233_v43 = vsel %vm568_vm3, %v5938_v61, %v5937_v49  ;;  %v1393_v2 = vmul.f32 %v3452_v28, %v4257_v59  ;;  %v1209_v44 = vadd.f32 %v1205_v46, %v1196_v5  ;;  %v1408_v25 = vmul.f32 %v1215_v4, %v5939_v47  ;;  %v4353_v5 = vld [vmem:[%s3392_s6 + $0xd0] sm:$0xff] }
  0xed   : > { %v1237_v60 = vmul.f32 %v1233_v43, %v5874_v22  ;;  %v4336_v20 = vmul.f32 %v1233_v43, %v5925_v9  ;;  %v1165_v53 = vadd.f32 %v1161_v50, %v5940_v16  ;;  %v4343_v33 = vadd.f32 %v1423_v38, %v1411_v6  ;;  %v5943_v38 = vld [vmem:[#allocation28_spill] sm:$0xff] }
  0xee   : > { %v4346_v41 = vmul.f32 %v1233_v43, %v5942_v54  ;;  %v1206_v49 = vmul.f32 %v3571_v39, %v4257_v59  ;;  %v1216_v46 = vsel %vm551_vm2, %v1212_v19, %v1214_v17  ;;  %v1225_v61 = vadd.f32 %v1221_v30, %v1209_v44  ;;  %v5944_v54 = vld [vmem:[#allocation14_spill] sm:$0xff] }
  0xef   : > { %5941 = vst [vmem:[#allocation16_spill] sm:$0xff] %v4343_v33  ;;  %v1396_v4 = vadd.f32 %v1392_v55, %v3446_v26  ;;  %v1181_v50 = vadd.f32 %v1177_v18, %v1165_v53  ;;  %v1234_v6 = vsel %vm568_vm3, %v1230_v36, %v1228_v48  ;;  %v1222_v16 = vmul.f32 %v1216_v46, %v5943_v38  ;;  %v5945_v55 = vld [vmem:[#allocation42_spill] sm:$0xff] }
  0xf0   : > { %v1397_v43 = vadd.f32 %v1393_v2, %v3449_v27  ;;  %v1296_v33 = vmul.f32 %v3455_v29, %v4213_v58  ;;  %v1241_v17 = vadd.f32 %v1237_v60, %v1225_v61  ;;  %v1409_v30 = vmul.f32 %v1216_v46, %v5944_v54  ;;  %v5946_v60 = vld [vmem:[#allocation35_spill] sm:$0xff]  ;;  %v5954_v54 = vld [vmem:[#allocation29_spill] sm:$0xff] }
  0xf1   : > { %v1197_v19 = vadd.f32 %v1193_v51, %v1181_v50  ;;  %v1528_v2 = vmul.f32 %v3436_v21, %v4341_v7  ;;  %v1412_v58 = vadd.f32 %v1408_v25, %v1396_v4  ;;  %v1238_v51 = vmul.f32 %v1234_v6, %v5946_v60  ;;  %v5947_v50 = vld [vmem:[#allocation23_spill] sm:$0xff]  ;;  %v4384_v25 = vld [vmem:[%s3392_s6 + $0xc8] sm:$0xff] }
  0xf2   : > { %v1300_v44 = vadd.f32 %v1296_v33, %v5945_v55  ;;  %2925 = vst [vmem:[%s3653_s24 + $0x90] sm:$0xff] %v1241_v17  ;;  %v1297_v61 = vmul.f32 %v3470_v35, %v4253_v12  ;;  %v1425_v57 = vmul.f32 %v1234_v6, %v5947_v50  ;;  %v1341_v33 = vmul.f32 %v3542_v8, %v4341_v7 }
  0xf3   : > { %v1210_v53 = vadd.f32 %v1206_v49, %v1197_v19  ;;  %v5948_v55 = vrot.slane %v4341_v7, 7  ;;  %v5949_v48 = vrot.slane %v4353_v5, 7  ;;  %5950 = vst [vmem:[#allocation27_spill] sm:$0xff] %v4384_v25  ;;  %v4387_v49 = vld [vmem:[%s3392_s6 + $0xd8] sm:$0xff]  ;;  %v1413_v12 = vadd.f32 %v1409_v30, %v1397_v43 }
  0xf4   : > { %v1316_v18 = vadd.f32 %v1312_v14, %v1300_v44  ;;  %v5951_v19 = vld [vmem:[#allocation32_spill] sm:$0xff]  ;;  %v5952_v14 = vrot.slane %v4353_v5, 1  ;;  %v5953_v44 = vrot.slane %v4341_v7, 1  ;;  %v1350_v43 = vrot.slane %v4384_v25, 7 }
  0xf5   : > { %v1355_v17 = vsel %vm551_vm2, %v5949_v48, %v5948_v55  ;;  %v1226_v4 = vadd.f32 %v1222_v16, %v1210_v53  ;;  %v1532_v48 = vadd.f32 %v1528_v2, %v3446_v26  ;;  %v5955_v55 = vld [vmem:[#allocation38_spill] sm:$0xff]  ;;  %v5956_v16 = vld [vmem:[#allocation19_spill] sm:$0xff]  ;;  %v1352_v30 = vrot.slane %v4387_v49, 7 }
  0xf6   : > { %v1357_v36 = vmul.f32 %v1355_v17, %v5951_v19  ;;  %v1369_v50 = vsel %vm568_vm3, %v5953_v44, %v5952_v14  ;;  %v1332_v60 = vadd.f32 %v1328_v3, %v1316_v18  ;;  %v1301_v47 = vadd.f32 %v1297_v61, %v5955_v55 }
  0xf7   : > { %v1373_v38 = vmul.f32 %v1369_v50, %v5954_v54  ;;  %v1242_v42 = vadd.f32 %v1238_v51, %v1226_v4  ;;  %v1544_v53 = vmul.f32 %v1355_v17, %v5956_v16  ;;  %v1342_v14 = vmul.f32 %v3571_v39, %v4384_v25  ;;  %v5957_v16 = vld [vmem:[#allocation18_spill] sm:$0xff] }
  0xf8   : > { %v1345_v19 = vadd.f32 %v1341_v33, %v1332_v60  ;;  %v1317_v9 = vadd.f32 %v4304_v40, %v1301_v47  ;;  %v1366_v3 = vrot.slane %v4384_v25, 1  ;;  %v1356_v18 = vsel %vm551_vm2, %v1352_v30, %v1350_v43 }
  0xf9   : > { %2926 = vst [vmem:[%s3653_s24 + $0x98] sm:$0xff] %v1242_v42  ;;  %v1368_v2 = vrot.slane %v4387_v49, 1  ;;  %v1529_v51 = vmul.f32 %v3452_v28, %v4384_v25  ;;  %v1298_v61 = vmul.f32 %v3455_v29, %v4223_v45  ;;  %v1560_v40 = vmul.f32 %v1369_v50, %v5911_v56 }
  0xfa   : > { %v1361_v60 = vadd.f32 %v1357_v36, %v1345_v19  ;;  %v1333_v47 = vadd.f32 %v4327_v13, %v1317_v9  ;;  %v1358_v33 = vmul.f32 %v1356_v18, %v3538_v0  ;;  %v1548_v42 = vadd.f32 %v1544_v53, %v1532_v48 }
  0xfb   : > { %v1370_v4 = vsel %vm568_vm3, %v1366_v3, %v1368_v2  ;;  %v1533_v44 = vadd.f32 %v1529_v51, %v3449_v27  ;;  %v1545_v55 = vmul.f32 %v1356_v18, %v5934_v34  ;;  %v1315_v54 = vmul.f32 %v1216_v46, %v5957_v16 }
  0xfc   : > { %v1377_v25 = vadd.f32 %v1373_v38, %v1361_v60  ;;  %v1346_v45 = vadd.f32 %v1342_v14, %v1333_v47  ;;  %v1374_v36 = vmul.f32 %v1370_v4, %v3512_v52  ;;  %v4424_v19 = vadd.f32 %v4346_v41, %v1412_v58 }
  0xfd   : > { %v1331_v9 = vmul.f32 %v1234_v6, %v5852_v63  ;;  %v4427_v13 = vadd.f32 %v1425_v57, %v1413_v12  ;;  %v1302_v48 = vadd.f32 %v1298_v61, %v4292_v31  ;;  %v1450_v53 = vmul.f32 %v1355_v17, %v3476_v37 }
  0xfe   : > { %2927 = vst [vmem:[%s3653_s24 + $0xa0] sm:$0xff] %v1377_v25  ;;  %v1362_v51 = vadd.f32 %v1358_v33, %v1346_v45  ;;  %v1549_v34 = vadd.f32 %v1545_v55, %v1533_v44  ;;  %v1561_v46 = vmul.f32 %v1370_v4, %v5893_v62  ;;  %v1466_v38 = vmul.f32 %v1369_v50, %v5863_v32  ;;  %v5965_v45 = vld [vmem:[#allocation30_spill] sm:$0xff] }
  0xff   : > { %5958 = vst [vmem:[#allocation43_spill] sm:$0xff] %v4427_v13  ;;  %v4434_v14 = vadd.f32 %v1560_v40, %v1548_v42  ;;  %v1318_v41 = vadd.f32 %v4331_v15, %v1302_v48  ;;  %v1343_v57 = vmul.f32 %v3542_v8, %v4353_v5  ;;  %v1451_v31 = vmul.f32 %v1356_v18, %v5868_v23  ;;  %v5966_v48 = vld [vmem:[#allocation40_spill] sm:$0xff] }
 0x100   : > { %v1378_v6 = vadd.f32 %v1374_v36, %v1362_v51  ;;  %v5960_v58 = vrot.slane %v4353_v5, 7  ;;  %v5961_v17 = vrot.slane %v4341_v7, 7  ;;  %v1530_v50 = vmul.f32 %v3436_v21, %v4353_v5  ;;  %v4475_v51 = vld [vmem:[%s3392_s6 + $0xe0] sm:$0xff] }
 0x101   : > { %5959 = vst [vmem:[#allocation25_spill] sm:$0xff] %v4434_v14  ;;  %v1334_v12 = vadd.f32 %v4336_v20, %v1318_v41  ;;  %v5962_v61 = vrot.slane %v4341_v7, 1  ;;  %v5963_v60 = vrot.slane %v4353_v5, 1  ;;  %v1299_v40 = vmul.f32 %v3470_v35, %v4257_v59  ;;  %v5968_v41 = vld [vmem:[#allocation22_spill] sm:$0xff]  ;;  %v5974_v14 = vld [vmem:[#allocation23_spill] sm:$0xff] }
 0x102   : > { %v1353_v25 = vsel %vm551_vm2, %v5961_v17, %v5960_v58  ;;  %2928 = vst [vmem:[%s3653_s24 + $0xa8] sm:$0xff] %v1378_v6  ;;  %v4460_v47 = vmul.f32 %v1370_v4, %v5869_v10  ;;  %v4462_v33 = vadd.f32 %v1561_v46, %v1549_v34  ;;  %v1531_v42 = vmul.f32 %v3452_v28, %v4387_v49  ;;  %v5967_v34 = vld [vmem:[#allocation13_spill] sm:$0xff]  ;;  %v4485_v58 = vld [vmem:[%s3392_s6 + $0xf0] sm:$0xff] }
 0x103   : > { %v1359_v15 = vmul.f32 %v1353_v25, %v5894_v11  ;;  %v1371_v18 = vsel %vm568_vm3, %v5963_v60, %v5962_v61  ;;  %v1347_v44 = vadd.f32 %v1343_v57, %v1334_v12  ;;  %v4468_v55 = vmul.f32 %v1353_v25, %v5897_v24 }
 0x104   : > { %5964 = vst [vmem:[#allocation39_spill] sm:$0xff] %v4462_v33  ;;  %v1375_v20 = vmul.f32 %v1371_v18, %v5874_v22  ;;  %v4471_v36 = vmul.f32 %v1371_v18, %v5965_v45  ;;  %v1303_v59 = vadd.f32 %v1299_v40, %v5966_v48  ;;  %v1534_v4 = vadd.f32 %v1530_v50, %v3446_v26  ;;  %v5969_v50 = vld [vmem:[#allocation28_spill] sm:$0xff] }
 0x105   : > { %v1546_v46 = vmul.f32 %v1353_v25, %v5967_v34  ;;  %v4480_v6 = vmul.f32 %v1371_v18, %v5968_v41  ;;  %v1354_v57 = vsel %vm551_vm2, %v1350_v43, %v1352_v30  ;;  %v1363_v17 = vadd.f32 %v1359_v15, %v1347_v44  ;;  %v5970_v15 = vld [vmem:[#allocation14_spill] sm:$0xff] }
 0x106   : > { %v1319_v12 = vadd.f32 %v1315_v54, %v1303_v59  ;;  %v1344_v61 = vmul.f32 %v3571_v39, %v4387_v49  ;;  %v1372_v60 = vsel %vm568_vm3, %v1368_v2, %v1366_v3  ;;  %v1360_v40 = vmul.f32 %v1354_v57, %v5969_v50  ;;  %v5971_v59 = vld [vmem:[#allocation37_spill] sm:$0xff] }
 0x107   : > { %v1535_v25 = vadd.f32 %v1531_v42, %v3449_v27  ;;  %v1434_v18 = vmul.f32 %v3455_v29, %v4341_v7  ;;  %v1379_v30 = vadd.f32 %v1375_v20, %v1363_v17  ;;  %v1547_v54 = vmul.f32 %v1354_v57, %v5970_v15  ;;  %v5972_v20 = vld [vmem:[#allocation35_spill] sm:$0xff]  ;;  %v5980_v50 = vld [vmem:[#allocation29_spill] sm:$0xff] }
 0x108   : > { %v1335_v48 = vadd.f32 %v1331_v9, %v1319_v12  ;;  %v1666_v42 = vmul.f32 %v3436_v21, %v4475_v51  ;;  %v1550_v7 = vadd.f32 %v1546_v46, %v1534_v4  ;;  %v1376_v9 = vmul.f32 %v1372_v60, %v5972_v20  ;;  %v5973_v17 = vld [vmem:[#allocation27_spill] sm:$0xff]  ;;  %v4517_v4 = vld [vmem:[%s3392_s6 + $0xe8] sm:$0xff]  ;;  %v4520_v46 = vld [vmem:[%s3392_s6 + $0xf8] sm:$0xff] }
 0x109   : > { %v1438_v33 = vadd.f32 %v1434_v18, %v5971_v59  ;;  %2929 = vst [vmem:[%s3653_s24 + $0xb0] sm:$0xff] %v1379_v30  ;;  %v1435_v12 = vmul.f32 %v3470_v35, %v5973_v17  ;;  %v1563_v15 = vmul.f32 %v1372_v60, %v5974_v14  ;;  %v1479_v18 = vmul.f32 %v3542_v8, %v4475_v51  ;;  %v5977_v17 = vld [vmem:[#allocation32_spill] sm:$0xff] }
 0x10a   : > { %v1348_v43 = vadd.f32 %v1344_v61, %v1335_v48  ;;  %v5975_v59 = vrot.slane %v4475_v51, 7  ;;  %v5976_v3 = vrot.slane %v4485_v58, 7  ;;  %v1551_v48 = vadd.f32 %v1547_v54, %v1535_v25 }
 0x10b   : > { %v1454_v44 = vadd.f32 %v1450_v53, %v1438_v33  ;;  %v5978_v53 = vrot.slane %v4485_v58, 1  ;;  %v5979_v33 = vrot.slane %v4475_v51, 1  ;;  %v1488_v25 = vrot.slane %v4517_v4, 7 }
 0x10c   : > { %v1493_v30 = vsel %vm551_vm2, %v5976_v3, %v5975_v59  ;;  %v1364_v61 = vadd.f32 %v1360_v40, %v1348_v43  ;;  %v1670_v3 = vadd.f32 %v1666_v42, %v3446_v26  ;;  %v5981_v59 = vld [vmem:[#allocation16_spill] sm:$0xff]  ;;  %v5982_v40 = vld [vmem:[#allocation19_spill] sm:$0xff]  ;;  %v1490_v54 = vrot.slane %v4520_v46, 7 }
 0x10d   : > { %v1495_v2 = vmul.f32 %v1493_v30, %v5977_v17  ;;  %v1507_v14 = vsel %vm568_vm3, %v5979_v33, %v5978_v53  ;;  %v1470_v20 = vadd.f32 %v1466_v38, %v1454_v44  ;;  %v1439_v34 = vadd.f32 %v1435_v12, %v5981_v59  ;;  %v5983_v33 = vld [vmem:[#allocation21_spill] sm:$0xff] }
 0x10e   : > { %v1511_v41 = vmul.f32 %v1507_v14, %v5980_v50  ;;  %v1380_v13 = vadd.f32 %v1376_v9, %v1364_v61  ;;  %v1682_v43 = vmul.f32 %v1493_v30, %v5982_v40  ;;  %v1480_v24 = vmul.f32 %v3571_v39, %v4517_v4 }
 0x10f   : > { %v1483_v17 = vadd.f32 %v1479_v18, %v1470_v20  ;;  %v1455_v45 = vadd.f32 %v1451_v31, %v1439_v34  ;;  %v1504_v38 = vrot.slane %v4517_v4, 1  ;;  %v1494_v44 = vsel %vm551_vm2, %v1490_v54, %v1488_v25 }
 0x110   : > { %2930 = vst [vmem:[%s3653_s24 + $0xb8] sm:$0xff] %v1380_v13  ;;  %v1506_v42 = vrot.slane %v4520_v46, 1  ;;  %v1667_v9 = vmul.f32 %v3452_v28, %v4517_v4  ;;  %v1436_v12 = vmul.f32 %v3455_v29, %v4353_v5  ;;  %v1698_v31 = vmul.f32 %v1507_v14, %v5911_v56 }
 0x111   : > { %v1499_v61 = vadd.f32 %v1495_v2, %v1483_v17  ;;  %v1471_v34 = vadd.f32 %v4460_v47, %v1455_v45  ;;  %v1496_v20 = vmul.f32 %v1494_v44, %v3538_v0  ;;  %v1686_v13 = vadd.f32 %v1682_v43, %v1670_v3 }
 0x112   : > { %v1508_v18 = vsel %vm568_vm3, %v1504_v38, %v1506_v42  ;;  %v1671_v53 = vadd.f32 %v1667_v9, %v3449_v27  ;;  %v1683_v59 = vmul.f32 %v1494_v44, %v5983_v33  ;;  %v1453_v40 = vmul.f32 %v1354_v57, %v5957_v16 }
 0x113   : > { %v1515_v50 = vadd.f32 %v1511_v41, %v1499_v61  ;;  %v1484_v5 = vadd.f32 %v1480_v24, %v1471_v34  ;;  %v1512_v2 = vmul.f32 %v1508_v18, %v3512_v52  ;;  %v4556_v17 = vadd.f32 %v4480_v6, %v1550_v7 }
 0x114   : > { %v1469_v47 = vmul.f32 %v1372_v60, %v5852_v63  ;;  %v4559_v45 = vadd.f32 %v1563_v15, %v1551_v48  ;;  %v1440_v3 = vadd.f32 %v1436_v12, %v4424_v19  ;;  %v1588_v43 = vmul.f32 %v1493_v30, %v3476_v37 }
 0x115   : > { %2931 = vst [vmem:[%s3653_s24 + $0xc0] sm:$0xff] %v1515_v50  ;;  %v1500_v9 = vadd.f32 %v1496_v20, %v1484_v5  ;;  %v1687_v33 = vadd.f32 %v1683_v59, %v1671_v53  ;;  %v1699_v41 = vmul.f32 %v1508_v18, %v5893_v62  ;;  %v1604_v24 = vmul.f32 %v1507_v14, %v5863_v32  ;;  %v5991_v59 = vld [vmem:[#allocation17_spill] sm:$0xff] }
 0x116   : > { %5984 = vst [vmem:[#allocation24_spill] sm:$0xff] %v4559_v45  ;;  %v4566_v57 = vadd.f32 %v1698_v31, %v1686_v13  ;;  %v1456_v6 = vadd.f32 %v4468_v55, %v1440_v3  ;;  %v1481_v60 = vmul.f32 %v3542_v8, %v4485_v58  ;;  %v1589_v19 = vmul.f32 %v1494_v44, %v5868_v23 }
 0x117   : > { %v1516_v15 = vadd.f32 %v1512_v2, %v1500_v9  ;;  %v5986_v50 = vrot.slane %v4485_v58, 7  ;;  %v5987_v7 = vrot.slane %v4475_v51, 7  ;;  %v1668_v14 = vmul.f32 %v3436_v21, %v4485_v58  ;;  %v5992_v2 = vld [vmem:[#allocation30_spill] sm:$0xff]  ;;  %v5993_v9 = vld [vmem:[#allocation43_spill] sm:$0xff] }
 0x118   : > { %5985 = vst [vmem:[#allocation41_spill] sm:$0xff] %v4566_v57  ;;  %v1472_v48 = vadd.f32 %v4471_v36, %v1456_v6  ;;  %v5988_v12 = vrot.slane %v4475_v51, 1  ;;  %v5989_v61 = vrot.slane %v4485_v58, 1  ;;  %v1437_v31 = vmul.f32 %v3470_v35, %v4387_v49  ;;  %v4607_v6 = vld [vmem:[%s3392_s6 + $0x100] sm:$0xff] }
 0x119   : > { %v1491_v30 = vsel %vm551_vm2, %v5987_v7, %v5986_v50  ;;  %2932 = vst [vmem:[%s3653_s24 + $0xc8] sm:$0xff] %v1516_v15  ;;  %v4592_v34 = vmul.f32 %v1508_v18, %v5869_v10  ;;  %v4594_v20 = vadd.f32 %v1699_v41, %v1687_v33  ;;  %v1669_v13 = vmul.f32 %v3452_v28, %v4520_v46  ;;  %v5994_v33 = vld [vmem:[#allocation13_spill] sm:$0xff]  ;;  %v5995_v15 = vld [vmem:[#allocation22_spill] sm:$0xff]  ;;  %v4617_v7 = vld [vmem:[%s3392_s6 + $0x110] sm:$0xff] }
 0x11a   : > { %v1497_v55 = vmul.f32 %v1491_v30, %v5894_v11  ;;  %v1509_v44 = vsel %vm568_vm3, %v5989_v61, %v5988_v12  ;;  %v1485_v53 = vadd.f32 %v1481_v60, %v1472_v48  ;;  %v4600_v5 = vmul.f32 %v1491_v30, %v5991_v59 }
 0x11b   : > { %5990 = vst [vmem:[#allocation26_spill] sm:$0xff] %v4594_v20  ;;  %v1513_v36 = vmul.f32 %v1509_v44, %v5874_v22  ;;  %v4603_v3 = vmul.f32 %v1509_v44, %v5992_v2  ;;  %v1441_v49 = vadd.f32 %v1437_v31, %v5993_v9  ;;  %v1672_v18 = vadd.f32 %v1668_v14, %v3446_v26  ;;  %v5996_v14 = vld [vmem:[#allocation28_spill] sm:$0xff] }
 0x11c   : > { %v1684_v41 = vmul.f32 %v1491_v30, %v5994_v33  ;;  %v4612_v50 = vmul.f32 %v1509_v44, %v5995_v15  ;;  %v1492_v60 = vsel %vm551_vm2, %v1488_v25, %v1490_v54  ;;  %v1501_v48 = vadd.f32 %v1497_v55, %v1485_v53  ;;  %v5997_v55 = vld [vmem:[#allocation14_spill] sm:$0xff] }
 0x11d   : > { %v1457_v12 = vadd.f32 %v1453_v40, %v1441_v49  ;;  %v1482_v61 = vmul.f32 %v3571_v39, %v4520_v46  ;;  %v1510_v31 = vsel %vm568_vm3, %v1506_v42, %v1504_v38  ;;  %v1498_v9 = vmul.f32 %v1492_v60, %v5996_v14  ;;  %v5998_v49 = vld [vmem:[#allocation25_spill] sm:$0xff] }
 0x11e   : > { %v1673_v30 = vadd.f32 %v1669_v13, %v3449_v27  ;;  %v1572_v44 = vmul.f32 %v3455_v29, %v4475_v51  ;;  %v1517_v54 = vadd.f32 %v1513_v36, %v1501_v48  ;;  %v1685_v40 = vmul.f32 %v1492_v60, %v5997_v55  ;;  %v5999_v36 = vld [vmem:[#allocation35_spill] sm:$0xff]  ;;  %v6006_v14 = vld [vmem:[#allocation29_spill] sm:$0xff] }
 0x11f   : > { %v1473_v20 = vadd.f32 %v1469_v47, %v1457_v12  ;;  %v1804_v13 = vmul.f32 %v3436_v21, %v4607_v6  ;;  %v1688_v51 = vadd.f32 %v1684_v41, %v1672_v18  ;;  %v1514_v47 = vmul.f32 %v1510_v31, %v5999_v36  ;;  %v6000_v12 = vld [vmem:[#allocation23_spill] sm:$0xff]  ;;  %v4649_v18 = vld [vmem:[%s3392_s6 + $0x108] sm:$0xff] }
 0x120   : > { %v1576_v57 = vadd.f32 %v1572_v44, %v5998_v49  ;;  %2933 = vst [vmem:[%s3653_s24 + $0xd0] sm:$0xff] %v1517_v54  ;;  %v1573_v48 = vmul.f32 %v3470_v35, %v4517_v4  ;;  %v1701_v55 = vmul.f32 %v1510_v31, %v6000_v12  ;;  %v1617_v44 = vmul.f32 %v3542_v8, %v4607_v6 }
 0x121   : > { %v1486_v25 = vadd.f32 %v1482_v61, %v1473_v20  ;;  %v6001_v49 = vrot.slane %v4607_v6, 7  ;;  %v6002_v38 = vrot.slane %v4617_v7, 7  ;;  %v4652_v20 = vld [vmem:[%s3392_s6 + $0x118] sm:$0xff]  ;;  %v1689_v4 = vadd.f32 %v1685_v40, %v1673_v30 }
 0x122   : > { %v1592_v53 = vadd.f32 %v1588_v43, %v1576_v57  ;;  %v6003_v61 = vld [vmem:[#allocation32_spill] sm:$0xff]  ;;  %v6004_v43 = vrot.slane %v4617_v7, 1  ;;  %v6005_v57 = vrot.slane %v4607_v6, 1  ;;  %v1626_v30 = vrot.slane %v4649_v18, 7 }
 0x123   : > { %v1631_v54 = vsel %vm551_vm2, %v6002_v38, %v6001_v49  ;;  %v1502_v41 = vadd.f32 %v1498_v9, %v1486_v25  ;;  %v1808_v38 = vadd.f32 %v1804_v13, %v3446_v26  ;;  %v6007_v49 = vld [vmem:[#allocation39_spill] sm:$0xff]  ;;  %v1628_v40 = vrot.slane %v4652_v20, 7 }
 0x124   : > { %v1633_v42 = vmul.f32 %v1631_v54, %v6003_v61  ;;  %v1645_v12 = vsel %vm568_vm3, %v6005_v57, %v6004_v43  ;;  %v1608_v36 = vadd.f32 %v1604_v24, %v1592_v53  ;;  %v1577_v33 = vadd.f32 %v1573_v48, %v6007_v49  ;;  %v6008_v9 = vld [vmem:[#allocation19_spill] sm:$0xff]  ;;  %v6009_v57 = vld [vmem:[#allocation21_spill] sm:$0xff] }
 0x125   : > { %v1649_v15 = vmul.f32 %v1645_v12, %v6006_v14  ;;  %v1518_v45 = vadd.f32 %v1514_v47, %v1502_v41  ;;  %v1820_v25 = vmul.f32 %v1631_v54, %v6008_v9  ;;  %v1618_v59 = vmul.f32 %v3571_v39, %v4649_v18 }
 0x126   : > { %v1621_v61 = vadd.f32 %v1617_v44, %v1608_v36  ;;  %v1593_v2 = vadd.f32 %v1589_v19, %v1577_v33  ;;  %v1642_v24 = vrot.slane %v4649_v18, 1  ;;  %v1632_v53 = vsel %vm551_vm2, %v1628_v40, %v1626_v30 }
 0x127   : > { %2934 = vst [vmem:[%s3653_s24 + $0xd8] sm:$0xff] %v1518_v45  ;;  %v1644_v13 = vrot.slane %v4652_v20, 1  ;;  %v1805_v47 = vmul.f32 %v3452_v28, %v4649_v18  ;;  %v1574_v48 = vmul.f32 %v3455_v29, %v4485_v58  ;;  %v1836_v19 = vmul.f32 %v1645_v12, %v5911_v56 }
 0x128   : > { %v1637_v41 = vadd.f32 %v1633_v42, %v1621_v61  ;;  %v1609_v33 = vadd.f32 %v4592_v34, %v1593_v2  ;;  %v1634_v36 = vmul.f32 %v1632_v53, %v3538_v0  ;;  %v1824_v45 = vadd.f32 %v1820_v25, %v1808_v38 }
 0x129   : > { %v1646_v44 = vsel %vm568_vm3, %v1642_v24, %v1644_v13  ;;  %v1809_v43 = vadd.f32 %v1805_v47, %v3449_v27  ;;  %v1821_v49 = vmul.f32 %v1632_v53, %v6009_v57  ;;  %v1591_v9 = vmul.f32 %v1492_v60, %v5957_v16 }
 0x12a   : > { %v1653_v14 = vadd.f32 %v1649_v15, %v1637_v41  ;;  %v1622_v58 = vadd.f32 %v1618_v59, %v1609_v33  ;;  %v1650_v42 = vmul.f32 %v1646_v44, %v3512_v52  ;;  %v4688_v61 = vadd.f32 %v4612_v50, %v1688_v51 }
 0x12b   : > { %v1607_v34 = vmul.f32 %v1510_v31, %v5852_v63  ;;  %v4691_v2 = vadd.f32 %v1701_v55, %v1689_v4  ;;  %v1578_v38 = vadd.f32 %v1574_v48, %v4556_v17  ;;  %v1726_v25 = vmul.f32 %v1631_v54, %v3476_v37 }
 0x12c   : > { %2935 = vst [vmem:[%s3653_s24 + $0xe0] sm:$0xff] %v1653_v14  ;;  %v1638_v47 = vadd.f32 %v1634_v36, %v1622_v58  ;;  %v1825_v57 = vadd.f32 %v1821_v49, %v1809_v43  ;;  %v1837_v15 = vmul.f32 %v1646_v44, %v5893_v62  ;;  %v1742_v59 = vmul.f32 %v1645_v12, %v5863_v32  ;;  %v6017_v49 = vld [vmem:[#allocation17_spill] sm:$0xff] }
 0x12d   : > { %6010 = vst [vmem:[#allocation34_spill] sm:$0xff] %v4691_v2  ;;  %v4698_v60 = vadd.f32 %v1836_v19, %v1824_v45  ;;  %v1594_v50 = vadd.f32 %v4600_v5, %v1578_v38  ;;  %v1619_v31 = vmul.f32 %v3542_v8, %v4617_v7  ;;  %v1727_v17 = vmul.f32 %v1632_v53, %v5868_v23 }
 0x12e   : > { %v1654_v55 = vadd.f32 %v1650_v42, %v1638_v47  ;;  %v6012_v14 = vrot.slane %v4617_v7, 7  ;;  %v6013_v51 = vrot.slane %v4607_v6, 7  ;;  %v1806_v12 = vmul.f32 %v3436_v21, %v4617_v7  ;;  %v6018_v42 = vld [vmem:[#allocation30_spill] sm:$0xff]  ;;  %v6019_v47 = vld [vmem:[#allocation24_spill] sm:$0xff] }
 0x12f   : > { %6011 = vst [vmem:[#allocation36_spill] sm:$0xff] %v4698_v60  ;;  %v1610_v4 = vadd.f32 %v4603_v3, %v1594_v50  ;;  %v6014_v48 = vrot.slane %v4607_v6, 1  ;;  %v6015_v41 = vrot.slane %v4617_v7, 1  ;;  %v1575_v19 = vmul.f32 %v3470_v35, %v4520_v46  ;;  %v4739_v50 = vld [vmem:[%s3392_s6 + $0x120] sm:$0xff] }
 0x130   : > { %v1629_v54 = vsel %vm551_vm2, %v6013_v51, %v6012_v14  ;;  %2936 = vst [vmem:[%s3653_s24 + $0xe8] sm:$0xff] %v1654_v55  ;;  %v4724_v33 = vmul.f32 %v1646_v44, %v5869_v10  ;;  %v4726_v36 = vadd.f32 %v1837_v15, %v1825_v57  ;;  %v1807_v45 = vmul.f32 %v3452_v28, %v4652_v20  ;;  %v6020_v57 = vld [vmem:[#allocation13_spill] sm:$0xff]  ;;  %v6021_v55 = vld [vmem:[#allocation22_spill] sm:$0xff]  ;;  %v4749_v51 = vld [vmem:[%s3392_s6 + $0x130] sm:$0xff] }
 0x131   : > { %v1635_v5 = vmul.f32 %v1629_v54, %v5894_v11  ;;  %v1647_v53 = vsel %vm568_vm3, %v6015_v41, %v6014_v48  ;;  %v1623_v43 = vadd.f32 %v1619_v31, %v1610_v4  ;;  %v4732_v58 = vmul.f32 %v1629_v54, %v6017_v49 }
 0x132   : > { %6016 = vst [vmem:[#allocation42_spill] sm:$0xff] %v4726_v36  ;;  %v1651_v3 = vmul.f32 %v1647_v53, %v5874_v22  ;;  %v4735_v38 = vmul.f32 %v1647_v53, %v6018_v42  ;;  %v1579_v46 = vadd.f32 %v1575_v19, %v6019_v47  ;;  %v1810_v44 = vadd.f32 %v1806_v12, %v3446_v26  ;;  %v6022_v12 = vld [vmem:[#allocation28_spill] sm:$0xff] }
 0x133   : > { %v1822_v15 = vmul.f32 %v1629_v54, %v6020_v57  ;;  %v4744_v14 = vmul.f32 %v1647_v53, %v6021_v55  ;;  %v1630_v31 = vsel %vm551_vm2, %v1626_v30, %v1628_v40  ;;  %v1639_v4 = vadd.f32 %v1635_v5, %v1623_v43  ;;  %v6023_v5 = vld [vmem:[#allocation14_spill] sm:$0xff] }
 0x134   : > { %v1595_v48 = vadd.f32 %v1591_v9, %v1579_v46  ;;  %v1620_v41 = vmul.f32 %v3571_v39, %v4652_v20  ;;  %v1648_v19 = vsel %vm568_vm3, %v1644_v13, %v1642_v24  ;;  %v1636_v47 = vmul.f32 %v1630_v31, %v6022_v12  ;;  %v6024_v46 = vld [vmem:[#allocation41_spill] sm:$0xff] }
 0x135   : > { %v1811_v54 = vadd.f32 %v1807_v45, %v3449_v27  ;;  %v1710_v53 = vmul.f32 %v3455_v29, %v4607_v6  ;;  %v1655_v40 = vadd.f32 %v1651_v3, %v1639_v4  ;;  %v1823_v9 = vmul.f32 %v1630_v31, %v6023_v5  ;;  %v6025_v3 = vld [vmem:[#allocation35_spill] sm:$0xff]  ;;  %v6032_v12 = vld [vmem:[#allocation29_spill] sm:$0xff] }
 0x136   : > { %v1611_v36 = vadd.f32 %v1607_v34, %v1595_v48  ;;  %v1942_v45 = vmul.f32 %v3436_v21, %v4739_v50  ;;  %v1826_v6 = vadd.f32 %v1822_v15, %v1810_v44  ;;  %v1652_v34 = vmul.f32 %v1648_v19, %v6025_v3  ;;  %v6026_v48 = vld [vmem:[#allocation23_spill] sm:$0xff]  ;;  %v4781_v44 = vld [vmem:[%s3392_s6 + $0x128] sm:$0xff] }
 0x137   : > { %v1714_v60 = vadd.f32 %v1710_v53, %v6024_v46  ;;  %2937 = vst [vmem:[%s3653_s24 + $0xf0] sm:$0xff] %v1655_v40  ;;  %v1711_v4 = vmul.f32 %v3470_v35, %v4649_v18  ;;  %v1839_v5 = vmul.f32 %v1648_v19, %v6026_v48  ;;  %v1755_v53 = vmul.f32 %v3542_v8, %v4739_v50 }
 0x138   : > { %v1624_v30 = vadd.f32 %v1620_v41, %v1611_v36  ;;  %v6027_v46 = vrot.slane %v4739_v50, 7  ;;  %v6028_v24 = vrot.slane %v4749_v51, 7  ;;  %v4784_v36 = vld [vmem:[%s3392_s6 + $0x138] sm:$0xff]  ;;  %v1827_v18 = vadd.f32 %v1823_v9, %v1811_v54 }
 0x139   : > { %v1730_v43 = vadd.f32 %v1726_v25, %v1714_v60  ;;  %v6029_v41 = vld [vmem:[#allocation32_spill] sm:$0xff]  ;;  %v6030_v25 = vrot.slane %v4749_v51, 1  ;;  %v6031_v60 = vrot.slane %v4739_v50, 1  ;;  %v1764_v54 = vrot.slane %v4781_v44, 7 }
 0x13a   : > { %v1769_v40 = vsel %vm551_vm2, %v6028_v24, %v6027_v46  ;;  %v1640_v15 = vadd.f32 %v1636_v47, %v1624_v30  ;;  %v1946_v24 = vadd.f32 %v1942_v45, %v3446_v26  ;;  %v6033_v46 = vld [vmem:[#allocation26_spill] sm:$0xff]  ;;  %v6034_v47 = vld [vmem:[#allocation19_spill] sm:$0xff]  ;;  %v1766_v9 = vrot.slane %v4784_v36, 7 }
 0x13b   : > { %v1771_v13 = vmul.f32 %v1769_v40, %v6029_v41  ;;  %v1783_v48 = vsel %vm568_vm3, %v6031_v60, %v6030_v25  ;;  %v1746_v3 = vadd.f32 %v1742_v59, %v1730_v43  ;;  %v1715_v57 = vadd.f32 %v1711_v4, %v6033_v46  ;;  %v6035_v60 = vld [vmem:[#allocation21_spill] sm:$0xff] }
 0x13c   : > { %v1787_v55 = vmul.f32 %v1783_v48, %v6032_v12  ;;  %v1656_v2 = vadd.f32 %v1652_v34, %v1640_v15  ;;  %v1958_v30 = vmul.f32 %v1769_v40, %v6034_v47  ;;  %v1756_v49 = vmul.f32 %v3571_v39, %v4781_v44 }
 0x13d   : > { %v1759_v41 = vadd.f32 %v1755_v53, %v1746_v3  ;;  %v1731_v42 = vadd.f32 %v1727_v17, %v1715_v57  ;;  %v1780_v59 = vrot.slane %v4781_v44, 1  ;;  %v1770_v43 = vsel %vm551_vm2, %v1766_v9, %v1764_v54 }
 0x13e   : > { %2938 = vst [vmem:[%s3653_s24 + $0xf8] sm:$0xff] %v1656_v2  ;;  %v1782_v45 = vrot.slane %v4784_v36, 1  ;;  %v1943_v34 = vmul.f32 %v3452_v28, %v4781_v44  ;;  %v1712_v4 = vmul.f32 %v3455_v29, %v4617_v7  ;;  %v1974_v17 = vmul.f32 %v1783_v48, %v5911_v56 }
 0x13f   : > { %v1775_v15 = vadd.f32 %v1771_v13, %v1759_v41  ;;  %v1747_v57 = vadd.f32 %v4724_v33, %v1731_v42  ;;  %v1772_v3 = vmul.f32 %v1770_v43, %v3538_v0  ;;  %v1962_v2 = vadd.f32 %v1958_v30, %v1946_v24 }
 0x140   : > { %v1784_v53 = vsel %vm568_vm3, %v1780_v59, %v1782_v45  ;;  %v1947_v25 = vadd.f32 %v1943_v34, %v3449_v27  ;;  %v1959_v46 = vmul.f32 %v1770_v43, %v6035_v60  ;;  %v1729_v47 = vmul.f32 %v1630_v31, %v5957_v16 }
 0x141   : > { %v1791_v12 = vadd.f32 %v1787_v55, %v1775_v15  ;;  %v1760_v7 = vadd.f32 %v1756_v49, %v1747_v57  ;;  %v1788_v13 = vmul.f32 %v1784_v53, %v3512_v52  ;;  %v4820_v41 = vadd.f32 %v4744_v14, %v1826_v6 }
 0x142   : > { %v1745_v33 = vmul.f32 %v1648_v19, %v5852_v63  ;;  %v4823_v42 = vadd.f32 %v1839_v5, %v1827_v18  ;;  %v1716_v24 = vadd.f32 %v1712_v4, %v4688_v61  ;;  %v1864_v30 = vmul.f32 %v1769_v40, %v3476_v37 }
 0x143   : > { %2939 = vst [vmem:[%s3653_s24 + $0x100] sm:$0xff] %v1791_v12  ;;  %v1776_v34 = vadd.f32 %v1772_v3, %v1760_v7  ;;  %v1963_v60 = vadd.f32 %v1959_v46, %v1947_v25  ;;  %v1975_v55 = vmul.f32 %v1784_v53, %v5893_v62  ;;  %v1880_v49 = vmul.f32 %v1783_v48, %v5863_v32  ;;  %v6043_v46 = vld [vmem:[#allocation17_spill] sm:$0xff] }
 0x144   : > { %6036 = vst [vmem:[#allocation38_spill] sm:$0xff] %v4823_v42  ;;  %v4830_v31 = vadd.f32 %v1974_v17, %v1962_v2  ;;  %v1732_v14 = vadd.f32 %v4732_v58, %v1716_v24  ;;  %v1757_v19 = vmul.f32 %v3542_v8, %v4749_v51  ;;  %v1865_v61 = vmul.f32 %v1770_v43, %v5868_v23 }
 0x145   : > { %v1792_v5 = vadd.f32 %v1788_v13, %v1776_v34  ;;  %v6038_v12 = vrot.slane %v4749_v51, 7  ;;  %v6039_v6 = vrot.slane %v4739_v50, 7  ;;  %v1944_v48 = vmul.f32 %v3436_v21, %v4749_v51  ;;  %v6044_v13 = vld [vmem:[#allocation30_spill] sm:$0xff] }
 0x146   : > { %6037 = vst [vmem:[#allocation40_spill] sm:$0xff] %v4830_v31  ;;  %v1748_v18 = vadd.f32 %v4735_v38, %v1732_v14  ;;  %v6040_v4 = vrot.slane %v4739_v50, 1  ;;  %v6041_v15 = vrot.slane %v4749_v51, 1  ;;  %v1713_v17 = vmul.f32 %v3470_v35, %v4652_v20  ;;  %v6045_v34 = vld [vmem:[#allocation34_spill] sm:$0xff]  ;;  %v4871_v14 = vld [vmem:[%s3392_s6 + $0x140] sm:$0xff] }
 0x147   : > { %v1767_v40 = vsel %vm551_vm2, %v6039_v6, %v6038_v12  ;;  %2940 = vst [vmem:[%s3653_s24 + $0x108] sm:$0xff] %v1792_v5  ;;  %v4856_v57 = vmul.f32 %v1784_v53, %v5869_v10  ;;  %v4858_v3 = vadd.f32 %v1975_v55, %v1963_v60  ;;  %v1945_v2 = vmul.f32 %v3452_v28, %v4784_v36  ;;  %v6046_v60 = vld [vmem:[#allocation13_spill] sm:$0xff]  ;;  %v6047_v5 = vld [vmem:[#allocation22_spill] sm:$0xff]  ;;  %v4881_v6 = vld [vmem:[%s3392_s6 + $0x150] sm:$0xff] }
 0x148   : > { %v1773_v58 = vmul.f32 %v1767_v40, %v5894_v11  ;;  %v1785_v43 = vsel %vm568_vm3, %v6041_v15, %v6040_v4  ;;  %v1761_v25 = vadd.f32 %v1757_v19, %v1748_v18  ;;  %v4864_v7 = vmul.f32 %v1767_v40, %v6043_v46 }
 0x149   : > { %6042 = vst [vmem:[#allocation37_spill] sm:$0xff] %v4858_v3  ;;  %v1789_v38 = vmul.f32 %v1785_v43, %v5874_v22  ;;  %v4867_v24 = vmul.f32 %v1785_v43, %v6044_v13  ;;  %v1717_v20 = vadd.f32 %v1713_v17, %v6045_v34  ;;  %v1948_v53 = vadd.f32 %v1944_v48, %v3446_v26  ;;  %v6048_v48 = vld [vmem:[#allocation28_spill] sm:$0xff] }
 0x14a   : > { %v1960_v55 = vmul.f32 %v1767_v40, %v6046_v60  ;;  %v4876_v12 = vmul.f32 %v1785_v43, %v6047_v5  ;;  %v1768_v19 = vsel %vm551_vm2, %v1764_v54, %v1766_v9  ;;  %v1777_v18 = vadd.f32 %v1773_v58, %v1761_v25  ;;  %v6049_v58 = vld [vmem:[#allocation14_spill] sm:$0xff] }
 0x14b   : > { %v1733_v4 = vadd.f32 %v1729_v47, %v1717_v20  ;;  %v1758_v15 = vmul.f32 %v3571_v39, %v4784_v36  ;;  %v1786_v17 = vsel %vm568_vm3, %v1782_v45, %v1780_v59  ;;  %v1774_v34 = vmul.f32 %v1768_v19, %v6048_v48  ;;  %v6050_v20 = vld [vmem:[#allocation36_spill] sm:$0xff]  ;;  %v6058_v48 = vld [vmem:[#allocation29_spill] sm:$0xff] }
 0x14c   : > { %v1949_v40 = vadd.f32 %v1945_v2, %v3449_v27  ;;  %v1848_v43 = vmul.f32 %v3455_v29, %v4739_v50  ;;  %v1793_v9 = vadd.f32 %v1789_v38, %v1777_v18  ;;  %v1961_v47 = vmul.f32 %v1768_v19, %v6049_v58  ;;  %v6051_v38 = vld [vmem:[#allocation35_spill] sm:$0xff] }
 0x14d   : > { %v1749_v3 = vadd.f32 %v1745_v33, %v1733_v4  ;;  %v2080_v2 = vmul.f32 %v3436_v21, %v4871_v14  ;;  %v1964_v50 = vadd.f32 %v1960_v55, %v1948_v53  ;;  %v1790_v33 = vmul.f32 %v1786_v17, %v6051_v38  ;;  %v6052_v4 = vld [vmem:[#allocation23_spill] sm:$0xff]  ;;  %v4913_v53 = vld [vmem:[%s3392_s6 + $0x148] sm:$0xff] }
 0x14e   : > { %v1852_v31 = vadd.f32 %v1848_v43, %v6050_v20  ;;  %2941 = vst [vmem:[%s3653_s24 + $0x110] sm:$0xff] %v1793_v9  ;;  %v1849_v18 = vmul.f32 %v3470_v35, %v4781_v44  ;;  %v1977_v58 = vmul.f32 %v1786_v17, %v6052_v4  ;;  %v1893_v43 = vmul.f32 %v3542_v8, %v4871_v14 }
 0x14f   : > { %v1762_v54 = vadd.f32 %v1758_v15, %v1749_v3  ;;  %v6053_v20 = vrot.slane %v4871_v14, 7  ;;  %v6054_v59 = vrot.slane %v4881_v6, 7  ;;  %v4916_v3 = vld [vmem:[%s3392_s6 + $0x158] sm:$0xff]  ;;  %v1965_v44 = vadd.f32 %v1961_v47, %v1949_v40 }
 0x150   : > { %v1868_v25 = vadd.f32 %v1864_v30, %v1852_v31  ;;  %v6055_v15 = vld [vmem:[#allocation32_spill] sm:$0xff]  ;;  %v6056_v30 = vrot.slane %v4881_v6, 1  ;;  %v6057_v31 = vrot.slane %v4871_v14, 1  ;;  %v1902_v40 = vrot.slane %v4913_v53, 7 }
 0x151   : > { %v1907_v9 = vsel %vm551_vm2, %v6054_v59, %v6053_v20  ;;  %v1778_v55 = vadd.f32 %v1774_v34, %v1762_v54  ;;  %v2084_v59 = vadd.f32 %v2080_v2, %v3446_v26  ;;  %v6059_v20 = vld [vmem:[#allocation42_spill] sm:$0xff]  ;;  %v6060_v34 = vld [vmem:[#allocation19_spill] sm:$0xff]  ;;  %v1904_v47 = vrot.slane %v4916_v3, 7 }
 0x152   : > { %v1909_v45 = vmul.f32 %v1907_v9, %v6055_v15  ;;  %v1921_v4 = vsel %vm568_vm3, %v6057_v31, %v6056_v30  ;;  %v1884_v38 = vadd.f32 %v1880_v49, %v1868_v25  ;;  %v1853_v60 = vadd.f32 %v1849_v18, %v6059_v20  ;;  %v6061_v31 = vld [vmem:[#allocation21_spill] sm:$0xff] }
 0x153   : > { %v1925_v5 = vmul.f32 %v1921_v4, %v6058_v48  ;;  %v1794_v42 = vadd.f32 %v1790_v33, %v1778_v55  ;;  %v2096_v54 = vmul.f32 %v1907_v9, %v6060_v34  ;;  %v1894_v46 = vmul.f32 %v3571_v39, %v4913_v53 }
 0x154   : > { %v1897_v15 = vadd.f32 %v1893_v43, %v1884_v38  ;;  %v1869_v13 = vadd.f32 %v1865_v61, %v1853_v60  ;;  %v1918_v49 = vrot.slane %v4913_v53, 1  ;;  %v1908_v25 = vsel %vm551_vm2, %v1904_v47, %v1902_v40 }
 0x155   : > { %2942 = vst [vmem:[%s3653_s24 + $0x118] sm:$0xff] %v1794_v42  ;;  %v1920_v2 = vrot.slane %v4916_v3, 1  ;;  %v2081_v33 = vmul.f32 %v3452_v28, %v4913_v53  ;;  %v1850_v18 = vmul.f32 %v3455_v29, %v4749_v51  ;;  %v2112_v61 = vmul.f32 %v1921_v4, %v5911_v56 }
 0x156   : > { %v1913_v55 = vadd.f32 %v1909_v45, %v1897_v15  ;;  %v1885_v60 = vadd.f32 %v4856_v57, %v1869_v13  ;;  %v1910_v38 = vmul.f32 %v1908_v25, %v3538_v0  ;;  %v2100_v42 = vadd.f32 %v2096_v54, %v2084_v59 }
 0x157   : > { %v1922_v43 = vsel %vm568_vm3, %v1918_v49, %v1920_v2  ;;  %v2085_v30 = vadd.f32 %v2081_v33, %v3449_v27  ;;  %v2097_v20 = vmul.f32 %v1908_v25, %v6061_v31  ;;  %v1867_v34 = vmul.f32 %v1768_v19, %v5957_v16 }
 0x158   : > { %v1929_v48 = vadd.f32 %v1925_v5, %v1913_v55  ;;  %v1898_v51 = vadd.f32 %v1894_v46, %v1885_v60  ;;  %v1926_v45 = vmul.f32 %v1922_v43, %v3512_v52  ;;  %v4952_v15 = vadd.f32 %v4876_v12, %v1964_v50 }
 0x159   : > { %v1883_v57 = vmul.f32 %v1786_v17, %v5852_v63  ;;  %v4955_v13 = vadd.f32 %v1977_v58, %v1965_v44  ;;  %v1854_v59 = vadd.f32 %v1850_v18, %v4820_v41  ;;  %v2002_v54 = vmul.f32 %v1907_v9, %v3476_v37 }
 0x15a   : > { %2943 = vst [vmem:[%s3653_s24 + $0x120] sm:$0xff] %v1929_v48  ;;  %v1914_v33 = vadd.f32 %v1910_v38, %v1898_v51  ;;  %v2101_v31 = vadd.f32 %v2097_v20, %v2085_v30  ;;  %v2113_v5 = vmul.f32 %v1922_v43, %v5893_v62  ;;  %v2018_v46 = vmul.f32 %v1921_v4, %v5863_v32  ;;  %v6069_v20 = vld [vmem:[#allocation17_spill] sm:$0xff] }
 0x15b   : > { %6062 = vst [vmem:[#allocation27_spill] sm:$0xff] %v4955_v13  ;;  %v4962_v19 = vadd.f32 %v2112_v61, %v2100_v42  ;;  %v1870_v12 = vadd.f32 %v4864_v7, %v1854_v59  ;;  %v1895_v17 = vmul.f32 %v3542_v8, %v4881_v6  ;;  %v2003_v41 = vmul.f32 %v1908_v25, %v5868_v23 }
 0x15c   : > { %v1930_v58 = vadd.f32 %v1926_v45, %v1914_v33  ;;  %v6064_v48 = vrot.slane %v4881_v6, 7  ;;  %v6065_v50 = vrot.slane %v4871_v14, 7  ;;  %v2082_v4 = vmul.f32 %v3436_v21, %v4881_v6  ;;  %v6070_v45 = vld [vmem:[#allocation30_spill] sm:$0xff] }
 0x15d   : > { %6063 = vst [vmem:[#allocation16_spill] sm:$0xff] %v4962_v19  ;;  %v1886_v44 = vadd.f32 %v4867_v24, %v1870_v12  ;;  %v6066_v18 = vrot.slane %v4871_v14, 1  ;;  %v6067_v55 = vrot.slane %v4881_v6, 1  ;;  %v1851_v61 = vmul.f32 %v3470_v35, %v4784_v36  ;;  %v6071_v33 = vld [vmem:[#allocation38_spill] sm:$0xff]  ;;  %v5003_v12 = vld [vmem:[%s3392_s6 + $0x160] sm:$0xff] }
 0x15e   : > { %v1905_v9 = vsel %vm551_vm2, %v6065_v50, %v6064_v48  ;;  %2944 = vst [vmem:[%s3653_s24 + $0x128] sm:$0xff] %v1930_v58  ;;  %v4988_v60 = vmul.f32 %v1922_v43, %v5869_v10  ;;  %v4990_v38 = vadd.f32 %v2113_v5, %v2101_v31  ;;  %v2083_v42 = vmul.f32 %v3452_v28, %v4916_v3  ;;  %v6072_v31 = vld [vmem:[#allocation13_spill] sm:$0xff]  ;;  %v6073_v58 = vld [vmem:[#allocation22_spill] sm:$0xff]  ;;  %v5013_v50 = vld [vmem:[%s3392_s6 + $0x170] sm:$0xff] }
 0x15f   : > { %v1911_v7 = vmul.f32 %v1905_v9, %v5894_v11  ;;  %v1923_v25 = vsel %vm568_vm3, %v6067_v55, %v6066_v18  ;;  %v1899_v30 = vadd.f32 %v1895_v17, %v1886_v44  ;;  %v4996_v51 = vmul.f32 %v1905_v9, %v6069_v20 }
 0x160   : > { %6068 = vst [vmem:[#allocation43_spill] sm:$0xff] %v4990_v38  ;;  %v1927_v24 = vmul.f32 %v1923_v25, %v5874_v22  ;;  %v4999_v59 = vmul.f32 %v1923_v25, %v6070_v45  ;;  %v1855_v36 = vadd.f32 %v1851_v61, %v6071_v33  ;;  %v2086_v43 = vadd.f32 %v2082_v4, %v3446_v26  ;;  %v6074_v4 = vld [vmem:[#allocation28_spill] sm:$0xff] }
 0x161   : > { %v2098_v5 = vmul.f32 %v1905_v9, %v6072_v31  ;;  %v5008_v48 = vmul.f32 %v1923_v25, %v6073_v58  ;;  %v1906_v17 = vsel %vm551_vm2, %v1902_v40, %v1904_v47  ;;  %v1915_v44 = vadd.f32 %v1911_v7, %v1899_v30  ;;  %v6075_v7 = vld [vmem:[#allocation14_spill] sm:$0xff] }
 0x162   : > { %v1871_v18 = vadd.f32 %v1867_v34, %v1855_v36  ;;  %v1896_v55 = vmul.f32 %v3571_v39, %v4916_v3  ;;  %v1924_v61 = vsel %vm568_vm3, %v1920_v2, %v1918_v49  ;;  %v1912_v33 = vmul.f32 %v1906_v17, %v6074_v4  ;;  %v6076_v36 = vld [vmem:[#allocation40_spill] sm:$0xff]  ;;  %v6084_v4 = vld [vmem:[#allocation29_spill] sm:$0xff] }
 0x163   : > { %v2087_v9 = vadd.f32 %v2083_v42, %v3449_v27  ;;  %v1986_v25 = vmul.f32 %v3455_v29, %v4871_v14  ;;  %v1931_v47 = vadd.f32 %v1927_v24, %v1915_v44  ;;  %v2099_v34 = vmul.f32 %v1906_v17, %v6075_v7  ;;  %v6077_v24 = vld [vmem:[#allocation35_spill] sm:$0xff] }
 0x164   : > { %v1887_v38 = vadd.f32 %v1883_v57, %v1871_v18  ;;  %v2218_v42 = vmul.f32 %v3436_v21, %v5003_v12  ;;  %v2102_v14 = vadd.f32 %v2098_v5, %v2086_v43  ;;  %v1928_v57 = vmul.f32 %v1924_v61, %v6077_v24  ;;  %v6078_v18 = vld [vmem:[#allocation23_spill] sm:$0xff]  ;;  %v5045_v43 = vld [vmem:[%s3392_s6 + $0x168] sm:$0xff] }
 0x165   : > { %v1990_v19 = vadd.f32 %v1986_v25, %v6076_v36  ;;  %2945 = vst [vmem:[%s3653_s24 + $0x130] sm:$0xff] %v1931_v47  ;;  %v1987_v44 = vmul.f32 %v3470_v35, %v4913_v53  ;;  %v2115_v7 = vmul.f32 %v1924_v61, %v6078_v18  ;;  %v2031_v25 = vmul.f32 %v3542_v8, %v5003_v12 }
 0x166   : > { %v1900_v40 = vadd.f32 %v1896_v55, %v1887_v38  ;;  %v6079_v36 = vrot.slane %v5003_v12, 7  ;;  %v6080_v49 = vrot.slane %v5013_v50, 7  ;;  %v5048_v38 = vld [vmem:[%s3392_s6 + $0x178] sm:$0xff]  ;;  %v2103_v53 = vadd.f32 %v2099_v34, %v2087_v9 }
 0x167   : > { %v2006_v30 = vadd.f32 %v2002_v54, %v1990_v19  ;;  %v6081_v55 = vld [vmem:[#allocation32_spill] sm:$0xff]  ;;  %v6082_v54 = vrot.slane %v5013_v50, 1  ;;  %v6083_v19 = vrot.slane %v5003_v12, 1  ;;  %v2040_v9 = vrot.slane %v5045_v43, 7 }
 0x168   : > { %v2045_v47 = vsel %vm551_vm2, %v6080_v49, %v6079_v36  ;;  %v1916_v5 = vadd.f32 %v1912_v33, %v1900_v40  ;;  %v2222_v49 = vadd.f32 %v2218_v42, %v3446_v26  ;;  %v6085_v36 = vld [vmem:[#allocation37_spill] sm:$0xff]  ;;  %v6086_v33 = vld [vmem:[#allocation19_spill] sm:$0xff]  ;;  %v2042_v34 = vrot.slane %v5048_v38, 7 }
 0x169   : > { %v2047_v2 = vmul.f32 %v2045_v47, %v6081_v55  ;;  %v2059_v18 = vsel %vm568_vm3, %v6083_v19, %v6082_v54  ;;  %v2022_v24 = vadd.f32 %v2018_v46, %v2006_v30  ;;  %v1991_v31 = vadd.f32 %v1987_v44, %v6085_v36  ;;  %v6087_v19 = vld [vmem:[#allocation21_spill] sm:$0xff] }
 0x16a   : > { %v2063_v58 = vmul.f32 %v2059_v18, %v6084_v4  ;;  %v1932_v13 = vadd.f32 %v1928_v57, %v1916_v5  ;;  %v2234_v40 = vmul.f32 %v2045_v47, %v6086_v33  ;;  %v2032_v20 = vmul.f32 %v3571_v39, %v5045_v43 }
 0x16b   : > { %v2035_v55 = vadd.f32 %v2031_v25, %v2022_v24  ;;  %v2007_v45 = vadd.f32 %v2003_v41, %v1991_v31  ;;  %v2056_v46 = vrot.slane %v5045_v43, 1  ;;  %v2046_v30 = vsel %vm551_vm2, %v2042_v34, %v2040_v9 }
 0x16c   : > { %2946 = vst [vmem:[%s3653_s24 + $0x138] sm:$0xff] %v1932_v13  ;;  %v2058_v42 = vrot.slane %v5048_v38, 1  ;;  %v2219_v57 = vmul.f32 %v3452_v28, %v5045_v43  ;;  %v1988_v44 = vmul.f32 %v3455_v29, %v4881_v6  ;;  %v2250_v41 = vmul.f32 %v2059_v18, %v5911_v56 }
 0x16d   : > { %v2051_v5 = vadd.f32 %v2047_v2, %v2035_v55  ;;  %v2023_v31 = vadd.f32 %v4988_v60, %v2007_v45  ;;  %v2048_v24 = vmul.f32 %v2046_v30, %v3538_v0  ;;  %v2238_v13 = vadd.f32 %v2234_v40, %v2222_v49 }
 0x16e   : > { %v2060_v25 = vsel %vm568_vm3, %v2056_v46, %v2058_v42  ;;  %v2223_v54 = vadd.f32 %v2219_v57, %v3449_v27  ;;  %v2235_v36 = vmul.f32 %v2046_v30, %v6087_v19  ;;  %v2005_v33 = vmul.f32 %v1906_v17, %v5957_v16 }
 0x16f   : > { %v2067_v4 = vadd.f32 %v2063_v58, %v2051_v5  ;;  %v2036_v6 = vadd.f32 %v2032_v20, %v2023_v31  ;;  %v2064_v2 = vmul.f32 %v2060_v25, %v3512_v52  ;;  %v5084_v55 = vadd.f32 %v5008_v48, %v2102_v14 }
 0x170   : > { %v2021_v60 = vmul.f32 %v1924_v61, %v5852_v63  ;;  %v5087_v45 = vadd.f32 %v2115_v7, %v2103_v53  ;;  %v1992_v49 = vadd.f32 %v1988_v44, %v4952_v15  ;;  %v2140_v40 = vmul.f32 %v2045_v47, %v3476_v37 }
 0x171   : > { %2947 = vst [vmem:[%s3653_s24 + $0x140] sm:$0xff] %v2067_v4  ;;  %v2052_v57 = vadd.f32 %v2048_v24, %v2036_v6  ;;  %v2239_v19 = vadd.f32 %v2235_v36, %v2223_v54  ;;  %v2251_v58 = vmul.f32 %v2060_v25, %v5893_v62  ;;  %v2156_v20 = vmul.f32 %v2059_v18, %v5863_v32  ;;  %v6095_v36 = vld [vmem:[#allocation17_spill] sm:$0xff] }
 0x172   : > { %6088 = vst [vmem:[#allocation25_spill] sm:$0xff] %v5087_v45  ;;  %v5094_v17 = vadd.f32 %v2250_v41, %v2238_v13  ;;  %v2008_v48 = vadd.f32 %v4996_v51, %v1992_v49  ;;  %v2033_v61 = vmul.f32 %v3542_v8, %v5013_v50  ;;  %v2141_v15 = vmul.f32 %v2046_v30, %v5868_v23 }
 0x173   : > { %v2068_v7 = vadd.f32 %v2064_v2, %v2052_v57  ;;  %v6090_v4 = vrot.slane %v5013_v50, 7  ;;  %v6091_v14 = vrot.slane %v5003_v12, 7  ;;  %v2220_v18 = vmul.f32 %v3436_v21, %v5013_v50  ;;  %v6096_v2 = vld [vmem:[#allocation30_spill] sm:$0xff]  ;;  %v6097_v57 = vld [vmem:[#allocation27_spill] sm:$0xff] }
 0x174   : > { %6089 = vst [vmem:[#allocation39_spill] sm:$0xff] %v5094_v17  ;;  %v2024_v53 = vadd.f32 %v4999_v59, %v2008_v48  ;;  %v6092_v44 = vrot.slane %v5003_v12, 1  ;;  %v6093_v5 = vrot.slane %v5013_v50, 1  ;;  %v1989_v41 = vmul.f32 %v3470_v35, %v4916_v3  ;;  %v5135_v48 = vld [vmem:[%s3392_s6 + $0x180] sm:$0xff] }
 0x175   : > { %v2043_v47 = vsel %vm551_vm2, %v6091_v14, %v6090_v4  ;;  %2948 = vst [vmem:[%s3653_s24 + $0x148] sm:$0xff] %v2068_v7  ;;  %v5120_v31 = vmul.f32 %v2060_v25, %v5869_v10  ;;  %v5122_v24 = vadd.f32 %v2251_v58, %v2239_v19  ;;  %v2221_v13 = vmul.f32 %v3452_v28, %v5048_v38  ;;  %v6098_v19 = vld [vmem:[#allocation13_spill] sm:$0xff]  ;;  %v6099_v7 = vld [vmem:[#allocation22_spill] sm:$0xff]  ;;  %v5145_v14 = vld [vmem:[%s3392_s6 + $0x190] sm:$0xff] }
 0x176   : > { %v2049_v51 = vmul.f32 %v2043_v47, %v5894_v11  ;;  %v2061_v30 = vsel %vm568_vm3, %v6093_v5, %v6092_v44  ;;  %v2037_v54 = vadd.f32 %v2033_v61, %v2024_v53  ;;  %v5128_v6 = vmul.f32 %v2043_v47, %v6095_v36 }
 0x177   : > { %6094 = vst [vmem:[#allocation24_spill] sm:$0xff] %v5122_v24  ;;  %v2065_v59 = vmul.f32 %v2061_v30, %v5874_v22  ;;  %v5131_v49 = vmul.f32 %v2061_v30, %v6096_v2  ;;  %v1993_v3 = vadd.f32 %v1989_v41, %v6097_v57  ;;  %v2224_v25 = vadd.f32 %v2220_v18, %v3446_v26  ;;  %v6100_v18 = vld [vmem:[#allocation28_spill] sm:$0xff] }
 0x178   : > { %v2236_v58 = vmul.f32 %v2043_v47, %v6098_v19  ;;  %v5140_v4 = vmul.f32 %v2061_v30, %v6099_v7  ;;  %v2044_v61 = vsel %vm551_vm2, %v2040_v9, %v2042_v34  ;;  %v2053_v53 = vadd.f32 %v2049_v51, %v2037_v54  ;;  %v6101_v51 = vld [vmem:[#allocation14_spill] sm:$0xff] }
 0x179   : > { %v2009_v44 = vadd.f32 %v2005_v33, %v1993_v3  ;;  %v2034_v5 = vmul.f32 %v3571_v39, %v5048_v38  ;;  %v2062_v41 = vsel %vm568_vm3, %v2058_v42, %v2056_v46  ;;  %v2050_v57 = vmul.f32 %v2044_v61, %v6100_v18  ;;  %v6102_v3 = vld [vmem:[#allocation16_spill] sm:$0xff]  ;;  %v6110_v18 = vld [vmem:[#allocation29_spill] sm:$0xff] }
 0x17a   : > { %v2225_v47 = vadd.f32 %v2221_v13, %v3449_v27  ;;  %v2124_v30 = vmul.f32 %v3455_v29, %v5003_v12  ;;  %v2069_v34 = vadd.f32 %v2065_v59, %v2053_v53  ;;  %v2237_v33 = vmul.f32 %v2044_v61, %v6101_v51  ;;  %v6103_v59 = vld [vmem:[#allocation35_spill] sm:$0xff] }
 0x17b   : > { %v2025_v24 = vadd.f32 %v2021_v60, %v2009_v44  ;;  %v2356_v13 = vmul.f32 %v3436_v21, %v5135_v48  ;;  %v2240_v12 = vadd.f32 %v2236_v58, %v2224_v25  ;;  %v2066_v60 = vmul.f32 %v2062_v41, %v6103_v59  ;;  %v6104_v44 = vld [vmem:[#allocation23_spill] sm:$0xff]  ;;  %v5177_v25 = vld [vmem:[%s3392_s6 + $0x188] sm:$0xff] }
 0x17c   : > { %v2128_v17 = vadd.f32 %v2124_v30, %v6102_v3  ;;  %2949 = vst [vmem:[%s3653_s24 + $0x150] sm:$0xff] %v2069_v34  ;;  %v2125_v53 = vmul.f32 %v3470_v35, %v5045_v43  ;;  %v2253_v51 = vmul.f32 %v2062_v41, %v6104_v44  ;;  %v2169_v30 = vmul.f32 %v3542_v8, %v5135_v48 }
 0x17d   : > { %v2038_v9 = vadd.f32 %v2034_v5, %v2025_v24  ;;  %v6105_v3 = vrot.slane %v5135_v48, 7  ;;  %v6106_v46 = vrot.slane %v5145_v14, 7  ;;  %v5180_v24 = vld [vmem:[%s3392_s6 + $0x198] sm:$0xff]  ;;  %v2241_v43 = vadd.f32 %v2237_v33, %v2225_v47 }
 0x17e   : > { %v2144_v54 = vadd.f32 %v2140_v40, %v2128_v17  ;;  %v6107_v5 = vld [vmem:[#allocation32_spill] sm:$0xff]  ;;  %v6108_v40 = vrot.slane %v5145_v14, 1  ;;  %v6109_v17 = vrot.slane %v5135_v48, 1  ;;  %v2178_v47 = vrot.slane %v5177_v25, 7 }
 0x17f   : > { %v2183_v34 = vsel %vm551_vm2, %v6106_v46, %v6105_v3  ;;  %v2054_v58 = vadd.f32 %v2050_v57, %v2038_v9  ;;  %v2360_v46 = vadd.f32 %v2356_v13, %v3446_v26  ;;  %v6111_v3 = vld [vmem:[#allocation43_spill] sm:$0xff]  ;;  %v2180_v33 = vrot.slane %v5180_v24, 7 }
 0x180   : > { %v2185_v42 = vmul.f32 %v2183_v34, %v6107_v5  ;;  %v2197_v44 = vsel %vm568_vm3, %v6109_v17, %v6108_v40  ;;  %v2160_v59 = vadd.f32 %v2156_v20, %v2144_v54  ;;  %v2129_v19 = vadd.f32 %v2125_v53, %v6111_v3  ;;  %v6112_v57 = vld [vmem:[#allocation19_spill] sm:$0xff]  ;;  %v6113_v17 = vld [vmem:[#allocation21_spill] sm:$0xff] }
 0x181   : > { %v2201_v7 = vmul.f32 %v2197_v44, %v6110_v18  ;;  %v2070_v45 = vadd.f32 %v2066_v60, %v2054_v58  ;;  %v2372_v9 = vmul.f32 %v2183_v34, %v6112_v57  ;;  %v2170_v36 = vmul.f32 %v3571_v39, %v5177_v25 }
 0x182   : > { %v2173_v5 = vadd.f32 %v2169_v30, %v2160_v59  ;;  %v2145_v2 = vadd.f32 %v2141_v15, %v2129_v19  ;;  %v2194_v20 = vrot.slane %v5177_v25, 1  ;;  %v2184_v54 = vsel %vm551_vm2, %v2180_v33, %v2178_v47 }
 0x183   : > { %2950 = vst [vmem:[%s3653_s24 + $0x158] sm:$0xff] %v2070_v45  ;;  %v2196_v13 = vrot.slane %v5180_v24, 1  ;;  %v2357_v60 = vmul.f32 %v3452_v28, %v5177_v25  ;;  %v2126_v53 = vmul.f32 %v3455_v29, %v5013_v50  ;;  %v2388_v15 = vmul.f32 %v2197_v44, %v5911_v56 }
 0x184   : > { %v2189_v58 = vadd.f32 %v2185_v42, %v2173_v5  ;;  %v2161_v19 = vadd.f32 %v5120_v31, %v2145_v2  ;;  %v2186_v59 = vmul.f32 %v2184_v54, %v3538_v0  ;;  %v2376_v45 = vadd.f32 %v2372_v9, %v2360_v46 }
 0x185   : > { %v2198_v30 = vsel %vm568_vm3, %v2194_v20, %v2196_v13  ;;  %v2361_v40 = vadd.f32 %v2357_v60, %v3449_v27  ;;  %v2373_v3 = vmul.f32 %v2184_v54, %v6113_v17  ;;  %v2143_v57 = vmul.f32 %v2044_v61, %v5957_v16 }
 0x186   : > { %v2205_v18 = vadd.f32 %v2201_v7, %v2189_v58  ;;  %v2174_v50 = vadd.f32 %v2170_v36, %v2161_v19  ;;  %v2202_v42 = vmul.f32 %v2198_v30, %v3512_v52  ;;  %v5216_v5 = vadd.f32 %v5140_v4, %v2240_v12 }
 0x187   : > { %v2159_v31 = vmul.f32 %v2062_v41, %v5852_v63  ;;  %v5219_v2 = vadd.f32 %v2253_v51, %v2241_v43  ;;  %v2130_v46 = vadd.f32 %v2126_v53, %v5084_v55  ;;  %v2278_v9 = vmul.f32 %v2183_v34, %v3476_v37 }
 0x188   : > { %2951 = vst [vmem:[%s3653_s24 + $0x160] sm:$0xff] %v2205_v18  ;;  %v2190_v60 = vadd.f32 %v2186_v59, %v2174_v50  ;;  %v2377_v17 = vadd.f32 %v2373_v3, %v2361_v40  ;;  %v2389_v7 = vmul.f32 %v2198_v30, %v5893_v62  ;;  %v2294_v36 = vmul.f32 %v2197_v44, %v5863_v32  ;;  %v6121_v3 = vld [vmem:[#allocation17_spill] sm:$0xff] }
 0x189   : > { %6114 = vst [vmem:[#allocation41_spill] sm:$0xff] %v5219_v2  ;;  %v5226_v61 = vadd.f32 %v2388_v15, %v2376_v45  ;;  %v2146_v4 = vadd.f32 %v5128_v6, %v2130_v46  ;;  %v2171_v41 = vmul.f32 %v3542_v8, %v5145_v14  ;;  %v2279_v55 = vmul.f32 %v2184_v54, %v5868_v23 }
 0x18a   : > { %v2206_v51 = vadd.f32 %v2202_v42, %v2190_v60  ;;  %v6116_v18 = vrot.slane %v5145_v14, 7  ;;  %v6117_v12 = vrot.slane %v5135_v48, 7  ;;  %v2358_v44 = vmul.f32 %v3436_v21, %v5145_v14  ;;  %v6122_v42 = vld [vmem:[#allocation30_spill] sm:$0xff]  ;;  %v6123_v60 = vld [vmem:[#allocation25_spill] sm:$0xff] }
 0x18b   : > { %6115 = vst [vmem:[#allocation26_spill] sm:$0xff] %v5226_v61  ;;  %v2162_v43 = vadd.f32 %v5131_v49, %v2146_v4  ;;  %v6118_v53 = vrot.slane %v5135_v48, 1  ;;  %v6119_v58 = vrot.slane %v5145_v14, 1  ;;  %v2127_v15 = vmul.f32 %v3470_v35, %v5048_v38  ;;  %v5267_v4 = vld [vmem:[%s3392_s6 + $0x1a0] sm:$0xff] }
 0x18c   : > { %v2181_v34 = vsel %vm551_vm2, %v6117_v12, %v6116_v18  ;;  %2952 = vst [vmem:[%s3653_s24 + $0x168] sm:$0xff] %v2206_v51  ;;  %v5252_v19 = vmul.f32 %v2198_v30, %v5869_v10  ;;  %v5254_v59 = vadd.f32 %v2389_v7, %v2377_v17  ;;  %v2359_v45 = vmul.f32 %v3452_v28, %v5180_v24  ;;  %v6124_v17 = vld [vmem:[#allocation13_spill] sm:$0xff]  ;;  %v6125_v51 = vld [vmem:[#allocation22_spill] sm:$0xff]  ;;  %v5277_v12 = vld [vmem:[%s3392_s6 + $0x1b0] sm:$0xff] }
 0x18d   : > { %v2187_v6 = vmul.f32 %v2181_v34, %v5894_v11  ;;  %v2199_v54 = vsel %vm568_vm3, %v6119_v58, %v6118_v53  ;;  %v2175_v40 = vadd.f32 %v2171_v41, %v2162_v43  ;;  %v5260_v50 = vmul.f32 %v2181_v34, %v6121_v3 }
 0x18e   : > { %6120 = vst [vmem:[#allocation34_spill] sm:$0xff] %v5254_v59  ;;  %v2203_v49 = vmul.f32 %v2199_v54, %v5874_v22  ;;  %v5263_v46 = vmul.f32 %v2199_v54, %v6122_v42  ;;  %v2131_v38 = vadd.f32 %v2127_v15, %v6123_v60  ;;  %v2362_v30 = vadd.f32 %v2358_v44, %v3446_v26  ;;  %v6126_v44 = vld [vmem:[#allocation28_spill] sm:$0xff] }
 0x18f   : > { %v2374_v7 = vmul.f32 %v2181_v34, %v6124_v17  ;;  %v5272_v18 = vmul.f32 %v2199_v54, %v6125_v51  ;;  %v2182_v41 = vsel %vm551_vm2, %v2178_v47, %v2180_v33  ;;  %v2191_v43 = vadd.f32 %v2187_v6, %v2175_v40  ;;  %v6127_v6 = vld [vmem:[#allocation14_spill] sm:$0xff] }
 0x190   : > { %v2147_v53 = vadd.f32 %v2143_v57, %v2131_v38  ;;  %v2172_v58 = vmul.f32 %v3571_v39, %v5180_v24  ;;  %v2200_v15 = vsel %vm568_vm3, %v2196_v13, %v2194_v20  ;;  %v2188_v60 = vmul.f32 %v2182_v41, %v6126_v44  ;;  %v6128_v38 = vld [vmem:[#allocation39_spill] sm:$0xff]  ;;  %v6136_v44 = vld [vmem:[#allocation29_spill] sm:$0xff] }
 0x191   : > { %v2363_v34 = vadd.f32 %v2359_v45, %v3449_v27  ;;  %v2262_v54 = vmul.f32 %v3455_v29, %v5135_v48  ;;  %v2207_v33 = vadd.f32 %v2203_v49, %v2191_v43  ;;  %v2375_v57 = vmul.f32 %v2182_v41, %v6127_v6  ;;  %v6129_v49 = vld [vmem:[#allocation35_spill] sm:$0xff] }
 0x192   : > { %v2163_v59 = vadd.f32 %v2159_v31, %v2147_v53  ;;  %v2494_v45 = vmul.f32 %v3436_v21, %v5267_v4  ;;  %v2378_v48 = vadd.f32 %v2374_v7, %v2362_v30  ;;  %v2204_v31 = vmul.f32 %v2200_v15, %v6129_v49  ;;  %v6130_v53 = vld [vmem:[#allocation23_spill] sm:$0xff]  ;;  %v5309_v30 = vld [vmem:[%s3392_s6 + $0x1a8] sm:$0xff] }
 0x193   : > { %v2266_v61 = vadd.f32 %v2262_v54, %v6128_v38  ;;  %2953 = vst [vmem:[%s3653_s24 + $0x170] sm:$0xff] %v2207_v33  ;;  %v2263_v43 = vmul.f32 %v3470_v35, %v5177_v25  ;;  %v2391_v6 = vmul.f32 %v2200_v15, %v6130_v53  ;;  %v2307_v54 = vmul.f32 %v3542_v8, %v5267_v4 }
 0x194   : > { %v2176_v47 = vadd.f32 %v2172_v58, %v2163_v59  ;;  %v6131_v38 = vrot.slane %v5267_v4, 7  ;;  %v6132_v20 = vrot.slane %v5277_v12, 7  ;;  %v5312_v59 = vld [vmem:[%s3392_s6 + $0x1b8] sm:$0xff]  ;;  %v2379_v25 = vadd.f32 %v2375_v57, %v2363_v34 }
 0x195   : > { %v2282_v40 = vadd.f32 %v2278_v9, %v2266_v61  ;;  %v6133_v58 = vld [vmem:[#allocation32_spill] sm:$0xff]  ;;  %v6134_v9 = vrot.slane %v5277_v12, 1  ;;  %v6135_v61 = vrot.slane %v5267_v4, 1  ;;  %v2316_v34 = vrot.slane %v5309_v30, 7 }
 0x196   : > { %v2321_v33 = vsel %vm551_vm2, %v6132_v20, %v6131_v38  ;;  %v2192_v7 = vadd.f32 %v2188_v60, %v2176_v47  ;;  %v2498_v20 = vadd.f32 %v2494_v45, %v3446_v26  ;;  %v6137_v38 = vld [vmem:[#allocation24_spill] sm:$0xff]  ;;  %v6138_v60 = vld [vmem:[#allocation19_spill] sm:$0xff]  ;;  %v2318_v57 = vrot.slane %v5312_v59, 7 }
 0x197   : > { %v2323_v13 = vmul.f32 %v2321_v33, %v6133_v58  ;;  %v2335_v53 = vsel %vm568_vm3, %v6135_v61, %v6134_v9  ;;  %v2298_v49 = vadd.f32 %v2294_v36, %v2282_v40  ;;  %v2267_v17 = vadd.f32 %v2263_v43, %v6137_v38  ;;  %v6139_v61 = vld [vmem:[#allocation21_spill] sm:$0xff] }
 0x198   : > { %v2339_v51 = vmul.f32 %v2335_v53, %v6136_v44  ;;  %v2208_v42 = vadd.f32 %v2204_v31, %v2192_v7  ;;  %v2510_v47 = vmul.f32 %v2321_v33, %v6138_v60  ;;  %v2308_v3 = vmul.f32 %v3571_v39, %v5309_v30 }
 0x199   : > { %v2311_v58 = vadd.f32 %v2307_v54, %v2298_v49  ;;  %v2283_v2 = vadd.f32 %v2279_v55, %v2267_v17  ;;  %v2332_v36 = vrot.slane %v5309_v30, 1  ;;  %v2322_v40 = vsel %vm551_vm2, %v2318_v57, %v2316_v34 }
 0x19a   : > { %2954 = vst [vmem:[%s3653_s24 + $0x178] sm:$0xff] %v2208_v42  ;;  %v2334_v45 = vrot.slane %v5312_v59, 1  ;;  %v2495_v31 = vmul.f32 %v3452_v28, %v5309_v30  ;;  %v2264_v43 = vmul.f32 %v3455_v29, %v5145_v14  ;;  %v2526_v55 = vmul.f32 %v2335_v53, %v5911_v56 }
 0x19b   : > { %v2327_v7 = vadd.f32 %v2323_v13, %v2311_v58  ;;  %v2299_v17 = vadd.f32 %v5252_v19, %v2283_v2  ;;  %v2324_v49 = vmul.f32 %v2322_v40, %v3538_v0  ;;  %v2514_v42 = vadd.f32 %v2510_v47, %v2498_v20 }
 0x19c   : > { %v2336_v54 = vsel %vm568_vm3, %v2332_v36, %v2334_v45  ;;  %v2499_v9 = vadd.f32 %v2495_v31, %v3449_v27  ;;  %v2511_v38 = vmul.f32 %v2322_v40, %v6139_v61  ;;  %v2281_v60 = vmul.f32 %v2182_v41, %v5957_v16 }
 0x19d   : > { %v2343_v44 = vadd.f32 %v2339_v51, %v2327_v7  ;;  %v2312_v14 = vadd.f32 %v2308_v3, %v2299_v17  ;;  %v2340_v13 = vmul.f32 %v2336_v54, %v3512_v52  ;;  %v5348_v58 = vadd.f32 %v5272_v18, %v2378_v48 }
 0x19e   : > { %v2297_v2 = vmul.f32 %v2200_v15, %v5852_v63  ;;  %v5351_v19 = vadd.f32 %v2391_v6, %v2379_v25  ;;  %v2268_v20 = vadd.f32 %v2264_v43, %v5216_v5  ;;  %v2416_v47 = vmul.f32 %v2321_v33, %v3476_v37 }
 0x19f   : > { %2955 = vst [vmem:[%s3653_s24 + $0x180] sm:$0xff] %v2343_v44  ;;  %v2328_v31 = vadd.f32 %v2324_v49, %v2312_v14  ;;  %v2515_v56 = vadd.f32 %v2511_v38, %v2499_v9  ;;  %v2527_v51 = vmul.f32 %v2336_v54, %v5893_v62  ;;  %v2432_v3 = vmul.f32 %v2335_v53, %v5863_v32  ;;  %v6147_v38 = vld [vmem:[#allocation17_spill] sm:$0xff] }
 0x1a0   : > { %6140 = vst [vmem:[#allocation36_spill] sm:$0xff] %v5351_v19  ;;  %v5358_v41 = vadd.f32 %v2526_v55, %v2514_v42  ;;  %v2284_v18 = vadd.f32 %v5260_v50, %v2268_v20  ;;  %v2309_v15 = vmul.f32 %v3542_v8, %v5277_v12  ;;  %v2417_v5 = vmul.f32 %v2322_v40, %v5868_v23 }
 0x1a1   : > { %v2344_v6 = vadd.f32 %v2340_v13, %v2328_v31  ;;  %v6142_v44 = vrot.slane %v5277_v12, 7  ;;  %v6143_v48 = vrot.slane %v5267_v4, 7  ;;  %v2496_v53 = vmul.f32 %v3436_v21, %v5277_v12  ;;  %v6148_v13 = vld [vmem:[#allocation41_spill] sm:$0xff]  ;;  %v6149_v31 = vld [vmem:[#allocation30_spill] sm:$0xff] }
 0x1a2   : > { %6141 = vst [vmem:[#allocation42_spill] sm:$0xff] %v5358_v41  ;;  %v2300_v25 = vadd.f32 %v5263_v46, %v2284_v18  ;;  %v6144_v43 = vrot.slane %v5267_v4, 1  ;;  %v6145_v7 = vrot.slane %v5277_v12, 1  ;;  %v2265_v55 = vmul.f32 %v3470_v35, %v5180_v24 }
 0x1a3   : > { %v2319_v33 = vsel %vm551_vm2, %v6143_v48, %v6142_v44  ;;  %2956 = vst [vmem:[%s3653_s24 + $0x188] sm:$0xff] %v2344_v6  ;;  %v5384_v17 = vmul.f32 %v2336_v54, %v5869_v10  ;;  %v5386_v49 = vadd.f32 %v2527_v51, %v2515_v56  ;;  %v2497_v42 = vmul.f32 %v3452_v28, %v5312_v59  ;;  %v6150_v54 = vld [vmem:[#allocation13_spill] sm:$0xff]  ;;  %v6151_v6 = vld [vmem:[#allocation22_spill] sm:$0xff] }
 0x1a4   : > { %v2325_v50 = vmul.f32 %v2319_v33, %v5894_v11  ;;  %v2337_v40 = vsel %vm568_vm3, %v6145_v7, %v6144_v43  ;;  %v2313_v9 = vadd.f32 %v2309_v15, %v2300_v25  ;;  %v5392_v14 = vmul.f32 %v2319_v33, %v6147_v38  ;;  %v5404_v48 = vld [vmem:[%s3392_s6 + $0x1c0] sm:$0xff]  ;;  %v5407_v15 = vld [vmem:[%s3392_s6 + $0x1d0] sm:$0xff] }
 0x1a5   : > { %6146 = vst [vmem:[#allocation38_spill] sm:$0xff] %v5386_v49  ;;  %v2341_v46 = vmul.f32 %v2337_v40, %v5874_v22  ;;  %v2269_v20 = vadd.f32 %v2265_v55, %v6148_v13  ;;  %v2320_v24 = vsel %vm551_vm2, %v2316_v34, %v2318_v57  ;;  %v5398_v18 = vmul.f32 %v2337_v40, %v6149_v31  ;;  %v6152_v57 = vld [vmem:[#allocation28_spill] sm:$0xff] }
 0x1a6   : > { %v2500_v56 = vadd.f32 %v2496_v53, %v3446_v26  ;;  %v2512_v51 = vmul.f32 %v2319_v33, %v6150_v54  ;;  %v2528_v44 = vmul.f32 %v2337_v40, %v6151_v6  ;;  %v2329_v25 = vadd.f32 %v2325_v50, %v2313_v9  ;;  %v6153_v33 = vld [vmem:[#allocation14_spill] sm:$0xff] }
 0x1a7   : > { %v2285_v43 = vadd.f32 %v2281_v60, %v2269_v20  ;;  %v2310_v7 = vmul.f32 %v3571_v39, %v5312_v59  ;;  %v2338_v34 = vsel %vm568_vm3, %v2334_v45, %v2332_v36  ;;  %v2326_v55 = vmul.f32 %v2320_v24, %v6152_v57  ;;  %v6154_v20 = vld [vmem:[#allocation26_spill] sm:$0xff]  ;;  %v6155_v57 = vld [vmem:[#allocation35_spill] sm:$0xff] }
 0x1a8   : > { %v2501_v53 = vadd.f32 %v2497_v42, %v3449_v27  ;;  %v2513_v13 = vmul.f32 %v2320_v24, %v6153_v33  ;;  %v2400_v40 = vmul.f32 %v3455_v29, %v5267_v4  ;;  %v2345_v31 = vadd.f32 %v2341_v46, %v2329_v25 }
 0x1a9   : > { %v2301_v49 = vadd.f32 %v2297_v2, %v2285_v43  ;;  %v2453_v60 = vrot.slane %v5404_v48, 7  ;;  %v2455_v50 = vrot.slane %v5407_v15, 7  ;;  %v2516_v9 = vadd.f32 %v2512_v51, %v2500_v56  ;;  %v6157_v56 = vld [vmem:[#allocation23_spill] sm:$0xff] }
 0x1aa   : > { %v2404_v36 = vadd.f32 %v2400_v40, %v6154_v20  ;;  %v5787_v45 = vrot.slane %v5404_v48, 1  ;;  %v2471_v42 = vrot.slane %v5407_v15, 1  ;;  %2957 = vst [vmem:[%s3653_s24 + $0x190] sm:$0xff] %v2345_v31  ;;  %v2342_v33 = vmul.f32 %v2338_v34, %v6155_v57  ;;  %v5436_v40 = vld [vmem:[%s3392_s6 + $0x1c8] sm:$0xff] }
 0x1ab   : > { %v2314_v41 = vadd.f32 %v2310_v7, %v2301_v49  ;;  %v2632_v4 = vmul.f32 %v3436_v21, %v5404_v48  ;;  %v2401_v2 = vmul.f32 %v3470_v35, %v5309_v30  ;;  %v5430_v46 = vmul.f32 %v2320_v24, %v5957_v16  ;;  %6158 = vst [vmem:[#allocation37_spill] sm:$0xff] %v5436_v40  ;;  %v5439_v49 = vld [vmem:[%s3392_s6 + $0x1d8] sm:$0xff]  ;;  %v6160_v16 = vld [vmem:[#allocation29_spill] sm:$0xff]  ;;  %v6161_v57 = vld [vmem:[#allocation34_spill] sm:$0xff] }
 0x1ac   : > { %v2529_v51 = vmul.f32 %v2338_v34, %v6157_v56  ;;  %v2420_v25 = vadd.f32 %v2416_v47, %v2404_v36  ;;  %v2445_v43 = vmul.f32 %v3542_v8, %v5404_v48  ;;  %v2517_v7 = vadd.f32 %v2513_v13, %v2501_v53  ;;  %v6159_v47 = vld [vmem:[#allocation32_spill] sm:$0xff] }
 0x1ad   : > { %6156 = vst [vmem:[#allocation40_spill] sm:$0xff] %v5430_v46  ;;  %v2330_v31 = vadd.f32 %v2326_v55, %v2314_v41  ;;  %v2459_v20 = vsel %vm551_vm2, %v2455_v50, %v2453_v60  ;;  %v2473_v30 = vsel %vm568_vm3, %v5787_v45, %v2471_v42  ;;  %v2405_v46 = vadd.f32 %v2401_v2, %v6161_v57 }
 0x1ae   : > { %v2436_v24 = vadd.f32 %v2432_v3, %v2420_v25  ;;  %v2461_v36 = vmul.f32 %v2459_v20, %v6159_v47  ;;  %v2477_v56 = vmul.f32 %v2473_v30, %v6160_v16  ;;  %v2636_v41 = vadd.f32 %v2632_v4, %v3446_v26 }
 0x1af   : > { %v2346_v6 = vadd.f32 %v2342_v33, %v2330_v31  ;;  %v2454_v55 = vrot.slane %v5436_v40, 7  ;;  %v2456_v53 = vrot.slane %v5439_v49, 7  ;;  %v2421_v38 = vadd.f32 %v2417_v5, %v2405_v46 }
 0x1b0   : > { %v2449_v13 = vadd.f32 %v2445_v43, %v2436_v24  ;;  %v2446_v19 = vmul.f32 %v3571_v39, %v5436_v40  ;;  %v2470_v3 = vrot.slane %v5436_v40, 1  ;;  %v2472_v57 = vrot.slane %v5439_v49, 1  ;;  %v6162_v43 = vld [vmem:[#allocation19_spill] sm:$0xff] }
 0x1b1   : > { %2958 = vst [vmem:[%s3653_s24 + $0x198] sm:$0xff] %v2346_v6  ;;  %v2460_v25 = vsel %vm551_vm2, %v2456_v53, %v2454_v55  ;;  %v2633_v33 = vmul.f32 %v3452_v28, %v5436_v40  ;;  %v2402_v4 = vmul.f32 %v3455_v29, %v5277_v12  ;;  %v2648_v5 = vmul.f32 %v2459_v20, %v6162_v43 }
 0x1b2   : > { %v2465_v2 = vadd.f32 %v2461_v36, %v2449_v13  ;;  %v2437_v46 = vadd.f32 %v5384_v17, %v2421_v38  ;;  %v2462_v31 = vmul.f32 %v2460_v25, %v3538_v0  ;;  %v2435_v6 = vmul.f32 %v2338_v34, %v5852_v63  ;;  %v6163_v38 = vld [vmem:[#allocation15_spill] sm:$0xff] }
 0x1b3   : > { %v2474_v24 = vsel %vm568_vm3, %v2470_v3, %v2472_v57  ;;  %v2637_v45 = vadd.f32 %v2633_v33, %v3449_v27  ;;  %v2649_v16 = vmul.f32 %v2460_v25, %v6139_v61  ;;  %v5472_v47 = vadd.f32 %v2528_v44, %v2516_v9 }
 0x1b4   : > { %v2481_v12 = vadd.f32 %v2477_v56, %v2465_v2  ;;  %v2450_v36 = vadd.f32 %v2446_v19, %v2437_v46  ;;  %v2478_v13 = vmul.f32 %v2474_v24, %v3512_v52  ;;  %v5475_v43 = vadd.f32 %v2529_v51, %v2517_v7 }
 0x1b5   : > { %v2554_v17 = vmul.f32 %v2459_v20, %v3476_v37  ;;  %v2664_v0 = vmul.f32 %v2473_v30, %v6163_v38  ;;  %v2406_v34 = vadd.f32 %v2402_v4, %v5348_v58  ;;  %v2652_v63 = vadd.f32 %v2648_v5, %v2636_v41  ;;  %v5512_v4 = vld [vmem:[%s3392_s6 + $0x1e0] sm:$0xff] }
 0x1b6   : > { %2959 = vst [vmem:[%s3653_s24 + $0x1a0] sm:$0xff] %v2481_v12  ;;  %v2466_v40 = vadd.f32 %v2462_v31, %v2450_v36  ;;  %v2457_v61 = vsel %vm551_vm2, %v2453_v60, %v2455_v50  ;;  %v2634_v19 = vmul.f32 %v3436_v21, %v5407_v15  ;;  %v2570_v44 = vmul.f32 %v2473_v30, %v5863_v32  ;;  %v6171_v36 = vld [vmem:[#allocation14_spill] sm:$0xff] }
 0x1b7   : > { %v2653_v9 = vadd.f32 %v2649_v16, %v2637_v45  ;;  %v2422_v56 = vadd.f32 %v5392_v14, %v2406_v34  ;;  %v2447_v51 = vmul.f32 %v3542_v8, %v5407_v15  ;;  %v2665_v58 = vmul.f32 %v2474_v24, %v5893_v62 }
 0x1b8   : > { %v2482_v7 = vadd.f32 %v2478_v13, %v2466_v40  ;;  %v2463_v20 = vmul.f32 %v2457_v61, %v5894_v11  ;;  %v6164_v41 = vrot.slane %v5404_v48, 1  ;;  %v2638_v16 = vadd.f32 %v2634_v19, %v3446_v26  ;;  %v6166_v26 = vld [vmem:[#allocation36_spill] sm:$0xff] }
 0x1b9   : > { %v2438_v21 = vadd.f32 %v5398_v18, %v2422_v56  ;;  %v2650_v14 = vmul.f32 %v2457_v61, %v6150_v54  ;;  %v2403_v50 = vmul.f32 %v3470_v35, %v5312_v59  ;;  %v5500_v45 = vadd.f32 %v2664_v0, %v2652_v63  ;;  %v6168_v63 = vld [vmem:[#allocation17_spill] sm:$0xff] }
 0x1ba   : > { %v2475_v60 = vsel %vm568_vm3, %v2471_v42, %v6164_v41  ;;  %2960 = vst [vmem:[%s3653_s24 + $0x1a8] sm:$0xff] %v2482_v7  ;;  %v2555_v62 = vmul.f32 %v2460_v25, %v5868_v23  ;;  %v2571_v40 = vmul.f32 %v2474_v24, %v5869_v10  ;;  %v2635_v42 = vmul.f32 %v3452_v28, %v5439_v49  ;;  %v6169_v25 = vld [vmem:[#allocation22_spill] sm:$0xff]  ;;  %v5521_v28 = vld [vmem:[%s3392_s6 + $0x1f0] sm:$0xff]  ;;  %v6170_v24 = vld [vmem:[#allocation40_spill] sm:$0xff] }
 0x1bb   : > { %6165 = vst [vmem:[#allocation27_spill] sm:$0xff] %v5500_v45  ;;  %v2451_v30 = vadd.f32 %v2447_v51, %v2438_v21  ;;  %v2479_v18 = vmul.f32 %v2475_v60, %v5874_v22  ;;  %v2407_v33 = vadd.f32 %v2403_v50, %v6166_v26  ;;  %v2458_v54 = vsel %vm551_vm2, %v2454_v55, %v2456_v53  ;;  %v6173_v7 = vld [vmem:[#allocation42_spill] sm:$0xff]  ;;  %v6175_v41 = vld [vmem:[#allocation35_spill] sm:$0xff] }
 0x1bc   : > { %v5514_v0 = vadd.f32 %v2665_v58, %v2653_v9  ;;  %v2556_v59 = vmul.f32 %v2457_v61, %v6168_v63  ;;  %v2666_v2 = vmul.f32 %v2475_v60, %v6169_v25  ;;  %v2448_v5 = vmul.f32 %v3571_v39, %v5439_v49  ;;  %v6172_v9 = vld [vmem:[#allocation28_spill] sm:$0xff]  ;;  %v5544_v50 = vld [vmem:[%s3392_s6 + $0x1e8] sm:$0xff] }
 0x1bd   : > { %v2467_v46 = vadd.f32 %v2463_v20, %v2451_v30  ;;  %v2654_v31 = vadd.f32 %v2650_v14, %v2638_v16  ;;  %v2423_v12 = vadd.f32 %v6170_v24, %v2407_v33  ;;  %v2476_v55 = vsel %vm568_vm3, %v2472_v57, %v2470_v3  ;;  %v6174_v57 = vld [vmem:[#allocation37_spill] sm:$0xff]  ;;  %v6176_v16 = vld [vmem:[#allocation23_spill] sm:$0xff] }
 0x1be   : > { %6167 = vst [vmem:[#allocation16_spill] sm:$0xff] %v5514_v0  ;;  %v2639_v53 = vadd.f32 %v2635_v42, %v3449_v27  ;;  %v2651_v13 = vmul.f32 %v2458_v54, %v6171_v36  ;;  %v2538_v38 = vmul.f32 %v3455_v29, %v5404_v48  ;;  %v2591_v34 = vrot.slane %v5512_v4, 7  ;;  %v5547_v42 = vld [vmem:[%s3392_s6 + $0x1f8] sm:$0xff] }
 0x1bf   : > { %v2483_v61 = vadd.f32 %v2479_v18, %v2467_v46  ;;  %v2439_v19 = vadd.f32 %v2435_v6, %v2423_v12  ;;  %v2464_v56 = vmul.f32 %v2458_v54, %v6172_v9  ;;  %v2593_v51 = vrot.slane %v5521_v28, 7  ;;  %v6178_v12 = vld [vmem:[#allocation38_spill] sm:$0xff] }
 0x1c0   : > { %v2542_v58 = vadd.f32 %v2538_v38, %v6173_v7  ;;  %v2607_v3 = vrot.slane %v5512_v4, 1  ;;  %v2609_v27 = vrot.slane %v5521_v28, 1  ;;  %v2539_v20 = vmul.f32 %v3470_v35, %v6174_v57 }
 0x1c1   : > { %2961 = vst [vmem:[%s3653_s24 + $0x1b0] sm:$0xff] %v2483_v61  ;;  %v2452_v48 = vadd.f32 %v2448_v5, %v2439_v19  ;;  %v2480_v21 = vmul.f32 %v2476_v55, %v6175_v41  ;;  %v2667_v14 = vmul.f32 %v2476_v55, %v6176_v16  ;;  %v2583_v6 = vmul.f32 %v3542_v8, %v5512_v4  ;;  %v6177_v5 = vld [vmem:[#allocation32_spill] sm:$0xff]  ;;  %v6180_v16 = vld [vmem:[#allocation29_spill] sm:$0xff] }
 0x1c2   : > { %v2655_v30 = vadd.f32 %v2651_v13, %v2639_v53  ;;  %v2558_v18 = vadd.f32 %v2554_v17, %v2542_v58  ;;  %v2597_v26 = vsel %vm551_vm2, %v2593_v51, %v2591_v34  ;;  %v2584_v33 = vmul.f32 %v3571_v39, %v5544_v50  ;;  %v6179_v58 = vld [vmem:[#allocation30_spill] sm:$0xff] }
 0x1c3   : > { %v2468_v25 = vadd.f32 %v2464_v56, %v2452_v48  ;;  %v2599_v46 = vmul.f32 %v2597_v26, %v6177_v5  ;;  %v2611_v24 = vsel %vm568_vm3, %v2607_v3, %v2609_v27  ;;  %v2543_v36 = vadd.f32 %v2539_v20, %v6178_v12  ;;  %v6181_v20 = vld [vmem:[#allocation18_spill] sm:$0xff]  ;;  %v6182_v12 = vld [vmem:[#allocation31_spill] sm:$0xff] }
 0x1c4   : > { %v2574_v38 = vadd.f32 %v2570_v44, %v2558_v18  ;;  %v2592_v61 = vrot.slane %v5544_v50, 7  ;;  %v2594_v17 = vrot.slane %v5547_v42, 7  ;;  %v2608_v53 = vrot.slane %v5544_v50, 1 }
 0x1c5   : > { %v2484_v13 = vadd.f32 %v2480_v21, %v2468_v25  ;;  %v2559_v19 = vadd.f32 %v2555_v62, %v2543_v36  ;;  %v2610_v7 = vrot.slane %v5547_v42, 1  ;;  %v2540_v56 = vmul.f32 %v3455_v29, %v5407_v15  ;;  %v6183_v62 = vld [vmem:[#allocation33_spill] sm:$0xff] }
 0x1c6   : > { %v2572_v57 = vmul.f32 %v2475_v60, %v6179_v58  ;;  %v2587_v48 = vadd.f32 %v2583_v6, %v2574_v38  ;;  %v2615_v5 = vmul.f32 %v2611_v24, %v6180_v16  ;;  %v2598_v44 = vsel %vm551_vm2, %v2594_v17, %v2592_v61 }
 0x1c7   : > { %2962 = vst [vmem:[%s3653_s24 + $0x1b8] sm:$0xff] %v2484_v13  ;;  %v2557_v18 = vmul.f32 %v2458_v54, %v6181_v20  ;;  %v2573_v0 = vmul.f32 %v2476_v55, %v6182_v12  ;;  %v2575_v21 = vadd.f32 %v2571_v40, %v2559_v19  ;;  %v2600_v25 = vmul.f32 %v2598_v44, %v6183_v62 }
 0x1c8   : > { %v2670_v36 = vadd.f32 %v2666_v2, %v2654_v31  ;;  %v2603_v41 = vadd.f32 %v2599_v46, %v2587_v48  ;;  %v2612_v15 = vsel %vm568_vm3, %v2608_v53, %v2610_v7  ;;  %v2544_v60 = vadd.f32 %v2540_v56, %v5472_v47  ;;  %v6186_v56 = vld [vmem:[#allocation16_spill] sm:$0xff] }
 0x1c9   : > { %v2671_v6 = vadd.f32 %v2667_v14, %v2655_v30  ;;  %v2692_v38 = vmul.f32 %v2597_v26, %v3476_v37  ;;  %v2588_v16 = vadd.f32 %v2584_v33, %v2575_v21  ;;  %v2616_v13 = vmul.f32 %v2612_v15, %v3512_v52  ;;  %v6187_v21 = vld [vmem:[#allocation32_spill] sm:$0xff] }
 0x1ca   : > { %v2619_v54 = vadd.f32 %v2615_v5, %v2603_v41  ;;  %v2560_v45 = vadd.f32 %v2556_v59, %v2544_v60  ;;  %v2585_v40 = vmul.f32 %v3542_v8, %v5521_v28  ;;  %v2595_v2 = vsel %vm551_vm2, %v2591_v34, %v2593_v51 }
 0x1cb   : > { %v2708_v31 = vmul.f32 %v2611_v24, %v5863_v32  ;;  %v2604_v55 = vadd.f32 %v2600_v25, %v2588_v16  ;;  %v2613_v47 = vsel %vm568_vm3, %v2609_v27, %v2607_v3  ;;  %v2541_v37 = vmul.f32 %v3470_v35, %v5439_v49  ;;  %v6184_v24 = vld [vmem:[#allocation27_spill] sm:$0xff]  ;;  %v6188_v25 = vld [vmem:[#allocation12_spill] sm:$0xff] }
 0x1cc   : > { %2963 = vst [vmem:[%s3653_s24 + $0x1c0] sm:$0xff] %v2619_v54  ;;  %v2693_v41 = vmul.f32 %v2598_v44, %v5868_v23  ;;  %v2709_v59 = vmul.f32 %v2612_v15, %v5869_v10  ;;  %v2576_v14 = vadd.f32 %v2572_v57, %v2560_v45  ;;  %v2601_v30 = vmul.f32 %v2595_v2, %v5894_v11 }
 0x1cd   : > { %v2620_v26 = vadd.f32 %v2616_v13, %v2604_v55  ;;  %v2694_v34 = vmul.f32 %v2595_v2, %v6168_v63  ;;  %v2545_v32 = vadd.f32 %v2541_v37, %v5475_v43  ;;  %v2596_v51 = vsel %vm551_vm2, %v2592_v61, %v2594_v17  ;;  %v6185_v17 = vld [vmem:[#allocation35_spill] sm:$0xff]  ;;  %v6190_v13 = vld [vmem:[#allocation20_spill] sm:$0xff] }
 0x1ce   : > { %v2589_v3 = vadd.f32 %v2585_v40, %v2576_v14  ;;  %v2617_v27 = vmul.f32 %v2613_v47, %v5874_v22  ;;  %v2710_v49 = vmul.f32 %v2613_v47, %v6179_v58  ;;  %v2676_v23 = vmul.f32 %v3455_v29, %v5512_v4 }
 0x1cf   : > { %2964 = vst [vmem:[%s3653_s24 + $0x1c8] sm:$0xff] %v2620_v26  ;;  %v2561_v10 = vadd.f32 %v2557_v18, %v2545_v32  ;;  %v2586_v45 = vmul.f32 %v3571_v39, %v5547_v42  ;;  %v2602_v63 = vmul.f32 %v2596_v51, %v6172_v9  ;;  %v2677_v43 = vmul.f32 %v3470_v35, %v5544_v50 }
 0x1d0   : > { %v2605_v33 = vadd.f32 %v2601_v30, %v2589_v3  ;;  %v2614_v5 = vsel %vm568_vm3, %v2610_v7, %v2608_v53  ;;  %v2695_v46 = vmul.f32 %v2596_v51, %v6181_v20  ;;  %v2680_v61 = vadd.f32 %v2676_v23, %v6184_v24 }
 0x1d1   : > { %v2577_v4 = vadd.f32 %v2573_v0, %v2561_v10  ;;  %v2618_v19 = vmul.f32 %v2614_v5, %v6185_v17  ;;  %v2681_v58 = vadd.f32 %v2677_v43, %v6186_v56  ;;  %v2678_v57 = vmul.f32 %v3455_v29, %v5521_v28 }
 0x1d2   : > { %v2621_v48 = vadd.f32 %v2617_v27, %v2605_v33  ;;  %v2696_v16 = vadd.f32 %v2692_v38, %v2680_v61  ;;  %v2720_v50 = vmul.f32 0.0, %v3542_v8  ;;  %v2679_v1 = vmul.f32 %v3470_v35, %v5547_v42  ;;  %v6189_v38 = vld [vmem:[#allocation29_spill] sm:$0xff] }
 0x1d3   : > { %v2590_v53 = vadd.f32 %v2586_v45, %v2577_v4  ;;  %v2697_v7 = vadd.f32 %v2693_v41, %v2681_v58  ;;  %v2721_v44 = vmul.f32 0.0, %v3571_v39  ;;  %v2682_v20 = vadd.f32 %v2678_v57, %v2670_v36 }
 0x1d4   : > { %2965 = vst [vmem:[%s3653_s24 + $0x1d0] sm:$0xff] %v2621_v48  ;;  %v2711_v0 = vmul.f32 %v2614_v5, %v6182_v12  ;;  %v2712_v18 = vadd.f32 %v2708_v31, %v2696_v16  ;;  %v2736_v15 = vmul.f32 %v6188_v25, %v6187_v21  ;;  %v2683_v29 = vadd.f32 %v2679_v1, %v2671_v6 }
 0x1d5   : > { %v2606_v28 = vadd.f32 %v2602_v63, %v2590_v53  ;;  %v2713_v60 = vadd.f32 %v2709_v59, %v2697_v7  ;;  %v2737_v8 = vmul.f32 %v6188_v25, %v6183_v62  ;;  %v2698_v35 = vadd.f32 %v2694_v34, %v2682_v20 }
 0x1d6   : > { %v2724_v42 = vadd.f32 %v2720_v50, %v2712_v18  ;;  %v2752_v39 = vmul.f32 %v6190_v13, %v6189_v38  ;;  %v2753_v36 = vmul.f32 %v6190_v13, %v3512_v52  ;;  %v2699_v12 = vadd.f32 %v2695_v46, %v2683_v29 }
 0x1d7   : > { %v2622_v54 = vadd.f32 %v2618_v19, %v2606_v28  ;;  %v2725_v40 = vadd.f32 %v2721_v44, %v2713_v60  ;;  %v2714_v6 = vadd.f32 %v2710_v49, %v2698_v35  ;;  %v2738_v2 = vmul.f32 %v6188_v25, %v5894_v11 }
 0x1d8   : > { %v2740_v31 = vadd.f32 %v2736_v15, %v2724_v42  ;;  %v2715_v62 = vadd.f32 %v2711_v0, %v2699_v12  ;;  %v2739_v55 = vmul.f32 %v6188_v25, %v6172_v9  ;;  %v2754_v52 = vmul.f32 %v6190_v13, %v5874_v22 }
 0x1d9   : > { %2966 = vst [vmem:[%s3653_s24 + $0x1d8] sm:$0xff] %v2622_v54  ;;  %v2741_v47 = vadd.f32 %v2737_v8, %v2725_v40  ;;  %v2726_v37 = vadd.f32 %v2720_v50, %v2714_v6  ;;  %v2755_v11 = vmul.f32 %v6190_v13, %v6185_v17 }
 0x1da   : > { %v2756_v41 = vadd.f32 %v2752_v39, %v2740_v31  ;;  %v2727_v59 = vadd.f32 %v2721_v44, %v2715_v62 }
 0x1db   : > { %v2757_v14 = vadd.f32 %v2753_v36, %v2741_v47  ;;  %v2742_v30 = vadd.f32 %v2738_v2, %v2726_v37 }
 0x1dc   : > { %2967 = vst [vmem:[%s3653_s24 + $0x1e0] sm:$0xff] %v2756_v41  ;;  %v2743_v9 = vadd.f32 %v2739_v55, %v2727_v59 }
 0x1dd   : > { %2968 = vst [vmem:[%s3653_s24 + $0x1e8] sm:$0xff] %v2757_v14  ;;  %v2758_v26 = vadd.f32 %v2754_v52, %v2742_v30 }
 0x1de   : > { %v2759_v22 = vadd.f32 %v2755_v11, %v2743_v9 }
 0x1df   : > { %2969 = vst [vmem:[%s3653_s24 + $0x1f0] sm:$0xff] %v2758_v26 }
 0x1e0   : > { %2970 = vst [vmem:[%s3653_s24 + $0x1f8] sm:$0xff] %v2759_v22 }
 0x1e1   : > { %3129 = shalt.err (!%p3126_p5)
}
 0x1e2   : > { %s3130_s25 = scalar_lea.hbm %s5641_s26, 8192  ;;  %s3134_s6 = scalar_lea.hbm %s5697_s3, 16384 }
 0x1e3   : > { %p3131_p9 = scmp.ne.s32.totalorder %s5641_s26, %s3130_s25  ;;  %p3135_p3 = scmp.lt.u32.totalorder %s5641_s26, %s5697_s3 }
 0x1e4   : > { %p3136_p7 = scmp.lt.u32.totalorder %s3134_s6, %s3130_s25  ;;  %p3138_p4 = scmp.lt.u32.totalorder %s3130_s25, %s5641_s26 }
 0x1e5   : > { %p3132_p1 = pnand %p3131_p9, %p3330_p10 }
 0x1e6   : > { %p3137_p13 = por %p3136_p7, %p3135_p3 }
 0x1e7   : > { %p3133_p2 = pneg %p3132_p1 }
 0x1e8   : > { %p3139_p6 = por %p3138_p4, %p3137_p13 }
 0x1ea   : > { %p3140_p8 = pnand %p3139_p6, %p3133_p2 }
 0x1ec   : > { %3143 = shalt.err (!%p3140_p8)
}
 0x1ed   : > { %s3212_s24 = smov 256   ;;  %s3213_s9 = smov 16  }
 0x1ee   : > { %2984 = dma.vmem_to_hbm [thread:$0]  (%p3330_p10), %s5643_s10, 8192, %s5641_s26, %s2766_s15, %s3212_s24, %s3212_s24, %s3213_s9  }
 0x1ef PF: > { %s2796_s11 = sand.u32 1, %s3182_s12   ;;  %p6191_p12 = scmp.ne.s32.totalorder %s5795_s23, 0 }
 0x1f0   : > { %p6192_p11 = scmp.ge.s32.totalorder %s3202_s17, 2  ;;  %s2797_s18 = scalar_lea.sflag [#allocation5], %s2796_s11 }
 0x1f2   : > { %p2995_p0 = pnand %p6192_p11, %p6191_p12 }
 0x1f4   : > { %3177 = dma.done.wait (!%p2995_p0), %s2797_s18, 8192  }
 0x1f5   : > { %3179 = vsyncadd (!%p2995_p0), %s2797_s18, 4294959104  ;;  %s20_s17 = sadd.s32 1, %s3202_s17   ;;  %s6193_s12 = smov %s3186_s13 }
 0x1f6   : > { %p17_p5 = scmp.ge.s32.totalorder %s20_s17, 4   ;;  %s6194_s13 = smov %s3190_s14 }
 0x1f7   : > { %s6195_s14 = smov %s3339_s5  ;;  %s6196_s15 = smov %s3198_s16 }
 0x1f8   : > { %s6197_s16 = smov %s6199_s28  ;;  %19 = sbr.rel (!%p17_p5) target bundleno = 7 (0x7), region = 125 }
 0x1ff   :  { %2802 = vsyncpa [#allocation4], 1 }
 0x200   :  { %2804 = vsyncpa [#allocation4 + $0x1], 1 }
 0x201   :  { %2805 = vsyncpa [#allocation7], 1 }
 0x202   :  { %2806 = vsyncpa [#allocation5], 1 }
 0x203   :  { %2808 = vsyncpa [#allocation5 + $0x1], 1 }

</bundles_post_ra>
